<compile_context>
chip_gen: v6e
topology: v6e:2x2x1
jax: 0.10.0
libtpu: 0.0.40
codegen_flags: <defaults>
</compile_context>

<pallas_src>
import functools

import jax
import jax.numpy as jnp
from jax.experimental import pallas as pl
from jax.experimental.pallas import tpu as pltpu


_NUM_CLASSES = 10
_LANES = 128                      # padded FC width (lane-dense FC outputs)
_MAX_IMGS_PER_STEP = 128          # conv grids: images per step (2048/1024 rows)
_MAX_FC_ROWS = 512                # FC-head grid: rows per step
_VMEM_LIMIT = 32 * 1024 * 1024    # safe on v5e/v6e (128 MiB) and v7x (64 MiB)


# ----------------------------- Pallas kernels ------------------------------

def _conv_relu_pool_kernel(xe_ref, xo_ref, band_ref, bias_ref, o_ref):
    """Fused 5x5 valid conv + bias + relu + 2x2 max-pool for a tile of images.

    xe/xo : (R, Win*Cin) bf16 — even-/odd-h input rows, lane-packed (w, c_in).
            R = imgs_per_step * S rows, S = per-image row slab (multiple of 8).
    band  : (10, Win*Cin, PW*Cout) bf16 — width-banded conv weights indexed by
            2*kh + w_parity; kw and c_in are folded into the contraction dim.
    bias  : (1, PW*Cout) f32 — conv bias tiled over pw.
    o     : (R, PW*Cout) bf16 — pool(relu(conv + b)); per-image tail rows
            (ph >= PH) are don't-care and are sliced off by the wrapper.
    """
    R = xe_ref.shape[0]
    xe = xe_ref[...]
    xo = xo_ref[...]

    def shift(y, d):
        # y[r] <- y[r + d]; the d zero rows land in per-image don't-care tails.
        if d == 0:
            return y
        pad = jnp.zeros((d,) + y.shape[1:], y.dtype)
        return jnp.concatenate([y[d:], pad], axis=0)

    zs = []
    for a in (0, 1):                      # output-h parity (pool rows)
        for b in (0, 1):                  # output-w parity (pool cols)
            by_d = [None, None, None]     # group the 5 kh taps by row shift d
            for kh in range(5):
                src = xe if (a + kh) % 2 == 0 else xo
                d = (a + kh) // 2
                y = jnp.dot(src, band_ref[2 * kh + b],
                            preferred_element_type=jnp.float32)
                by_d[d] = y if by_d[d] is None else by_d[d] + y
            zs.append(shift(by_d[0], 0) + shift(by_d[1], 1) + shift(by_d[2], 2))
    # 2x2 max-pool == max over the 4 parity accumulators (commutes with +b, relu)
    z = jnp.maximum(jnp.maximum(zs[0], zs[1]), jnp.maximum(zs[2], zs[3]))
    o_ref[...] = jnp.maximum(z + bias_ref[...], 0.0).astype(o_ref.dtype)


def _fc_head_kernel(x_ref, w1_ref, b1_ref, w2_ref, b2_ref, w3_ref, b3_ref,
                    o_ref, *, num_classes):
    """Fused fc1+relu -> fc2+relu -> fc3+log_softmax.

    Weights zero-padded to 128 output lanes; padded class lanes are masked to
    -1e30 before the softmax reduction (safe only because z stays f32)."""
    x = x_ref[...]                                               # (tm, 400) bf16
    h1 = jnp.dot(x, w1_ref[...], preferred_element_type=jnp.float32) + b1_ref[...]
    h1 = jnp.maximum(h1, 0.0)                                    # f32 (tm, 128)
    h2 = jnp.dot(h1.astype(jnp.bfloat16), w2_ref[...],
                 preferred_element_type=jnp.float32) + b2_ref[...]
    h2 = jnp.maximum(h2, 0.0)                                    # f32 (tm, 128)
    z = jnp.dot(h2.astype(jnp.bfloat16), w3_ref[...],
                preferred_element_type=jnp.float32) + b3_ref[...]
    lane = jax.lax.broadcasted_iota(jnp.int32, z.shape, 1)
    z = jnp.where(lane < num_classes, z, -1e30)                  # exclude padding
    m = jnp.max(z, axis=-1, keepdims=True)
    s = z - m
    lse = jnp.log(jnp.sum(jnp.exp(s), axis=-1, keepdims=True))
    o_ref[...] = (s - lse).astype(o_ref.dtype)


# ------------------------------ Pallas wrappers -----------------------------

def conv_relu_pool(xe, xo, band, bias, *, imgs, slab_rows, out_lanes):
    """xe/xo: (imgs*slab_rows, Kin) bf16; band: (10, Kin, F) bf16;
       bias: (1, F) f32 -> (imgs*slab_rows, F) bf16 (tail rows per image junk)."""
    rows, in_lanes = xe.shape
    tn = imgs if imgs <= _MAX_IMGS_PER_STEP else _MAX_IMGS_PER_STEP
    tr = tn * slab_rows                                  # multiple of 8
    return pl.pallas_call(
        _conv_relu_pool_kernel,
        out_shape=jax.ShapeDtypeStruct((rows, out_lanes), jnp.bfloat16),
        grid=(pl.cdiv(imgs, tn),),
        in_specs=[
            pl.BlockSpec((tr, in_lanes), lambda i: (i, 0)),
            pl.BlockSpec((tr, in_lanes), lambda i: (i, 0)),
            pl.BlockSpec(band.shape, lambda i: (0, 0, 0)),   # resident weights
            pl.BlockSpec(bias.shape, lambda i: (0, 0)),      # resident bias
        ],
        out_specs=pl.BlockSpec((tr, out_lanes), lambda i: (i, 0)),
        compiler_params=pltpu.CompilerParams(
            dimension_semantics=("parallel",),
            vmem_limit_bytes=_VMEM_LIMIT,
        ),
    )(xe, xo, band, bias)


def fc_head(x, w1, b1, w2, b2, w3, b3):
    """x: (M, 400) bf16; padded weights (., 128) bf16; biases (1, 128) f32.
       Returns (M, 128) f32 lane-dense padded log-probabilities."""
    M, K = x.shape
    tm = M if M <= _MAX_FC_ROWS else _MAX_FC_ROWS
    kern = functools.partial(_fc_head_kernel, num_classes=_NUM_CLASSES)
    const = lambda i: (0, 0)
    return pl.pallas_call(
        kern,
        out_shape=jax.ShapeDtypeStruct((M, _LANES), jnp.float32),
        grid=(pl.cdiv(M, tm),),
        in_specs=[
            pl.BlockSpec((tm, K), lambda i: (i, 0)),
            pl.BlockSpec((K, _LANES), const),
            pl.BlockSpec((1, _LANES), const),
            pl.BlockSpec((_LANES, _LANES), const),
            pl.BlockSpec((1, _LANES), const),
            pl.BlockSpec((_LANES, _LANES), const),
            pl.BlockSpec((1, _LANES), const),
        ],
        out_specs=pl.BlockSpec((tm, _LANES), lambda i: (i, 0)),
        compiler_params=pltpu.CompilerParams(
            dimension_semantics=("parallel",),
            vmem_limit_bytes=_VMEM_LIMIT,
        ),
    )(x, w1, b1, w2, b2, w3, b3)


# --------------------------------- Glue -------------------------------------

def _banded_conv_weights(w, w_in, pooled_w):
    """(Cout,Cin,5,5) conv weight -> (10, w_in*Cin, pooled_w*Cout) banded mats.

    band[2*kh + wpar][wi*Cin + ci, pw*Cout + co] =
        w[co, ci, kh, wi - (2*pw + wpar)]   (0 where the tap is out of range),
    so one matmul against a lane-packed (w, c_in) input row performs the conv
    over (kw, c_in) for every even-w (wpar=0) / odd-w (wpar=1) output column."""
    c_out, c_in, k, _ = w.shape
    wi = jnp.arange(w_in).reshape(w_in, 1, 1, 1)
    pw = jnp.arange(pooled_w).reshape(1, pooled_w, 1, 1)
    kw = jnp.arange(k).reshape(1, 1, k, 1)
    par = jnp.arange(2).reshape(1, 1, 1, 2)
    sel = (wi == 2 * pw + kw + par).astype(w.dtype)        # (Win, PW, K, 2)
    band = jnp.einsum('wpkb,oihk->hbwipo', sel, w)         # (K,2,Win,Cin,PW,Cout)
    return band.reshape(2 * k, w_in * c_in, pooled_w * c_out)


def _pad2(a, rows, cols):
    return jnp.pad(a, ((0, rows - a.shape[0]), (0, cols - a.shape[1])))


# ------------------------------ Model / params -------------------------------

def init_params(key):
    """Deterministic synthetic init (PyTorch-style uniform +-1/sqrt(fan_in))."""
    ks = jax.random.split(key, 10)

    def u(k, shape, fan_in):
        bound = 1.0 / jnp.sqrt(float(fan_in))
        return jax.random.uniform(k, shape, jnp.float32, -bound, bound)

    return {
        "conv1_w": u(ks[0], (6, 3, 5, 5), 3 * 5 * 5),
        "conv1_b": u(ks[1], (6,), 3 * 5 * 5),
        "conv2_w": u(ks[2], (16, 6, 5, 5), 6 * 5 * 5),
        "conv2_b": u(ks[3], (16,), 6 * 5 * 5),
        "fc1_w": u(ks[4], (120, 400), 400),
        "fc1_b": u(ks[5], (120,), 400),
        "fc2_w": u(ks[6], (84, 120), 120),
        "fc2_b": u(ks[7], (84,), 120),
        "fc3_w": u(ks[8], (10, 84), 84),
        "fc3_b": u(ks[9], (10,), 84),
    }


def lenet_cifar10_forward(x_nchw, params):
    """x: (N, 3, 32, 32) float32 -> log-probabilities (N, 10)."""
    N = x_nchw.shape[0]

    # ---- stage 1: conv1(3->6, 5x5) + relu + 2x2 maxpool ---------------------
    x = x_nchw.astype(jnp.bfloat16).transpose(0, 2, 3, 1).reshape(N, 32, 96)
    xe = x[:, 0::2, :].reshape(N * 16, 96)      # even-h rows, lane-packed (w,c)
    xo = x[:, 1::2, :].reshape(N * 16, 96)      # odd-h rows
    band1 = _banded_conv_weights(params["conv1_w"], 32, 14).astype(jnp.bfloat16)
    bias1 = jnp.tile(params["conv1_b"], 14).reshape(1, 84)
    y1 = conv_relu_pool(xe, xo, band1, bias1, imgs=N, slab_rows=16, out_lanes=84)
    y1 = y1.reshape(N, 16, 84)[:, :14, :]       # (N,14,84): rows=ph, lanes=(pw,c)

    # ---- stage 2: conv2(6->16, 5x5) + relu + 2x2 maxpool --------------------
    y1e = jnp.pad(y1[:, 0::2, :], ((0, 0), (0, 1), (0, 0))).reshape(N * 8, 84)
    y1o = jnp.pad(y1[:, 1::2, :], ((0, 0), (0, 1), (0, 0))).reshape(N * 8, 84)
    band2 = _banded_conv_weights(params["conv2_w"], 14, 5).astype(jnp.bfloat16)
    bias2 = jnp.tile(params["conv2_b"], 5).reshape(1, 80)
    y2 = conv_relu_pool(y1e, y1o, band2, bias2, imgs=N, slab_rows=8, out_lanes=80)
    y2 = y2.reshape(N, 8, 80)[:, :5, :]         # (N,5,80): rows=ph, lanes=(pw,c)

    # ---- stage 3: fused FC head (fc1+relu -> fc2+relu -> fc3+log_softmax) ---
    flat = y2.reshape(N, 400)                   # bf16, (h, w, c) feature order
    # permute fc1 columns from PyTorch's (c, h, w) flatten order to ours
    h_i = jnp.arange(5).reshape(5, 1, 1)
    w_i = jnp.arange(5).reshape(1, 5, 1)
    c_i = jnp.arange(16).reshape(1, 1, 16)
    perm = (c_i * 25 + h_i * 5 + w_i).reshape(-1)
    fw1 = _pad2(params["fc1_w"][:, perm].T, 400, _LANES).astype(jnp.bfloat16)
    fb1 = _pad2(params["fc1_b"].reshape(1, -1), 1, _LANES)
    fw2 = _pad2(params["fc2_w"].T, _LANES, _LANES).astype(jnp.bfloat16)
    fb2 = _pad2(params["fc2_b"].reshape(1, -1), 1, _LANES)
    fw3 = _pad2(params["fc3_w"].T, _LANES, _LANES).astype(jnp.bfloat16)
    fb3 = _pad2(params["fc3_b"].reshape(1, -1), 1, _LANES)
    out_padded = fc_head(flat, fw1, fb1, fw2, fb2, fw3, fb3)     # (N, 128) f32
    return out_padded[:, :_NUM_CLASSES]


# --------------------------- Pure-JAX reference ------------------------------

def _reference_forward(x_nchw, params):
    y = jax.lax.conv_general_dilated(
        x_nchw, params["conv1_w"], (1, 1), "VALID",
        dimension_numbers=("NCHW", "OIHW", "NCHW"))
    y = jnp.maximum(y + params["conv1_b"].reshape(1, -1, 1, 1), 0.0)
    y = jax.lax.reduce_window(y, -jnp.inf, jax.lax.max,
                              (1, 1, 2, 2), (1, 1, 2, 2), "VALID")
    y = jax.lax.conv_general_dilated(
        y, params["conv2_w"], (1, 1), "VALID",
        dimension_numbers=("NCHW", "OIHW", "NCHW"))
    y = jnp.maximum(y + params["conv2_b"].reshape(1, -1, 1, 1), 0.0)
    y = jax.lax.reduce_window(y, -jnp.inf, jax.lax.max,
                              (1, 1, 2, 2), (1, 1, 2, 2), "VALID")
    flat = y.reshape(y.shape[0], -1)
    h1 = jnp.maximum(flat @ params["fc1_w"].T + params["fc1_b"], 0.0)
    h2 = jnp.maximum(h1 @ params["fc2_w"].T + params["fc2_b"], 0.0)
    z = h2 @ params["fc3_w"].T + params["fc3_b"]
    return jax.nn.log_softmax(z, axis=-1)


# ----------------------------------- Main ------------------------------------

if __name__ == "__main__":
    key = jax.random.PRNGKey(0)
    k_x, k_p = jax.random.split(key)

    # CIFAR-10 sized input: the architecture requires 32x32x3 (fc1 = 16*5*5).
    x = jax.random.normal(k_x, (2, 3, 32, 32), dtype=jnp.float32)
    params = init_params(k_p)

    out = jax.jit(lenet_cifar10_forward)(x, params)
    out = jax.block_until_ready(out)

    assert out.shape == (2, 10), out.shape
    assert bool(jnp.all(jnp.isfinite(out)))
    # log_softmax rows should exponentiate to ~1
    row_sums = jnp.exp(out).sum(axis=1)
    assert bool(jnp.allclose(row_sums, 1.0, atol=1e-4)), row_sums
    # loose check vs f32 reference (kernels use bf16 MXU operands, f32 accum)
    ref = jax.jit(_reference_forward)(x, params)
    assert bool(jnp.allclose(out, ref, atol=0.25)), float(jnp.max(jnp.abs(out - ref)))

    print("KERNEL_OK")
</pallas_src>

<mosaic_0001>
module attributes {stable_mosaic.version = 11 : i64} {
  func.func @_conv_relu_pool_kernel(%arg0: i32, %arg1: memref<32x96xbf16, #tpu.memory_space<vmem>>, %arg2: memref<32x96xbf16, #tpu.memory_space<vmem>>, %arg3: memref<10x96x84xbf16, #tpu.memory_space<vmem>>, %arg4: memref<1x84xf32, #tpu.memory_space<vmem>>, %arg5: memref<32x84xbf16, #tpu.memory_space<vmem>>) attributes {dimension_semantics = [#tpu.dimension_semantics<parallel>], iteration_bounds = array<i64: 1>, scalar_prefetch = 0 : i64, scratch_operands = 0 : i64, tpu.core_type = #tpu.core_type<tc>, window_params = [{transform_indices = @transform_0, window_bounds = array<i64: 32, 96>}, {transform_indices = @transform_1, window_bounds = array<i64: 32, 96>}, {pipeline_mode = #tpu.pipeline_mode<synchronous>, transform_indices = @transform_2, window_bounds = array<i64: 10, 96, 84>}, {pipeline_mode = #tpu.pipeline_mode<synchronous>, transform_indices = @transform_3, window_bounds = array<i64: 1, 84>}, {transform_indices = @transform_4, window_bounds = array<i64: 32, 84>}]} {
    %c0 = arith.constant 0 : index
    %c0_0 = arith.constant 0 : index
    %0 = vector.load %arg1[%c0, %c0_0] : memref<32x96xbf16, #tpu.memory_space<vmem>>, vector<32x96xbf16>
    %c0_1 = arith.constant 0 : index
    %c0_2 = arith.constant 0 : index
    %1 = vector.load %arg2[%c0_1, %c0_2] : memref<32x96xbf16, #tpu.memory_space<vmem>>, vector<32x96xbf16>
    %c0_3 = arith.constant 0 : index
    %c0_4 = arith.constant 0 : index
    %c0_5 = arith.constant 0 : index
    %2 = vector.load %arg3[%c0_3, %c0_4, %c0_5] : memref<10x96x84xbf16, #tpu.memory_space<vmem>>, vector<1x96x84xbf16>
    %3 = vector.shape_cast %2 : vector<1x96x84xbf16> to vector<96x84xbf16>
    %cst = arith.constant dense<0.000000e+00> : vector<32x84xf32>
    %4 = tpu.matmul %0, %3, %cst {dimension_numbers = #tpu.dot_dimension_numbers<[1], [0], [0], [1], [0, 0, 1, 1], [], []>} : vector<32x96xbf16>, vector<96x84xbf16>, vector<32x84xf32> -> vector<32x84xf32>
    %c2 = arith.constant 2 : index
    %c0_6 = arith.constant 0 : index
    %c0_7 = arith.constant 0 : index
    %5 = vector.load %arg3[%c2, %c0_6, %c0_7] : memref<10x96x84xbf16, #tpu.memory_space<vmem>>, vector<1x96x84xbf16>
    %6 = vector.shape_cast %5 : vector<1x96x84xbf16> to vector<96x84xbf16>
    %cst_8 = arith.constant dense<0.000000e+00> : vector<32x84xf32>
    %7 = tpu.matmul %1, %6, %cst_8 {dimension_numbers = #tpu.dot_dimension_numbers<[1], [0], [0], [1], [0, 0, 1, 1], [], []>} : vector<32x96xbf16>, vector<96x84xbf16>, vector<32x84xf32> -> vector<32x84xf32>
    %8 = arith.addf %4, %7 : vector<32x84xf32>
    %c4 = arith.constant 4 : index
    %c0_9 = arith.constant 0 : index
    %c0_10 = arith.constant 0 : index
    %9 = vector.load %arg3[%c4, %c0_9, %c0_10] : memref<10x96x84xbf16, #tpu.memory_space<vmem>>, vector<1x96x84xbf16>
    %10 = vector.shape_cast %9 : vector<1x96x84xbf16> to vector<96x84xbf16>
    %cst_11 = arith.constant dense<0.000000e+00> : vector<32x84xf32>
    %11 = tpu.matmul %0, %10, %cst_11 {dimension_numbers = #tpu.dot_dimension_numbers<[1], [0], [0], [1], [0, 0, 1, 1], [], []>} : vector<32x96xbf16>, vector<96x84xbf16>, vector<32x84xf32> -> vector<32x84xf32>
    %c6 = arith.constant 6 : index
    %c0_12 = arith.constant 0 : index
    %c0_13 = arith.constant 0 : index
    %12 = vector.load %arg3[%c6, %c0_12, %c0_13] : memref<10x96x84xbf16, #tpu.memory_space<vmem>>, vector<1x96x84xbf16>
    %13 = vector.shape_cast %12 : vector<1x96x84xbf16> to vector<96x84xbf16>
    %cst_14 = arith.constant dense<0.000000e+00> : vector<32x84xf32>
    %14 = tpu.matmul %1, %13, %cst_14 {dimension_numbers = #tpu.dot_dimension_numbers<[1], [0], [0], [1], [0, 0, 1, 1], [], []>} : vector<32x96xbf16>, vector<96x84xbf16>, vector<32x84xf32> -> vector<32x84xf32>
    %15 = arith.addf %11, %14 : vector<32x84xf32>
    %c8 = arith.constant 8 : index
    %c0_15 = arith.constant 0 : index
    %c0_16 = arith.constant 0 : index
    %16 = vector.load %arg3[%c8, %c0_15, %c0_16] : memref<10x96x84xbf16, #tpu.memory_space<vmem>>, vector<1x96x84xbf16>
    %17 = vector.shape_cast %16 : vector<1x96x84xbf16> to vector<96x84xbf16>
    %cst_17 = arith.constant dense<0.000000e+00> : vector<32x84xf32>
    %18 = tpu.matmul %0, %17, %cst_17 {dimension_numbers = #tpu.dot_dimension_numbers<[1], [0], [0], [1], [0, 0, 1, 1], [], []>} : vector<32x96xbf16>, vector<96x84xbf16>, vector<32x84xf32> -> vector<32x84xf32>
    %cst_18 = arith.constant 0.000000e+00 : f32
    %19 = vector.broadcast %cst_18 : f32 to vector<1x84xf32>
    %20 = vector.extract_strided_slice %15 {offsets = [1, 0], sizes = [31, 84], strides = [1, 1]} : vector<32x84xf32> to vector<31x84xf32>
    %21 = tpu.concatenate %20, %19 in 0 : vector<31x84xf32>, vector<1x84xf32> -> vector<32x84xf32>
    %22 = arith.addf %8, %21 : vector<32x84xf32>
    %cst_19 = arith.constant 0.000000e+00 : f32
    %23 = vector.broadcast %cst_19 : f32 to vector<2x84xf32>
    %24 = vector.extract_strided_slice %18 {offsets = [2, 0], sizes = [30, 84], strides = [1, 1]} : vector<32x84xf32> to vector<30x84xf32>
    %25 = tpu.concatenate %24, %23 in 0 : vector<30x84xf32>, vector<2x84xf32> -> vector<32x84xf32>
    %26 = arith.addf %22, %25 : vector<32x84xf32>
    %c1 = arith.constant 1 : index
    %c0_20 = arith.constant 0 : index
    %c0_21 = arith.constant 0 : index
    %27 = vector.load %arg3[%c1, %c0_20, %c0_21] : memref<10x96x84xbf16, #tpu.memory_space<vmem>>, vector<1x96x84xbf16>
    %28 = vector.shape_cast %27 : vector<1x96x84xbf16> to vector<96x84xbf16>
    %cst_22 = arith.constant dense<0.000000e+00> : vector<32x84xf32>
    %29 = tpu.matmul %0, %28, %cst_22 {dimension_numbers = #tpu.dot_dimension_numbers<[1], [0], [0], [1], [0, 0, 1, 1], [], []>} : vector<32x96xbf16>, vector<96x84xbf16>, vector<32x84xf32> -> vector<32x84xf32>
    %c3 = arith.constant 3 : index
    %c0_23 = arith.constant 0 : index
    %c0_24 = arith.constant 0 : index
    %30 = vector.load %arg3[%c3, %c0_23, %c0_24] : memref<10x96x84xbf16, #tpu.memory_space<vmem>>, vector<1x96x84xbf16>
    %31 = vector.shape_cast %30 : vector<1x96x84xbf16> to vector<96x84xbf16>
    %cst_25 = arith.constant dense<0.000000e+00> : vector<32x84xf32>
    %32 = tpu.matmul %1, %31, %cst_25 {dimension_numbers = #tpu.dot_dimension_numbers<[1], [0], [0], [1], [0, 0, 1, 1], [], []>} : vector<32x96xbf16>, vector<96x84xbf16>, vector<32x84xf32> -> vector<32x84xf32>
    %33 = arith.addf %29, %32 : vector<32x84xf32>
    %c5 = arith.constant 5 : index
    %c0_26 = arith.constant 0 : index
    %c0_27 = arith.constant 0 : index
    %34 = vector.load %arg3[%c5, %c0_26, %c0_27] : memref<10x96x84xbf16, #tpu.memory_space<vmem>>, vector<1x96x84xbf16>
    %35 = vector.shape_cast %34 : vector<1x96x84xbf16> to vector<96x84xbf16>
    %cst_28 = arith.constant dense<0.000000e+00> : vector<32x84xf32>
    %36 = tpu.matmul %0, %35, %cst_28 {dimension_numbers = #tpu.dot_dimension_numbers<[1], [0], [0], [1], [0, 0, 1, 1], [], []>} : vector<32x96xbf16>, vector<96x84xbf16>, vector<32x84xf32> -> vector<32x84xf32>
    %c7 = arith.constant 7 : index
    %c0_29 = arith.constant 0 : index
    %c0_30 = arith.constant 0 : index
    %37 = vector.load %arg3[%c7, %c0_29, %c0_30] : memref<10x96x84xbf16, #tpu.memory_space<vmem>>, vector<1x96x84xbf16>
    %38 = vector.shape_cast %37 : vector<1x96x84xbf16> to vector<96x84xbf16>
    %cst_31 = arith.constant dense<0.000000e+00> : vector<32x84xf32>
    %39 = tpu.matmul %1, %38, %cst_31 {dimension_numbers = #tpu.dot_dimension_numbers<[1], [0], [0], [1], [0, 0, 1, 1], [], []>} : vector<32x96xbf16>, vector<96x84xbf16>, vector<32x84xf32> -> vector<32x84xf32>
    %40 = arith.addf %36, %39 : vector<32x84xf32>
    %c9 = arith.constant 9 : index
    %c0_32 = arith.constant 0 : index
    %c0_33 = arith.constant 0 : index
    %41 = vector.load %arg3[%c9, %c0_32, %c0_33] : memref<10x96x84xbf16, #tpu.memory_space<vmem>>, vector<1x96x84xbf16>
    %42 = vector.shape_cast %41 : vector<1x96x84xbf16> to vector<96x84xbf16>
    %cst_34 = arith.constant dense<0.000000e+00> : vector<32x84xf32>
    %43 = tpu.matmul %0, %42, %cst_34 {dimension_numbers = #tpu.dot_dimension_numbers<[1], [0], [0], [1], [0, 0, 1, 1], [], []>} : vector<32x96xbf16>, vector<96x84xbf16>, vector<32x84xf32> -> vector<32x84xf32>
    %cst_35 = arith.constant 0.000000e+00 : f32
    %44 = vector.broadcast %cst_35 : f32 to vector<1x84xf32>
    %45 = vector.extract_strided_slice %40 {offsets = [1, 0], sizes = [31, 84], strides = [1, 1]} : vector<32x84xf32> to vector<31x84xf32>
    %46 = tpu.concatenate %45, %44 in 0 : vector<31x84xf32>, vector<1x84xf32> -> vector<32x84xf32>
    %47 = arith.addf %33, %46 : vector<32x84xf32>
    %cst_36 = arith.constant 0.000000e+00 : f32
    %48 = vector.broadcast %cst_36 : f32 to vector<2x84xf32>
    %49 = vector.extract_strided_slice %43 {offsets = [2, 0], sizes = [30, 84], strides = [1, 1]} : vector<32x84xf32> to vector<30x84xf32>
    %50 = tpu.concatenate %49, %48 in 0 : vector<30x84xf32>, vector<2x84xf32> -> vector<32x84xf32>
    %51 = arith.addf %47, %50 : vector<32x84xf32>
    %c0_37 = arith.constant 0 : index
    %c0_38 = arith.constant 0 : index
    %c0_39 = arith.constant 0 : index
    %52 = vector.load %arg3[%c0_37, %c0_38, %c0_39] : memref<10x96x84xbf16, #tpu.memory_space<vmem>>, vector<1x96x84xbf16>
    %53 = vector.shape_cast %52 : vector<1x96x84xbf16> to vector<96x84xbf16>
    %cst_40 = arith.constant dense<0.000000e+00> : vector<32x84xf32>
    %54 = tpu.matmul %1, %53, %cst_40 {dimension_numbers = #tpu.dot_dimension_numbers<[1], [0], [0], [1], [0, 0, 1, 1], [], []>} : vector<32x96xbf16>, vector<96x84xbf16>, vector<32x84xf32> -> vector<32x84xf32>
    %c2_41 = arith.constant 2 : index
    %c0_42 = arith.constant 0 : index
    %c0_43 = arith.constant 0 : index
    %55 = vector.load %arg3[%c2_41, %c0_42, %c0_43] : memref<10x96x84xbf16, #tpu.memory_space<vmem>>, vector<1x96x84xbf16>
    %56 = vector.shape_cast %55 : vector<1x96x84xbf16> to vector<96x84xbf16>
    %cst_44 = arith.constant dense<0.000000e+00> : vector<32x84xf32>
    %57 = tpu.matmul %0, %56, %cst_44 {dimension_numbers = #tpu.dot_dimension_numbers<[1], [0], [0], [1], [0, 0, 1, 1], [], []>} : vector<32x96xbf16>, vector<96x84xbf16>, vector<32x84xf32> -> vector<32x84xf32>
    %c4_45 = arith.constant 4 : index
    %c0_46 = arith.constant 0 : index
    %c0_47 = arith.constant 0 : index
    %58 = vector.load %arg3[%c4_45, %c0_46, %c0_47] : memref<10x96x84xbf16, #tpu.memory_space<vmem>>, vector<1x96x84xbf16>
    %59 = vector.shape_cast %58 : vector<1x96x84xbf16> to vector<96x84xbf16>
    %cst_48 = arith.constant dense<0.000000e+00> : vector<32x84xf32>
    %60 = tpu.matmul %1, %59, %cst_48 {dimension_numbers = #tpu.dot_dimension_numbers<[1], [0], [0], [1], [0, 0, 1, 1], [], []>} : vector<32x96xbf16>, vector<96x84xbf16>, vector<32x84xf32> -> vector<32x84xf32>
    %61 = arith.addf %57, %60 : vector<32x84xf32>
    %c6_49 = arith.constant 6 : index
    %c0_50 = arith.constant 0 : index
    %c0_51 = arith.constant 0 : index
    %62 = vector.load %arg3[%c6_49, %c0_50, %c0_51] : memref<10x96x84xbf16, #tpu.memory_space<vmem>>, vector<1x96x84xbf16>
    %63 = vector.shape_cast %62 : vector<1x96x84xbf16> to vector<96x84xbf16>
    %cst_52 = arith.constant dense<0.000000e+00> : vector<32x84xf32>
    %64 = tpu.matmul %0, %63, %cst_52 {dimension_numbers = #tpu.dot_dimension_numbers<[1], [0], [0], [1], [0, 0, 1, 1], [], []>} : vector<32x96xbf16>, vector<96x84xbf16>, vector<32x84xf32> -> vector<32x84xf32>
    %c8_53 = arith.constant 8 : index
    %c0_54 = arith.constant 0 : index
    %c0_55 = arith.constant 0 : index
    %65 = vector.load %arg3[%c8_53, %c0_54, %c0_55] : memref<10x96x84xbf16, #tpu.memory_space<vmem>>, vector<1x96x84xbf16>
    %66 = vector.shape_cast %65 : vector<1x96x84xbf16> to vector<96x84xbf16>
    %cst_56 = arith.constant dense<0.000000e+00> : vector<32x84xf32>
    %67 = tpu.matmul %1, %66, %cst_56 {dimension_numbers = #tpu.dot_dimension_numbers<[1], [0], [0], [1], [0, 0, 1, 1], [], []>} : vector<32x96xbf16>, vector<96x84xbf16>, vector<32x84xf32> -> vector<32x84xf32>
    %68 = arith.addf %64, %67 : vector<32x84xf32>
    %cst_57 = arith.constant 0.000000e+00 : f32
    %69 = vector.broadcast %cst_57 : f32 to vector<1x84xf32>
    %70 = vector.extract_strided_slice %61 {offsets = [1, 0], sizes = [31, 84], strides = [1, 1]} : vector<32x84xf32> to vector<31x84xf32>
    %71 = tpu.concatenate %70, %69 in 0 : vector<31x84xf32>, vector<1x84xf32> -> vector<32x84xf32>
    %72 = arith.addf %54, %71 : vector<32x84xf32>
    %cst_58 = arith.constant 0.000000e+00 : f32
    %73 = vector.broadcast %cst_58 : f32 to vector<2x84xf32>
    %74 = vector.extract_strided_slice %68 {offsets = [2, 0], sizes = [30, 84], strides = [1, 1]} : vector<32x84xf32> to vector<30x84xf32>
    %75 = tpu.concatenate %74, %73 in 0 : vector<30x84xf32>, vector<2x84xf32> -> vector<32x84xf32>
    %76 = arith.addf %72, %75 : vector<32x84xf32>
    %c1_59 = arith.constant 1 : index
    %c0_60 = arith.constant 0 : index
    %c0_61 = arith.constant 0 : index
    %77 = vector.load %arg3[%c1_59, %c0_60, %c0_61] : memref<10x96x84xbf16, #tpu.memory_space<vmem>>, vector<1x96x84xbf16>
    %78 = vector.shape_cast %77 : vector<1x96x84xbf16> to vector<96x84xbf16>
    %cst_62 = arith.constant dense<0.000000e+00> : vector<32x84xf32>
    %79 = tpu.matmul %1, %78, %cst_62 {dimension_numbers = #tpu.dot_dimension_numbers<[1], [0], [0], [1], [0, 0, 1, 1], [], []>} : vector<32x96xbf16>, vector<96x84xbf16>, vector<32x84xf32> -> vector<32x84xf32>
    %c3_63 = arith.constant 3 : index
    %c0_64 = arith.constant 0 : index
    %c0_65 = arith.constant 0 : index
    %80 = vector.load %arg3[%c3_63, %c0_64, %c0_65] : memref<10x96x84xbf16, #tpu.memory_space<vmem>>, vector<1x96x84xbf16>
    %81 = vector.shape_cast %80 : vector<1x96x84xbf16> to vector<96x84xbf16>
    %cst_66 = arith.constant dense<0.000000e+00> : vector<32x84xf32>
    %82 = tpu.matmul %0, %81, %cst_66 {dimension_numbers = #tpu.dot_dimension_numbers<[1], [0], [0], [1], [0, 0, 1, 1], [], []>} : vector<32x96xbf16>, vector<96x84xbf16>, vector<32x84xf32> -> vector<32x84xf32>
    %c5_67 = arith.constant 5 : index
    %c0_68 = arith.constant 0 : index
    %c0_69 = arith.constant 0 : index
    %83 = vector.load %arg3[%c5_67, %c0_68, %c0_69] : memref<10x96x84xbf16, #tpu.memory_space<vmem>>, vector<1x96x84xbf16>
    %84 = vector.shape_cast %83 : vector<1x96x84xbf16> to vector<96x84xbf16>
    %cst_70 = arith.constant dense<0.000000e+00> : vector<32x84xf32>
    %85 = tpu.matmul %1, %84, %cst_70 {dimension_numbers = #tpu.dot_dimension_numbers<[1], [0], [0], [1], [0, 0, 1, 1], [], []>} : vector<32x96xbf16>, vector<96x84xbf16>, vector<32x84xf32> -> vector<32x84xf32>
    %86 = arith.addf %82, %85 : vector<32x84xf32>
    %c7_71 = arith.constant 7 : index
    %c0_72 = arith.constant 0 : index
    %c0_73 = arith.constant 0 : index
    %87 = vector.load %arg3[%c7_71, %c0_72, %c0_73] : memref<10x96x84xbf16, #tpu.memory_space<vmem>>, vector<1x96x84xbf16>
    %88 = vector.shape_cast %87 : vector<1x96x84xbf16> to vector<96x84xbf16>
    %cst_74 = arith.constant dense<0.000000e+00> : vector<32x84xf32>
    %89 = tpu.matmul %0, %88, %cst_74 {dimension_numbers = #tpu.dot_dimension_numbers<[1], [0], [0], [1], [0, 0, 1, 1], [], []>} : vector<32x96xbf16>, vector<96x84xbf16>, vector<32x84xf32> -> vector<32x84xf32>
    %c9_75 = arith.constant 9 : index
    %c0_76 = arith.constant 0 : index
    %c0_77 = arith.constant 0 : index
    %90 = vector.load %arg3[%c9_75, %c0_76, %c0_77] : memref<10x96x84xbf16, #tpu.memory_space<vmem>>, vector<1x96x84xbf16>
    %91 = vector.shape_cast %90 : vector<1x96x84xbf16> to vector<96x84xbf16>
    %cst_78 = arith.constant dense<0.000000e+00> : vector<32x84xf32>
    %92 = tpu.matmul %1, %91, %cst_78 {dimension_numbers = #tpu.dot_dimension_numbers<[1], [0], [0], [1], [0, 0, 1, 1], [], []>} : vector<32x96xbf16>, vector<96x84xbf16>, vector<32x84xf32> -> vector<32x84xf32>
    %93 = arith.addf %89, %92 : vector<32x84xf32>
    %cst_79 = arith.constant 0.000000e+00 : f32
    %94 = vector.broadcast %cst_79 : f32 to vector<1x84xf32>
    %95 = vector.extract_strided_slice %86 {offsets = [1, 0], sizes = [31, 84], strides = [1, 1]} : vector<32x84xf32> to vector<31x84xf32>
    %96 = tpu.concatenate %95, %94 in 0 : vector<31x84xf32>, vector<1x84xf32> -> vector<32x84xf32>
    %97 = arith.addf %79, %96 : vector<32x84xf32>
    %cst_80 = arith.constant 0.000000e+00 : f32
    %98 = vector.broadcast %cst_80 : f32 to vector<2x84xf32>
    %99 = vector.extract_strided_slice %93 {offsets = [2, 0], sizes = [30, 84], strides = [1, 1]} : vector<32x84xf32> to vector<30x84xf32>
    %100 = tpu.concatenate %99, %98 in 0 : vector<30x84xf32>, vector<2x84xf32> -> vector<32x84xf32>
    %101 = arith.addf %97, %100 : vector<32x84xf32>
    %102 = arith.maximumf %26, %51 : vector<32x84xf32>
    %103 = arith.maximumf %76, %101 : vector<32x84xf32>
    %104 = arith.maximumf %102, %103 : vector<32x84xf32>
    %c0_81 = arith.constant 0 : index
    %c0_82 = arith.constant 0 : index
    %105 = vector.load %arg4[%c0_81, %c0_82] : memref<1x84xf32, #tpu.memory_space<vmem>>, vector<1x84xf32>
    %106 = vector.broadcast %105 : vector<1x84xf32> to vector<32x84xf32>
    %107 = arith.addf %104, %106 : vector<32x84xf32>
    %cst_83 = arith.constant 0.000000e+00 : f32
    %108 = vector.broadcast %cst_83 : f32 to vector<32x84xf32>
    %109 = arith.maximumf %107, %108 : vector<32x84xf32>
    %110 = arith.truncf %109 : vector<32x84xf32> to vector<32x84xbf16>
    %c0_84 = arith.constant 0 : index
    %c0_85 = arith.constant 0 : index
    %111 = vector.load %arg5[%c0_84, %c0_85] : memref<32x84xbf16, #tpu.memory_space<vmem>>, vector<32x84xbf16>
    tpu.vector_store %arg5[%c0_84, %c0_85], %110 {strides = array<i32>} : memref<32x84xbf16, #tpu.memory_space<vmem>>, vector<32x84xbf16>,
    return
  }
  func.func @transform_0(%arg0: i32) -> (i32, i32) {
    %c0_i32 = arith.constant 0 : i32
    %c0_i32_0 = arith.constant 0 : i32
    return %arg0, %c0_i32 : i32, i32
  }
  func.func @transform_1(%arg0: i32) -> (i32, i32) {
    %c0_i32 = arith.constant 0 : i32
    %c0_i32_0 = arith.constant 0 : i32
    return %arg0, %c0_i32 : i32, i32
  }
  func.func @transform_2(%arg0: i32) -> (i32, i32, i32) {
    %c0_i32 = arith.constant 0 : i32
    %c0_i32_0 = arith.constant 0 : i32
    %c0_i32_1 = arith.constant 0 : i32
    %c0_i32_2 = arith.constant 0 : i32
    return %c0_i32, %c0_i32_0, %c0_i32_1 : i32, i32, i32
  }
  func.func @transform_3(%arg0: i32) -> (i32, i32) {
    %c0_i32 = arith.constant 0 : i32
    %c0_i32_0 = arith.constant 0 : i32
    %c0_i32_1 = arith.constant 0 : i32
    return %c0_i32, %c0_i32_0 : i32, i32
  }
  func.func @transform_4(%arg0: i32) -> (i32, i32) {
    %c0_i32 = arith.constant 0 : i32
    %c0_i32_0 = arith.constant 0 : i32
    return %arg0, %c0_i32 : i32, i32
  }
}

module attributes {stable_mosaic.version = 11 : i64} {
  func.func @_conv_relu_pool_kernel(%arg0: i32, %arg1: memref<16x84xbf16, #tpu.memory_space<vmem>>, %arg2: memref<16x84xbf16, #tpu.memory_space<vmem>>, %arg3: memref<10x84x80xbf16, #tpu.memory_space<vmem>>, %arg4: memref<1x80xf32, #tpu.memory_space<vmem>>, %arg5: memref<16x80xbf16, #tpu.memory_space<vmem>>) attributes {dimension_semantics = [#tpu.dimension_semantics<parallel>], iteration_bounds = array<i64: 1>, scalar_prefetch = 0 : i64, scratch_operands = 0 : i64, tpu.core_type = #tpu.core_type<tc>, window_params = [{transform_indices = @transform_0, window_bounds = array<i64: 16, 84>}, {transform_indices = @transform_1, window_bounds = array<i64: 16, 84>}, {pipeline_mode = #tpu.pipeline_mode<synchronous>, transform_indices = @transform_2, window_bounds = array<i64: 10, 84, 80>}, {pipeline_mode = #tpu.pipeline_mode<synchronous>, transform_indices = @transform_3, window_bounds = array<i64: 1, 80>}, {transform_indices = @transform_4, window_bounds = array<i64: 16, 80>}]} {
    %c0 = arith.constant 0 : index
    %c0_0 = arith.constant 0 : index
    %0 = vector.load %arg1[%c0, %c0_0] : memref<16x84xbf16, #tpu.memory_space<vmem>>, vector<16x84xbf16>
    %c0_1 = arith.constant 0 : index
    %c0_2 = arith.constant 0 : index
    %1 = vector.load %arg2[%c0_1, %c0_2] : memref<16x84xbf16, #tpu.memory_space<vmem>>, vector<16x84xbf16>
    %c0_3 = arith.constant 0 : index
    %c0_4 = arith.constant 0 : index
    %c0_5 = arith.constant 0 : index
    %2 = vector.load %arg3[%c0_3, %c0_4, %c0_5] : memref<10x84x80xbf16, #tpu.memory_space<vmem>>, vector<1x84x80xbf16>
    %3 = vector.shape_cast %2 : vector<1x84x80xbf16> to vector<84x80xbf16>
    %cst = arith.constant dense<0.000000e+00> : vector<16x80xf32>
    %4 = tpu.matmul %0, %3, %cst {dimension_numbers = #tpu.dot_dimension_numbers<[1], [0], [0], [1], [0, 0, 1, 1], [], []>} : vector<16x84xbf16>, vector<84x80xbf16>, vector<16x80xf32> -> vector<16x80xf32>
    %c2 = arith.constant 2 : index
    %c0_6 = arith.constant 0 : index
    %c0_7 = arith.constant 0 : index
    %5 = vector.load %arg3[%c2, %c0_6, %c0_7] : memref<10x84x80xbf16, #tpu.memory_space<vmem>>, vector<1x84x80xbf16>
    %6 = vector.shape_cast %5 : vector<1x84x80xbf16> to vector<84x80xbf16>
    %cst_8 = arith.constant dense<0.000000e+00> : vector<16x80xf32>
    %7 = tpu.matmul %1, %6, %cst_8 {dimension_numbers = #tpu.dot_dimension_numbers<[1], [0], [0], [1], [0, 0, 1, 1], [], []>} : vector<16x84xbf16>, vector<84x80xbf16>, vector<16x80xf32> -> vector<16x80xf32>
    %8 = arith.addf %4, %7 : vector<16x80xf32>
    %c4 = arith.constant 4 : index
    %c0_9 = arith.constant 0 : index
    %c0_10 = arith.constant 0 : index
    %9 = vector.load %arg3[%c4, %c0_9, %c0_10] : memref<10x84x80xbf16, #tpu.memory_space<vmem>>, vector<1x84x80xbf16>
    %10 = vector.shape_cast %9 : vector<1x84x80xbf16> to vector<84x80xbf16>
    %cst_11 = arith.constant dense<0.000000e+00> : vector<16x80xf32>
    %11 = tpu.matmul %0, %10, %cst_11 {dimension_numbers = #tpu.dot_dimension_numbers<[1], [0], [0], [1], [0, 0, 1, 1], [], []>} : vector<16x84xbf16>, vector<84x80xbf16>, vector<16x80xf32> -> vector<16x80xf32>
    %c6 = arith.constant 6 : index
    %c0_12 = arith.constant 0 : index
    %c0_13 = arith.constant 0 : index
    %12 = vector.load %arg3[%c6, %c0_12, %c0_13] : memref<10x84x80xbf16, #tpu.memory_space<vmem>>, vector<1x84x80xbf16>
    %13 = vector.shape_cast %12 : vector<1x84x80xbf16> to vector<84x80xbf16>
    %cst_14 = arith.constant dense<0.000000e+00> : vector<16x80xf32>
    %14 = tpu.matmul %1, %13, %cst_14 {dimension_numbers = #tpu.dot_dimension_numbers<[1], [0], [0], [1], [0, 0, 1, 1], [], []>} : vector<16x84xbf16>, vector<84x80xbf16>, vector<16x80xf32> -> vector<16x80xf32>
    %15 = arith.addf %11, %14 : vector<16x80xf32>
    %c8 = arith.constant 8 : index
    %c0_15 = arith.constant 0 : index
    %c0_16 = arith.constant 0 : index
    %16 = vector.load %arg3[%c8, %c0_15, %c0_16] : memref<10x84x80xbf16, #tpu.memory_space<vmem>>, vector<1x84x80xbf16>
    %17 = vector.shape_cast %16 : vector<1x84x80xbf16> to vector<84x80xbf16>
    %cst_17 = arith.constant dense<0.000000e+00> : vector<16x80xf32>
    %18 = tpu.matmul %0, %17, %cst_17 {dimension_numbers = #tpu.dot_dimension_numbers<[1], [0], [0], [1], [0, 0, 1, 1], [], []>} : vector<16x84xbf16>, vector<84x80xbf16>, vector<16x80xf32> -> vector<16x80xf32>
    %cst_18 = arith.constant 0.000000e+00 : f32
    %19 = vector.broadcast %cst_18 : f32 to vector<1x80xf32>
    %20 = vector.extract_strided_slice %15 {offsets = [1, 0], sizes = [15, 80], strides = [1, 1]} : vector<16x80xf32> to vector<15x80xf32>
    %21 = tpu.concatenate %20, %19 in 0 : vector<15x80xf32>, vector<1x80xf32> -> vector<16x80xf32>
    %22 = arith.addf %8, %21 : vector<16x80xf32>
    %cst_19 = arith.constant 0.000000e+00 : f32
    %23 = vector.broadcast %cst_19 : f32 to vector<2x80xf32>
    %24 = vector.extract_strided_slice %18 {offsets = [2, 0], sizes = [14, 80], strides = [1, 1]} : vector<16x80xf32> to vector<14x80xf32>
    %25 = tpu.concatenate %24, %23 in 0 : vector<14x80xf32>, vector<2x80xf32> -> vector<16x80xf32>
    %26 = arith.addf %22, %25 : vector<16x80xf32>
    %c1 = arith.constant 1 : index
    %c0_20 = arith.constant 0 : index
    %c0_21 = arith.constant 0 : index
    %27 = vector.load %arg3[%c1, %c0_20, %c0_21] : memref<10x84x80xbf16, #tpu.memory_space<vmem>>, vector<1x84x80xbf16>
    %28 = vector.shape_cast %27 : vector<1x84x80xbf16> to vector<84x80xbf16>
    %cst_22 = arith.constant dense<0.000000e+00> : vector<16x80xf32>
    %29 = tpu.matmul %0, %28, %cst_22 {dimension_numbers = #tpu.dot_dimension_numbers<[1], [0], [0], [1], [0, 0, 1, 1], [], []>} : vector<16x84xbf16>, vector<84x80xbf16>, vector<16x80xf32> -> vector<16x80xf32>
    %c3 = arith.constant 3 : index
    %c0_23 = arith.constant 0 : index
    %c0_24 = arith.constant 0 : index
    %30 = vector.load %arg3[%c3, %c0_23, %c0_24] : memref<10x84x80xbf16, #tpu.memory_space<vmem>>, vector<1x84x80xbf16>
    %31 = vector.shape_cast %30 : vector<1x84x80xbf16> to vector<84x80xbf16>
    %cst_25 = arith.constant dense<0.000000e+00> : vector<16x80xf32>
    %32 = tpu.matmul %1, %31, %cst_25 {dimension_numbers = #tpu.dot_dimension_numbers<[1], [0], [0], [1], [0, 0, 1, 1], [], []>} : vector<16x84xbf16>, vector<84x80xbf16>, vector<16x80xf32> -> vector<16x80xf32>
    %33 = arith.addf %29, %32 : vector<16x80xf32>
    %c5 = arith.constant 5 : index
    %c0_26 = arith.constant 0 : index
    %c0_27 = arith.constant 0 : index
    %34 = vector.load %arg3[%c5, %c0_26, %c0_27] : memref<10x84x80xbf16, #tpu.memory_space<vmem>>, vector<1x84x80xbf16>
    %35 = vector.shape_cast %34 : vector<1x84x80xbf16> to vector<84x80xbf16>
    %cst_28 = arith.constant dense<0.000000e+00> : vector<16x80xf32>
    %36 = tpu.matmul %0, %35, %cst_28 {dimension_numbers = #tpu.dot_dimension_numbers<[1], [0], [0], [1], [0, 0, 1, 1], [], []>} : vector<16x84xbf16>, vector<84x80xbf16>, vector<16x80xf32> -> vector<16x80xf32>
    %c7 = arith.constant 7 : index
    %c0_29 = arith.constant 0 : index
    %c0_30 = arith.constant 0 : index
    %37 = vector.load %arg3[%c7, %c0_29, %c0_30] : memref<10x84x80xbf16, #tpu.memory_space<vmem>>, vector<1x84x80xbf16>
    %38 = vector.shape_cast %37 : vector<1x84x80xbf16> to vector<84x80xbf16>
    %cst_31 = arith.constant dense<0.000000e+00> : vector<16x80xf32>
    %39 = tpu.matmul %1, %38, %cst_31 {dimension_numbers = #tpu.dot_dimension_numbers<[1], [0], [0], [1], [0, 0, 1, 1], [], []>} : vector<16x84xbf16>, vector<84x80xbf16>, vector<16x80xf32> -> vector<16x80xf32>
    %40 = arith.addf %36, %39 : vector<16x80xf32>
    %c9 = arith.constant 9 : index
    %c0_32 = arith.constant 0 : index
    %c0_33 = arith.constant 0 : index
    %41 = vector.load %arg3[%c9, %c0_32, %c0_33] : memref<10x84x80xbf16, #tpu.memory_space<vmem>>, vector<1x84x80xbf16>
    %42 = vector.shape_cast %41 : vector<1x84x80xbf16> to vector<84x80xbf16>
    %cst_34 = arith.constant dense<0.000000e+00> : vector<16x80xf32>
    %43 = tpu.matmul %0, %42, %cst_34 {dimension_numbers = #tpu.dot_dimension_numbers<[1], [0], [0], [1], [0, 0, 1, 1], [], []>} : vector<16x84xbf16>, vector<84x80xbf16>, vector<16x80xf32> -> vector<16x80xf32>
    %cst_35 = arith.constant 0.000000e+00 : f32
    %44 = vector.broadcast %cst_35 : f32 to vector<1x80xf32>
    %45 = vector.extract_strided_slice %40 {offsets = [1, 0], sizes = [15, 80], strides = [1, 1]} : vector<16x80xf32> to vector<15x80xf32>
    %46 = tpu.concatenate %45, %44 in 0 : vector<15x80xf32>, vector<1x80xf32> -> vector<16x80xf32>
    %47 = arith.addf %33, %46 : vector<16x80xf32>
    %cst_36 = arith.constant 0.000000e+00 : f32
    %48 = vector.broadcast %cst_36 : f32 to vector<2x80xf32>
    %49 = vector.extract_strided_slice %43 {offsets = [2, 0], sizes = [14, 80], strides = [1, 1]} : vector<16x80xf32> to vector<14x80xf32>
    %50 = tpu.concatenate %49, %48 in 0 : vector<14x80xf32>, vector<2x80xf32> -> vector<16x80xf32>
    %51 = arith.addf %47, %50 : vector<16x80xf32>
    %c0_37 = arith.constant 0 : index
    %c0_38 = arith.constant 0 : index
    %c0_39 = arith.constant 0 : index
    %52 = vector.load %arg3[%c0_37, %c0_38, %c0_39] : memref<10x84x80xbf16, #tpu.memory_space<vmem>>, vector<1x84x80xbf16>
    %53 = vector.shape_cast %52 : vector<1x84x80xbf16> to vector<84x80xbf16>
    %cst_40 = arith.constant dense<0.000000e+00> : vector<16x80xf32>
    %54 = tpu.matmul %1, %53, %cst_40 {dimension_numbers = #tpu.dot_dimension_numbers<[1], [0], [0], [1], [0, 0, 1, 1], [], []>} : vector<16x84xbf16>, vector<84x80xbf16>, vector<16x80xf32> -> vector<16x80xf32>
    %c2_41 = arith.constant 2 : index
    %c0_42 = arith.constant 0 : index
    %c0_43 = arith.constant 0 : index
    %55 = vector.load %arg3[%c2_41, %c0_42, %c0_43] : memref<10x84x80xbf16, #tpu.memory_space<vmem>>, vector<1x84x80xbf16>
    %56 = vector.shape_cast %55 : vector<1x84x80xbf16> to vector<84x80xbf16>
    %cst_44 = arith.constant dense<0.000000e+00> : vector<16x80xf32>
    %57 = tpu.matmul %0, %56, %cst_44 {dimension_numbers = #tpu.dot_dimension_numbers<[1], [0], [0], [1], [0, 0, 1, 1], [], []>} : vector<16x84xbf16>, vector<84x80xbf16>, vector<16x80xf32> -> vector<16x80xf32>
    %c4_45 = arith.constant 4 : index
    %c0_46 = arith.constant 0 : index
    %c0_47 = arith.constant 0 : index
    %58 = vector.load %arg3[%c4_45, %c0_46, %c0_47] : memref<10x84x80xbf16, #tpu.memory_space<vmem>>, vector<1x84x80xbf16>
    %59 = vector.shape_cast %58 : vector<1x84x80xbf16> to vector<84x80xbf16>
    %cst_48 = arith.constant dense<0.000000e+00> : vector<16x80xf32>
    %60 = tpu.matmul %1, %59, %cst_48 {dimension_numbers = #tpu.dot_dimension_numbers<[1], [0], [0], [1], [0, 0, 1, 1], [], []>} : vector<16x84xbf16>, vector<84x80xbf16>, vector<16x80xf32> -> vector<16x80xf32>
    %61 = arith.addf %57, %60 : vector<16x80xf32>
    %c6_49 = arith.constant 6 : index
    %c0_50 = arith.constant 0 : index
    %c0_51 = arith.constant 0 : index
    %62 = vector.load %arg3[%c6_49, %c0_50, %c0_51] : memref<10x84x80xbf16, #tpu.memory_space<vmem>>, vector<1x84x80xbf16>
    %63 = vector.shape_cast %62 : vector<1x84x80xbf16> to vector<84x80xbf16>
    %cst_52 = arith.constant dense<0.000000e+00> : vector<16x80xf32>
    %64 = tpu.matmul %0, %63, %cst_52 {dimension_numbers = #tpu.dot_dimension_numbers<[1], [0], [0], [1], [0, 0, 1, 1], [], []>} : vector<16x84xbf16>, vector<84x80xbf16>, vector<16x80xf32> -> vector<16x80xf32>
    %c8_53 = arith.constant 8 : index
    %c0_54 = arith.constant 0 : index
    %c0_55 = arith.constant 0 : index
    %65 = vector.load %arg3[%c8_53, %c0_54, %c0_55] : memref<10x84x80xbf16, #tpu.memory_space<vmem>>, vector<1x84x80xbf16>
    %66 = vector.shape_cast %65 : vector<1x84x80xbf16> to vector<84x80xbf16>
    %cst_56 = arith.constant dense<0.000000e+00> : vector<16x80xf32>
    %67 = tpu.matmul %1, %66, %cst_56 {dimension_numbers = #tpu.dot_dimension_numbers<[1], [0], [0], [1], [0, 0, 1, 1], [], []>} : vector<16x84xbf16>, vector<84x80xbf16>, vector<16x80xf32> -> vector<16x80xf32>
    %68 = arith.addf %64, %67 : vector<16x80xf32>
    %cst_57 = arith.constant 0.000000e+00 : f32
    %69 = vector.broadcast %cst_57 : f32 to vector<1x80xf32>
    %70 = vector.extract_strided_slice %61 {offsets = [1, 0], sizes = [15, 80], strides = [1, 1]} : vector<16x80xf32> to vector<15x80xf32>
    %71 = tpu.concatenate %70, %69 in 0 : vector<15x80xf32>, vector<1x80xf32> -> vector<16x80xf32>
    %72 = arith.addf %54, %71 : vector<16x80xf32>
    %cst_58 = arith.constant 0.000000e+00 : f32
    %73 = vector.broadcast %cst_58 : f32 to vector<2x80xf32>
    %74 = vector.extract_strided_slice %68 {offsets = [2, 0], sizes = [14, 80], strides = [1, 1]} : vector<16x80xf32> to vector<14x80xf32>
    %75 = tpu.concatenate %74, %73 in 0 : vector<14x80xf32>, vector<2x80xf32> -> vector<16x80xf32>
    %76 = arith.addf %72, %75 : vector<16x80xf32>
    %c1_59 = arith.constant 1 : index
    %c0_60 = arith.constant 0 : index
    %c0_61 = arith.constant 0 : index
    %77 = vector.load %arg3[%c1_59, %c0_60, %c0_61] : memref<10x84x80xbf16, #tpu.memory_space<vmem>>, vector<1x84x80xbf16>
    %78 = vector.shape_cast %77 : vector<1x84x80xbf16> to vector<84x80xbf16>
    %cst_62 = arith.constant dense<0.000000e+00> : vector<16x80xf32>
    %79 = tpu.matmul %1, %78, %cst_62 {dimension_numbers = #tpu.dot_dimension_numbers<[1], [0], [0], [1], [0, 0, 1, 1], [], []>} : vector<16x84xbf16>, vector<84x80xbf16>, vector<16x80xf32> -> vector<16x80xf32>
    %c3_63 = arith.constant 3 : index
    %c0_64 = arith.constant 0 : index
    %c0_65 = arith.constant 0 : index
    %80 = vector.load %arg3[%c3_63, %c0_64, %c0_65] : memref<10x84x80xbf16, #tpu.memory_space<vmem>>, vector<1x84x80xbf16>
    %81 = vector.shape_cast %80 : vector<1x84x80xbf16> to vector<84x80xbf16>
    %cst_66 = arith.constant dense<0.000000e+00> : vector<16x80xf32>
    %82 = tpu.matmul %0, %81, %cst_66 {dimension_numbers = #tpu.dot_dimension_numbers<[1], [0], [0], [1], [0, 0, 1, 1], [], []>} : vector<16x84xbf16>, vector<84x80xbf16>, vector<16x80xf32> -> vector<16x80xf32>
    %c5_67 = arith.constant 5 : index
    %c0_68 = arith.constant 0 : index
    %c0_69 = arith.constant 0 : index
    %83 = vector.load %arg3[%c5_67, %c0_68, %c0_69] : memref<10x84x80xbf16, #tpu.memory_space<vmem>>, vector<1x84x80xbf16>
    %84 = vector.shape_cast %83 : vector<1x84x80xbf16> to vector<84x80xbf16>
    %cst_70 = arith.constant dense<0.000000e+00> : vector<16x80xf32>
    %85 = tpu.matmul %1, %84, %cst_70 {dimension_numbers = #tpu.dot_dimension_numbers<[1], [0], [0], [1], [0, 0, 1, 1], [], []>} : vector<16x84xbf16>, vector<84x80xbf16>, vector<16x80xf32> -> vector<16x80xf32>
    %86 = arith.addf %82, %85 : vector<16x80xf32>
    %c7_71 = arith.constant 7 : index
    %c0_72 = arith.constant 0 : index
    %c0_73 = arith.constant 0 : index
    %87 = vector.load %arg3[%c7_71, %c0_72, %c0_73] : memref<10x84x80xbf16, #tpu.memory_space<vmem>>, vector<1x84x80xbf16>
    %88 = vector.shape_cast %87 : vector<1x84x80xbf16> to vector<84x80xbf16>
    %cst_74 = arith.constant dense<0.000000e+00> : vector<16x80xf32>
    %89 = tpu.matmul %0, %88, %cst_74 {dimension_numbers = #tpu.dot_dimension_numbers<[1], [0], [0], [1], [0, 0, 1, 1], [], []>} : vector<16x84xbf16>, vector<84x80xbf16>, vector<16x80xf32> -> vector<16x80xf32>
    %c9_75 = arith.constant 9 : index
    %c0_76 = arith.constant 0 : index
    %c0_77 = arith.constant 0 : index
    %90 = vector.load %arg3[%c9_75, %c0_76, %c0_77] : memref<10x84x80xbf16, #tpu.memory_space<vmem>>, vector<1x84x80xbf16>
    %91 = vector.shape_cast %90 : vector<1x84x80xbf16> to vector<84x80xbf16>
    %cst_78 = arith.constant dense<0.000000e+00> : vector<16x80xf32>
    %92 = tpu.matmul %1, %91, %cst_78 {dimension_numbers = #tpu.dot_dimension_numbers<[1], [0], [0], [1], [0, 0, 1, 1], [], []>} : vector<16x84xbf16>, vector<84x80xbf16>, vector<16x80xf32> -> vector<16x80xf32>
    %93 = arith.addf %89, %92 : vector<16x80xf32>
    %cst_79 = arith.constant 0.000000e+00 : f32
    %94 = vector.broadcast %cst_79 : f32 to vector<1x80xf32>
    %95 = vector.extract_strided_slice %86 {offsets = [1, 0], sizes = [15, 80], strides = [1, 1]} : vector<16x80xf32> to vector<15x80xf32>
    %96 = tpu.concatenate %95, %94 in 0 : vector<15x80xf32>, vector<1x80xf32> -> vector<16x80xf32>
    %97 = arith.addf %79, %96 : vector<16x80xf32>
    %cst_80 = arith.constant 0.000000e+00 : f32
    %98 = vector.broadcast %cst_80 : f32 to vector<2x80xf32>
    %99 = vector.extract_strided_slice %93 {offsets = [2, 0], sizes = [14, 80], strides = [1, 1]} : vector<16x80xf32> to vector<14x80xf32>
    %100 = tpu.concatenate %99, %98 in 0 : vector<14x80xf32>, vector<2x80xf32> -> vector<16x80xf32>
    %101 = arith.addf %97, %100 : vector<16x80xf32>
    %102 = arith.maximumf %26, %51 : vector<16x80xf32>
    %103 = arith.maximumf %76, %101 : vector<16x80xf32>
    %104 = arith.maximumf %102, %103 : vector<16x80xf32>
    %c0_81 = arith.constant 0 : index
    %c0_82 = arith.constant 0 : index
    %105 = vector.load %arg4[%c0_81, %c0_82] : memref<1x80xf32, #tpu.memory_space<vmem>>, vector<1x80xf32>
    %106 = vector.broadcast %105 : vector<1x80xf32> to vector<16x80xf32>
    %107 = arith.addf %104, %106 : vector<16x80xf32>
    %cst_83 = arith.constant 0.000000e+00 : f32
    %108 = vector.broadcast %cst_83 : f32 to vector<16x80xf32>
    %109 = arith.maximumf %107, %108 : vector<16x80xf32>
    %110 = arith.truncf %109 : vector<16x80xf32> to vector<16x80xbf16>
    %c0_84 = arith.constant 0 : index
    %c0_85 = arith.constant 0 : index
    %111 = vector.load %arg5[%c0_84, %c0_85] : memref<16x80xbf16, #tpu.memory_space<vmem>>, vector<16x80xbf16>
    tpu.vector_store %arg5[%c0_84, %c0_85], %110 {strides = array<i32>} : memref<16x80xbf16, #tpu.memory_space<vmem>>, vector<16x80xbf16>,
    return
  }
  func.func @transform_0(%arg0: i32) -> (i32, i32) {
    %c0_i32 = arith.constant 0 : i32
    %c0_i32_0 = arith.constant 0 : i32
    return %arg0, %c0_i32 : i32, i32
  }
  func.func @transform_1(%arg0: i32) -> (i32, i32) {
    %c0_i32 = arith.constant 0 : i32
    %c0_i32_0 = arith.constant 0 : i32
    return %arg0, %c0_i32 : i32, i32
  }
  func.func @transform_2(%arg0: i32) -> (i32, i32, i32) {
    %c0_i32 = arith.constant 0 : i32
    %c0_i32_0 = arith.constant 0 : i32
    %c0_i32_1 = arith.constant 0 : i32
    %c0_i32_2 = arith.constant 0 : i32
    return %c0_i32, %c0_i32_0, %c0_i32_1 : i32, i32, i32
  }
  func.func @transform_3(%arg0: i32) -> (i32, i32) {
    %c0_i32 = arith.constant 0 : i32
    %c0_i32_0 = arith.constant 0 : i32
    %c0_i32_1 = arith.constant 0 : i32
    return %c0_i32, %c0_i32_0 : i32, i32
  }
  func.func @transform_4(%arg0: i32) -> (i32, i32) {
    %c0_i32 = arith.constant 0 : i32
    %c0_i32_0 = arith.constant 0 : i32
    return %arg0, %c0_i32 : i32, i32
  }
}

module attributes {stable_mosaic.version = 11 : i64} {
  func.func @_fc_head_kernel(%arg0: i32, %arg1: memref<2x400xbf16, #tpu.memory_space<vmem>>, %arg2: memref<400x128xbf16, #tpu.memory_space<vmem>>, %arg3: memref<1x128xf32, #tpu.memory_space<vmem>>, %arg4: memref<128x128xbf16, #tpu.memory_space<vmem>>, %arg5: memref<1x128xf32, #tpu.memory_space<vmem>>, %arg6: memref<128x128xbf16, #tpu.memory_space<vmem>>, %arg7: memref<1x128xf32, #tpu.memory_space<vmem>>, %arg8: memref<2x128xf32, #tpu.memory_space<vmem>>) attributes {dimension_semantics = [#tpu.dimension_semantics<parallel>], iteration_bounds = array<i64: 1>, scalar_prefetch = 0 : i64, scratch_operands = 0 : i64, tpu.core_type = #tpu.core_type<tc>, window_params = [{transform_indices = @transform_0, window_bounds = array<i64: 2, 400>}, {pipeline_mode = #tpu.pipeline_mode<synchronous>, transform_indices = @transform_1, window_bounds = array<i64: 400, 128>}, {pipeline_mode = #tpu.pipeline_mode<synchronous>, transform_indices = @transform_2, window_bounds = array<i64: 1, 128>}, {pipeline_mode = #tpu.pipeline_mode<synchronous>, transform_indices = @transform_3, window_bounds = array<i64: 128, 128>}, {pipeline_mode = #tpu.pipeline_mode<synchronous>, transform_indices = @transform_4, window_bounds = array<i64: 1, 128>}, {pipeline_mode = #tpu.pipeline_mode<synchronous>, transform_indices = @transform_5, window_bounds = array<i64: 128, 128>}, {pipeline_mode = #tpu.pipeline_mode<synchronous>, transform_indices = @transform_6, window_bounds = array<i64: 1, 128>}, {transform_indices = @transform_7, window_bounds = array<i64: 2, 128>}]} {
    %c0 = arith.constant 0 : index
    %c0_0 = arith.constant 0 : index
    %0 = vector.load %arg1[%c0, %c0_0] : memref<2x400xbf16, #tpu.memory_space<vmem>>, vector<2x400xbf16>
    %c0_1 = arith.constant 0 : index
    %c0_2 = arith.constant 0 : index
    %1 = vector.load %arg2[%c0_1, %c0_2] : memref<400x128xbf16, #tpu.memory_space<vmem>>, vector<400x128xbf16>
    %cst = arith.constant dense<0.000000e+00> : vector<2x128xf32>
    %2 = tpu.matmul %0, %1, %cst {dimension_numbers = #tpu.dot_dimension_numbers<[1], [0], [0], [1], [0, 0, 1, 1], [], []>} : vector<2x400xbf16>, vector<400x128xbf16>, vector<2x128xf32> -> vector<2x128xf32>
    %c0_3 = arith.constant 0 : index
    %c0_4 = arith.constant 0 : index
    %3 = vector.load %arg3[%c0_3, %c0_4] : memref<1x128xf32, #tpu.memory_space<vmem>>, vector<1x128xf32>
    %4 = vector.broadcast %3 : vector<1x128xf32> to vector<2x128xf32>
    %5 = arith.addf %2, %4 : vector<2x128xf32>
    %cst_5 = arith.constant 0.000000e+00 : f32
    %6 = vector.broadcast %cst_5 : f32 to vector<2x128xf32>
    %7 = arith.maximumf %5, %6 : vector<2x128xf32>
    %8 = arith.truncf %7 : vector<2x128xf32> to vector<2x128xbf16>
    %c0_6 = arith.constant 0 : index
    %c0_7 = arith.constant 0 : index
    %9 = vector.load %arg4[%c0_6, %c0_7] : memref<128x128xbf16, #tpu.memory_space<vmem>>, vector<128x128xbf16>
    %cst_8 = arith.constant dense<0.000000e+00> : vector<2x128xf32>
    %10 = tpu.matmul %8, %9, %cst_8 {dimension_numbers = #tpu.dot_dimension_numbers<[1], [0], [0], [1], [0, 0, 1, 1], [], []>} : vector<2x128xbf16>, vector<128x128xbf16>, vector<2x128xf32> -> vector<2x128xf32>
    %c0_9 = arith.constant 0 : index
    %c0_10 = arith.constant 0 : index
    %11 = vector.load %arg5[%c0_9, %c0_10] : memref<1x128xf32, #tpu.memory_space<vmem>>, vector<1x128xf32>
    %12 = vector.broadcast %11 : vector<1x128xf32> to vector<2x128xf32>
    %13 = arith.addf %10, %12 : vector<2x128xf32>
    %cst_11 = arith.constant 0.000000e+00 : f32
    %14 = vector.broadcast %cst_11 : f32 to vector<2x128xf32>
    %15 = arith.maximumf %13, %14 : vector<2x128xf32>
    %16 = arith.truncf %15 : vector<2x128xf32> to vector<2x128xbf16>
    %c0_12 = arith.constant 0 : index
    %c0_13 = arith.constant 0 : index
    %17 = vector.load %arg6[%c0_12, %c0_13] : memref<128x128xbf16, #tpu.memory_space<vmem>>, vector<128x128xbf16>
    %cst_14 = arith.constant dense<0.000000e+00> : vector<2x128xf32>
    %18 = tpu.matmul %16, %17, %cst_14 {dimension_numbers = #tpu.dot_dimension_numbers<[1], [0], [0], [1], [0, 0, 1, 1], [], []>} : vector<2x128xbf16>, vector<128x128xbf16>, vector<2x128xf32> -> vector<2x128xf32>
    %c0_15 = arith.constant 0 : index
    %c0_16 = arith.constant 0 : index
    %19 = vector.load %arg7[%c0_15, %c0_16] : memref<1x128xf32, #tpu.memory_space<vmem>>, vector<1x128xf32>
    %20 = vector.broadcast %19 : vector<1x128xf32> to vector<2x128xf32>
    %21 = arith.addf %18, %20 : vector<2x128xf32>
    %22 = tpu.iota {dimensions = array<i32: 1>} : vector<2x128xi32>
    %c10_i32 = arith.constant 10 : i32
    %23 = vector.broadcast %c10_i32 : i32 to vector<2x128xi32>
    %24 = arith.cmpi slt, %22, %23 : vector<2x128xi32>
    %cst_17 = arith.constant -1.000000e+30 : f32
    %25 = vector.broadcast %cst_17 : f32 to vector<2x128xf32>
    %26 = arith.select %24, %21, %25 : vector<2x128xi1>, vector<2x128xf32>
    %cst_18 = arith.constant dense<0xFF800000> : vector<2xf32>
    %27 = vector.multi_reduction <maximumf>, %26, %cst_18 [1] : vector<2x128xf32> to vector<2xf32>
    %28 = vector.shape_cast %27 : vector<2xf32> to vector<2x1xf32>
    %29 = vector.broadcast %28 : vector<2x1xf32> to vector<2x128xf32>
    %30 = arith.subf %26, %29 : vector<2x128xf32>
    %31 = math.exp %30 : vector<2x128xf32>
    %cst_19 = arith.constant dense<0.000000e+00> : vector<2xf32>
    %32 = vector.multi_reduction <add>, %31, %cst_19 [1] : vector<2x128xf32> to vector<2xf32>
    %33 = vector.shape_cast %32 : vector<2xf32> to vector<2x1xf32>
    %34 = math.log %33 : vector<2x1xf32>
    %35 = vector.broadcast %34 : vector<2x1xf32> to vector<2x128xf32>
    %36 = arith.subf %30, %35 : vector<2x128xf32>
    %c0_20 = arith.constant 0 : index
    %c0_21 = arith.constant 0 : index
    %37 = vector.load %arg8[%c0_20, %c0_21] : memref<2x128xf32, #tpu.memory_space<vmem>>, vector<2x128xf32>
    tpu.vector_store %arg8[%c0_20, %c0_21], %36 {strides = array<i32>} : memref<2x128xf32, #tpu.memory_space<vmem>>, vector<2x128xf32>,
    return
  }
  func.func @transform_0(%arg0: i32) -> (i32, i32) {
    %c0_i32 = arith.constant 0 : i32
    %c0_i32_0 = arith.constant 0 : i32
    return %arg0, %c0_i32 : i32, i32
  }
  func.func @transform_1(%arg0: i32) -> (i32, i32) {
    %c0_i32 = arith.constant 0 : i32
    %c0_i32_0 = arith.constant 0 : i32
    %c0_i32_1 = arith.constant 0 : i32
    return %c0_i32, %c0_i32_0 : i32, i32
  }
  func.func @transform_2(%arg0: i32) -> (i32, i32) {
    %c0_i32 = arith.constant 0 : i32
    %c0_i32_0 = arith.constant 0 : i32
    %c0_i32_1 = arith.constant 0 : i32
    return %c0_i32, %c0_i32_0 : i32, i32
  }
  func.func @transform_3(%arg0: i32) -> (i32, i32) {
    %c0_i32 = arith.constant 0 : i32
    %c0_i32_0 = arith.constant 0 : i32
    %c0_i32_1 = arith.constant 0 : i32
    return %c0_i32, %c0_i32_0 : i32, i32
  }
  func.func @transform_4(%arg0: i32) -> (i32, i32) {
    %c0_i32 = arith.constant 0 : i32
    %c0_i32_0 = arith.constant 0 : i32
    %c0_i32_1 = arith.constant 0 : i32
    return %c0_i32, %c0_i32_0 : i32, i32
  }
  func.func @transform_5(%arg0: i32) -> (i32, i32) {
    %c0_i32 = arith.constant 0 : i32
    %c0_i32_0 = arith.constant 0 : i32
    %c0_i32_1 = arith.constant 0 : i32
    return %c0_i32, %c0_i32_0 : i32, i32
  }
  func.func @transform_6(%arg0: i32) -> (i32, i32) {
    %c0_i32 = arith.constant 0 : i32
    %c0_i32_0 = arith.constant 0 : i32
    %c0_i32_1 = arith.constant 0 : i32
    return %c0_i32, %c0_i32_0 : i32, i32
  }
  func.func @transform_7(%arg0: i32) -> (i32, i32) {
    %c0_i32 = arith.constant 0 : i32
    %c0_i32_0 = arith.constant 0 : i32
    return %arg0, %c0_i32 : i32, i32
  }
}

</mosaic_0001>

<bundles_post_ra>
// kernel: tile.13
= control target key start
LH: loop header
LB: loop body
LE: loop exit
PB: predicated region body
PF: predicated region fallthrough
CT: control target
= control target key end

     0   :  { %s28_s0 = inlined_call_operand.vmem [shape: f32[6], index: 0, kind: input, shape index: {}]   ;;  %s29_s1 = inlined_call_operand.vmem [shape: f32[14,6], index: 1, kind: output, shape index: {}]  }
   0x1   :  { %v4_v0 = vld [vmem:[%s28_s0] ss:$0 sm:$0xff] }
   0x2   :  { %5 = vst [vmem:[%s29_s1] sm:$0xff] %v4_v0  ;;  %8 = vst [vmem:[%s29_s1 + $0x8] sm:$0xff] %v4_v0 }

// kernel: tile.14
= control target key start
LH: loop header
LB: loop body
LE: loop exit
PB: predicated region body
PF: predicated region fallthrough
CT: control target
= control target key end

     0   :  { %s117_s10 = smov 78   ;;  %s118_s11 = smov 66   ;;  %vm3_vm0 = vcmask 48128   ;;  %vm9_vm1 = vcmask 687728   ;;  %vm15_vm2 = vcmask 638528   ;;  %vm21_vm3 = vcmask 589328   ;;  %s185_s0 = inlined_call_operand.vmem [shape: f32[14,6], index: 0, kind: input, shape index: {}]   ;;  %s186_s1 = inlined_call_operand.vmem [shape: f32[1,84], index: 1, kind: output, shape index: {}]  }
   0x1   :  { %v91_v0 = vld [vmem:[%s185_s0 + $0xd] sm:$0x1]   ;;  %v93_v1 = vld [vmem:[%s185_s0 + $0xb] sm:$0x1]   ;;  %v92_v2 = vld [vmem:[%s185_s0 + $0xc] sm:$0x1]  }
   0x2   :  { %7 = vrot.lane.b32.xlu0 %v91_v0, %s117_s10  ;;  %19 = vrot.lane.b32.xlu1 %v93_v1, %s118_s11  ;;  %v94_v3 = vld [vmem:[%s185_s0 + $0xa] sm:$0x1]   ;;  %s119_s16 = smov 72   ;;  %s120_s17 = smov 60   ;;  %v95_v4 = vld [vmem:[%s185_s0 + $0x9] sm:$0x1]  }
   0x3   :  { %v96_v5 = vld [vmem:[%s185_s0 + $0x8] sm:$0x1]   ;;  %v2_v6 = vld [vmem:[%s185_s0] sm:$0x1]   ;;  %s121_s24 = smov 54   ;;  %s122_s25 = smov 48  }
   0x4   :  { %4 = vst.msk [vmem:[#allocation0] sm:$0x1] %vm3_vm0, %v2_v6   ;;  %v97_v7 = vld [vmem:[%s185_s0 + $0x7] sm:$0x1]   ;;  %v98_v8 = vld [vmem:[%s185_s0 + $0x6] sm:$0x1]  }
   0x5   :  { %s123_s30 = smov 42   ;;  %s124_s2 = smov 36   ;;  %v99_v9 = vld [vmem:[%s185_s0 + $0x5] sm:$0x1]   ;;  %v100_v10 = vld [vmem:[%s185_s0 + $0x4] sm:$0x1]  }
   0x6   :  { %13 = vrot.lane.b32.xlu0 %v92_v2, %s119_s16  ;;  %25 = vrot.lane.b32.xlu1 %v94_v3, %s120_s17  ;;  %s125_s7 = smov 30   ;;  %s126_s8 = smov 24   ;;  %v101_v11 = vld [vmem:[%s185_s0 + $0x3] sm:$0x1]   ;;  %v102_v12 = vld [vmem:[%s185_s0 + $0x2] sm:$0x1]  }
   0x7   :  { %s127_s13 = smov 18   ;;  %s128_s14 = smov 12   ;;  %v103_v13 = vld [vmem:[%s185_s0 + $0x1] sm:$0x1]   ;;  %vm27_vm4 = vcmask 540128   ;;  %vm33_vm5 = vcmask 490928  }
   0x8   :  { %s129_s0 = smov 6   ;;  %vm39_vm6 = vcmask 441728   ;;  %vm45_vm7 = vcmask 392528   ;;  %vm51_vm8 = vcmask 343328   ;;  %vm57_vm9 = vcmask 294128  }
   0x9   :  { %vm63_vm10 = vcmask 244928   ;;  %vm69_vm11 = vcmask 195728   ;;  %vm75_vm12 = vcmask 146528   ;;  %vm81_vm13 = vcmask 97328  }
   0xa   :  { %31 = vrot.lane.b32.xlu0 %v95_v4, %s121_s24  ;;  %37 = vrot.lane.b32.xlu1 %v96_v5, %s122_s25 }
   0xe   :  { %43 = vrot.lane.b32.xlu0 %v97_v7, %s123_s30  ;;  %49 = vrot.lane.b32.xlu1 %v98_v8, %s124_s2 }
  0x12   :  { %55 = vrot.lane.b32.xlu0 %v99_v9, %s125_s7  ;;  %61 = vrot.lane.b32.xlu1 %v100_v10, %s126_s8 }
  0x16   :  { %67 = vrot.lane.b32.xlu0 %v101_v11, %s127_s13  ;;  %73 = vrot.lane.b32.xlu1 %v102_v12, %s128_s14 }
  0x1a   :  { %79 = vrot.lane.b32.xlu0 %v103_v13, %s129_s0 }
  0x74   :  { %v8_v14 = vpop.permute.xlu0 %7   ;;  %v20_v15 = vpop.permute.xlu1 %19  }
  0x75   :  { %10 = vst.msk [vmem:[#allocation0] sm:$0x1] %vm9_vm1, %v8_v14  }
  0x78   :  { %v14_v16 = vpop.permute.xlu0 %13   ;;  %v26_v17 = vpop.permute.xlu1 %25  }
  0x79   :  { %16 = vst.msk [vmem:[#allocation0] sm:$0x1] %vm15_vm2, %v14_v16  }
  0x7a   :  { %22 = vst.msk [vmem:[#allocation0] sm:$0x1] %vm21_vm3, %v20_v15  }
  0x7b   :  { %28 = vst.msk [vmem:[#allocation0] sm:$0x1] %vm27_vm4, %v26_v17  }
  0x7c   :  { %v32_v18 = vpop.permute.xlu0 %31   ;;  %v38_v19 = vpop.permute.xlu1 %37  }
  0x7d   :  { %34 = vst.msk [vmem:[#allocation0] sm:$0x1] %vm33_vm5, %v32_v18  }
  0x7e   :  { %40 = vst.msk [vmem:[#allocation0] sm:$0x1] %vm39_vm6, %v38_v19  }
  0x80   :  { %v44_v20 = vpop.permute.xlu0 %43   ;;  %v50_v21 = vpop.permute.xlu1 %49  }
  0x81   :  { %46 = vst.msk [vmem:[#allocation0] sm:$0x1] %vm45_vm7, %v44_v20  }
  0x82   :  { %52 = vst.msk [vmem:[#allocation0] sm:$0x1] %vm51_vm8, %v50_v21  }
  0x84   :  { %v56_v22 = vpop.permute.xlu0 %55   ;;  %v62_v23 = vpop.permute.xlu1 %61  }
  0x85   :  { %58 = vst.msk [vmem:[#allocation0] sm:$0x1] %vm57_vm9, %v56_v22  }
  0x86   :  { %64 = vst.msk [vmem:[#allocation0] sm:$0x1] %vm63_vm10, %v62_v23  }
  0x88   :  { %v68_v24 = vpop.permute.xlu0 %67   ;;  %v74_v25 = vpop.permute.xlu1 %73  }
  0x89   :  { %70 = vst.msk [vmem:[#allocation0] sm:$0x1] %vm69_vm11, %v68_v24  }
  0x8a   :  { %76 = vst.msk [vmem:[#allocation0] sm:$0x1] %vm75_vm12, %v74_v25  }
  0x8c   :  { %v80_v26 = vpop.permute.xlu0 %79  }
  0x8d   :  { %82 = vst.msk [vmem:[#allocation0] sm:$0x1] %vm81_vm13, %v80_v26  }
  0x94   :  { %v87_v27 = vld [vmem:[#allocation0] sm:$0x1] }
  0x95   :  { %90 = vst [vmem:[%s186_s1] sm:$0x1] %v87_v27 }

// kernel: lenet_cifar10_forward.3
= control target key start
LH: loop header
LB: loop body
LE: loop exit
PB: predicated region body
PF: predicated region fallthrough
CT: control target
= control target key end

     0   :  { %vm97_vm0 = vcmask 785408   ;;  %vm552_vm1 = vcmask 1046528   ;;  %vm573_vm2 = vcmask 1045504   ;;  %vm1725_vm3 = vcmask 683008   ;;  %s3365_s2 = inlined_call_operand.vmem [shape: bf16[10,96,84], index: 2, kind: input, shape index: {}]   ;;  %s3366_s1 = inlined_call_operand.vmem [shape: bf16[32,96], index: 1, kind: input, shape index: {}]   ;;  %s3367_s0 = inlined_call_operand.vmem [shape: bf16[32,96], index: 0, kind: input, shape index: {}]   ;;  %s3368_s3 = inlined_call_operand.vmem [shape: f32[1,84], index: 3, kind: input, shape index: {}]   ;;  %s3369_s4 = inlined_call_operand.vmem [shape: bf16[32,84], index: 4, kind: output, shape index: {}]  }
   0x1   :  { %v2527_v0 = vld [vmem:[%s3365_s2 + $0x88] sm:$0xff]   ;;  %v2538_v2 = vld [vmem:[%s3365_s2 + $0x80] sm:$0xff]   ;;  %v2552_v4 = vld [vmem:[%s3365_s2 + $0x78] sm:$0xff]  }
   0x2   :  { %v2532_v1 = vld [vmem:[%s3365_s2 + $0x28] sm:$0xff]   ;;  %2115 = vmatprep.subr.bf16.mxu0 %v2527_v0  ;;  %v2545_v3 = vld [vmem:[%s3365_s2 + $0x20] sm:$0xff]   ;;  %v2558_v5 = vld [vmem:[%s3365_s2 + $0x18] sm:$0xff]  }
   0x3   :  { %2131 = vmatprep.subr.bf16.mxu1 %v2532_v1  ;;  %2116 = vmatpush3.bf16.msra.mxu0 %v2527_v0  ;;  %v2566_v6 = vld [vmem:[%s3365_s2 + $0x70] sm:$0xff]   ;;  %v2577_v8 = vld [vmem:[%s3365_s2 + $0x68] sm:$0xff]   ;;  %v2590_v10 = vld [vmem:[%s3366_s1] sm:$0xff]  }
   0x4   :  { %2132 = vmatpush3.bf16.msra.mxu1 %v2532_v1  ;;  %2117 = vmatprep.subr.bf16.mxu0 %v2538_v2  ;;  %v2572_v7 = vld [vmem:[%s3365_s2 + $0x10] sm:$0xff]   ;;  %v2583_v9 = vld [vmem:[%s3365_s2 + $0x8] sm:$0xff]   ;;  %v2596_v11 = vld [vmem:[%s3367_s0] sm:$0xff]  }
   0x5   :  { %2133 = vmatprep.subr.bf16.mxu1 %v2545_v3  ;;  %2127 = vmatprep.mubr.msk.bf16.mxu0 %vm97_vm0, %v2590_v10  ;;  %v2608_v12 = vld [vmem:[%s3365_s2 + $0x60] sm:$0xff]   ;;  %v2622_v14 = vld [vmem:[%s3365_s2 + $0x148] sm:$0xff]   ;;  %v2664_v20 = vld [vmem:[%s3365_s2 + $0x138] sm:$0xff]  }
   0x6   :  { %2143 = vmatprep.mubr.msk.bf16.mxu1 %vm97_vm0, %v2596_v11  ;;  %v2614_v13 = vld [vmem:[%s3365_s2] sm:$0xff]   ;;  %v2628_v15 = vld [vmem:[%s3365_s2 + $0xe8] sm:$0xff]   ;;  %v2670_v21 = vld [vmem:[%s3365_s2 + $0xd8] sm:$0xff]  }
   0x7   :  { %2118 = vmatpush3.bf16.msra.mxu0 %v2538_v2  ;;  %v2633_v16 = vld [vmem:[%s3366_s1 + $0x8] sm:$0xff]   ;;  %v2646_v18 = vld [vmem:[%s3365_s2 + $0x140] sm:$0xff]   ;;  %v2682_v22 = vld [vmem:[%s3365_s2 + $0x130] sm:$0xff]  }
   0x8   :  { %2134 = vmatpush3.bf16.msra.mxu1 %v2545_v3  ;;  %2119 = vmatprep.subr.bf16.mxu0 %v2552_v4  ;;  %v2639_v17 = vld [vmem:[%s3367_s0 + $0x8] sm:$0xff]   ;;  %v2652_v19 = vld [vmem:[%s3365_s2 + $0xe0] sm:$0xff]   ;;  %v2688_v23 = vld [vmem:[%s3365_s2 + $0xd0] sm:$0xff]  }
   0x9   :  { %2135 = vmatprep.subr.bf16.mxu1 %v2558_v5  ;;  %v2696_v24 = vld [vmem:[%s3365_s2 + $0x128] sm:$0xff]   ;;  %v2710_v26 = vld [vmem:[%s3365_s2 + $0x120] sm:$0xff]   ;;  %v2730_v29 = vld [vmem:[%s3365_s2 + $0xb8] sm:$0xff]  }
   0xa   :  { %v2702_v25 = vld [vmem:[%s3365_s2 + $0xc8] sm:$0xff]   ;;  %v2716_v27 = vld [vmem:[%s3365_s2 + $0xc0] sm:$0xff]   ;;  %v2744_v31 = vld [vmem:[%s3365_s2 + $0xb0] sm:$0xff]  }
   0xb   :  { %2120 = vmatpush3.bf16.msra.mxu0 %v2552_v4  ;;  %v2724_v28 = vld [vmem:[%s3365_s2 + $0x1a8] sm:$0xff]   ;;  %v2738_v30 = vld [vmem:[%s3365_s2 + $0x1a0] sm:$0xff]   ;;  %v2756_v32 = vld [vmem:[%s3365_s2 + $0x198] sm:$0xff]  }
   0xc   :  { %2136 = vmatpush3.bf16.msra.mxu1 %v2558_v5  ;;  %2121 = vmatprep.subr.bf16.mxu0 %v2566_v6  ;;  %v2762_v33 = vld [vmem:[%s3365_s2 + $0xa8] sm:$0xff]   ;;  %v2774_v34 = vld [vmem:[%s3365_s2 + $0x190] sm:$0xff]   ;;  %v2780_v35 = vld [vmem:[%s3365_s2 + $0xa0] sm:$0xff]  }
   0xd   :  { %2137 = vmatprep.subr.bf16.mxu1 %v2572_v7  ;;  %v2788_v36 = vld [vmem:[%s3365_s2 + $0x188] sm:$0xff]   ;;  %v2794_v37 = vld [vmem:[%s3365_s2 + $0x98] sm:$0xff]   ;;  %v2802_v38 = vld [vmem:[%s3365_s2 + $0x180] sm:$0xff]  }
   0xe   :  { %v2808_v39 = vld [vmem:[%s3365_s2 + $0x90] sm:$0xff]   ;;  %v2816_v40 = vld [vmem:[%s3365_s2 + $0x58] sm:$0xff]   ;;  %v2848_v44 = vld [vmem:[%s3365_s2 + $0x48] sm:$0xff]  }
   0xf   :  { %2122 = vmatpush3.bf16.msra.mxu0 %v2566_v6  ;;  %v2822_v41 = vld [vmem:[%s3365_s2 + $0x178] sm:$0xff]   ;;  %v2830_v42 = vld [vmem:[%s3365_s2 + $0x50] sm:$0xff]   ;;  %v2854_v45 = vld [vmem:[%s3365_s2 + $0x168] sm:$0xff]  }
  0x10   :  { %2138 = vmatpush3.bf16.msra.mxu1 %v2572_v7  ;;  %2123 = vmatprep.subr.bf16.mxu0 %v2577_v8  ;;  %v2836_v43 = vld [vmem:[%s3365_s2 + $0x170] sm:$0xff]   ;;  %v2866_v46 = vld [vmem:[%s3365_s2 + $0x40] sm:$0xff]   ;;  %v2880_v48 = vld [vmem:[%s3365_s2 + $0x38] sm:$0xff]  }
  0x11   :  { %2139 = vmatprep.subr.bf16.mxu1 %v2583_v9  ;;  %v2872_v47 = vld [vmem:[%s3365_s2 + $0x160] sm:$0xff]   ;;  %v2886_v49 = vld [vmem:[%s3365_s2 + $0x158] sm:$0xff]   ;;  %v2894_v50 = vld [vmem:[%s3365_s2 + $0x30] sm:$0xff]  }
  0x12   :  { %v2900_v51 = vld [vmem:[%s3365_s2 + $0x150] sm:$0xff]   ;;  %v2908_v52 = vld [vmem:[%s3365_s2 + $0x118] sm:$0xff]   ;;  %v2940_v56 = vld [vmem:[%s3365_s2 + $0x108] sm:$0xff]  }
  0x13   :  { %2124 = vmatpush3.bf16.msra.mxu0 %v2577_v8  ;;  %v2914_v53 = vld [vmem:[%s3365_s2 + $0x1d8] sm:$0xff]   ;;  %v2922_v54 = vld [vmem:[%s3365_s2 + $0x110] sm:$0xff]   ;;  %v2946_v57 = vld [vmem:[%s3365_s2 + $0x1c8] sm:$0xff]  }
  0x14   :  { %2140 = vmatpush3.bf16.msra.mxu1 %v2583_v9  ;;  %2125 = vmatprep.subr.bf16.mxu0 %v2608_v12  ;;  %v2928_v55 = vld [vmem:[%s3365_s2 + $0x1d0] sm:$0xff]   ;;  %v2958_v58 = vld [vmem:[%s3365_s2 + $0x100] sm:$0xff]   ;;  %v2972_v60 = vld [vmem:[%s3365_s2 + $0xf8] sm:$0xff]  }
  0x15   :  { %2141 = vmatprep.subr.bf16.mxu1 %v2614_v13  ;;  %v2964_v59 = vld [vmem:[%s3365_s2 + $0x1c0] sm:$0xff]   ;;  %v2978_v61 = vld [vmem:[%s3365_s2 + $0x1b8] sm:$0xff]   ;;  %v2986_v62 = vld [vmem:[%s3365_s2 + $0xf0] sm:$0xff]  }
  0x16   :  { %v2992_v63 = vld [vmem:[%s3365_s2 + $0x1b0] sm:$0xff]  }
  0x17   :  { %2126 = vmatpush3.bf16.msra.mxu0 %v2608_v12 }
  0x18   :  { %2142 = vmatpush3.bf16.msra.mxu1 %v2614_v13  ;;  %2147 = vmatprep.subr.bf16.mxu0 %v2622_v14 }
  0x19   :  { %2163 = vmatprep.subr.bf16.mxu1 %v2628_v15 }
  0x1a   :  { %2128 = vmatmul.mubr.msk.bf16.vlgmr.msra.gmra.mxu0 %vm97_vm0, %v2633_v16 }
  0x1b   :  { %2144 = vmatmul.mubr.msk.bf16.vlgmr.msra.gmra.mxu1 %vm97_vm0, %v2639_v17  ;;  %2148 = vmatpush3.bf16.msra.mxu0 %v2622_v14 }
  0x1c   :  { %2164 = vmatpush3.bf16.msra.mxu1 %v2628_v15  ;;  %2149 = vmatprep.subr.bf16.mxu0 %v2646_v18 }
  0x1d   :  { %2165 = vmatprep.subr.bf16.mxu1 %v2652_v19  ;;  %2159 = vmatprep.mubr.msk.bf16.mxu0 %vm97_vm0, %v2590_v10 }
  0x1e   :  { %2175 = vmatprep.mubr.msk.bf16.mxu1 %vm97_vm0, %v2596_v11 }
  0x1f   :  { %2150 = vmatpush3.bf16.msra.mxu0 %v2646_v18 }
  0x20   :  { %2166 = vmatpush3.bf16.msra.mxu1 %v2652_v19  ;;  %2151 = vmatprep.subr.bf16.mxu0 %v2664_v20 }
  0x21   :  { %2167 = vmatprep.subr.bf16.mxu1 %v2670_v21 }
  0x23   :  { %2152 = vmatpush3.bf16.msra.mxu0 %v2664_v20 }
  0x24   :  { %2168 = vmatpush3.bf16.msra.mxu1 %v2670_v21  ;;  %2153 = vmatprep.subr.bf16.mxu0 %v2682_v22 }
  0x25   :  { %2169 = vmatprep.subr.bf16.mxu1 %v2688_v23 }
  0x27   :  { %2154 = vmatpush3.bf16.msra.mxu0 %v2682_v22 }
  0x28   :  { %2170 = vmatpush3.bf16.msra.mxu1 %v2688_v23  ;;  %2155 = vmatprep.subr.bf16.mxu0 %v2696_v24 }
  0x29   :  { %2171 = vmatprep.subr.bf16.mxu1 %v2702_v25 }
  0x2b   :  { %2156 = vmatpush3.bf16.msra.mxu0 %v2696_v24 }
  0x2c   :  { %2172 = vmatpush3.bf16.msra.mxu1 %v2702_v25  ;;  %2157 = vmatprep.subr.bf16.mxu0 %v2710_v26 }
  0x2d   :  { %2173 = vmatprep.subr.bf16.mxu1 %v2716_v27 }
  0x2f   :  { %2158 = vmatpush3.bf16.msra.mxu0 %v2710_v26 }
  0x30   :  { %2174 = vmatpush3.bf16.msra.mxu1 %v2716_v27  ;;  %2179 = vmatprep.subr.bf16.mxu0 %v2724_v28 }
  0x31   :  { %2195 = vmatprep.subr.bf16.mxu1 %v2730_v29 }
  0x32   :  { %2160 = vmatmul.mubr.msk.bf16.vlgmr.msra.gmra.mxu0 %vm97_vm0, %v2633_v16 }
  0x33   :  { %2176 = vmatmul.mubr.msk.bf16.vlgmr.msra.gmra.mxu1 %vm97_vm0, %v2639_v17  ;;  %2180 = vmatpush3.bf16.msra.mxu0 %v2724_v28 }
  0x34   :  { %2196 = vmatpush3.bf16.msra.mxu1 %v2730_v29  ;;  %2181 = vmatprep.subr.bf16.mxu0 %v2738_v30 }
  0x35   :  { %2197 = vmatprep.subr.bf16.mxu1 %v2744_v31  ;;  %2191 = vmatprep.mubr.msk.bf16.mxu0 %vm97_vm0, %v2596_v11 }
  0x36   :  { %2207 = vmatprep.mubr.msk.bf16.mxu1 %vm97_vm0, %v2590_v10 }
  0x37   :  { %2182 = vmatpush3.bf16.msra.mxu0 %v2738_v30 }
  0x38   :  { %2198 = vmatpush3.bf16.msra.mxu1 %v2744_v31  ;;  %2183 = vmatprep.subr.bf16.mxu0 %v2756_v32 }
  0x39   :  { %2199 = vmatprep.subr.bf16.mxu1 %v2762_v33 }
  0x3b   :  { %2184 = vmatpush3.bf16.msra.mxu0 %v2756_v32 }
  0x3c   :  { %2200 = vmatpush3.bf16.msra.mxu1 %v2762_v33  ;;  %2185 = vmatprep.subr.bf16.mxu0 %v2774_v34 }
  0x3d   :  { %2201 = vmatprep.subr.bf16.mxu1 %v2780_v35 }
  0x3f   :  { %2186 = vmatpush3.bf16.msra.mxu0 %v2774_v34 }
  0x40   :  { %2202 = vmatpush3.bf16.msra.mxu1 %v2780_v35  ;;  %2187 = vmatprep.subr.bf16.mxu0 %v2788_v36 }
  0x41   :  { %2203 = vmatprep.subr.bf16.mxu1 %v2794_v37 }
  0x43   :  { %2188 = vmatpush3.bf16.msra.mxu0 %v2788_v36 }
  0x44   :  { %2204 = vmatpush3.bf16.msra.mxu1 %v2794_v37  ;;  %2189 = vmatprep.subr.bf16.mxu0 %v2802_v38 }
  0x45   :  { %2205 = vmatprep.subr.bf16.mxu1 %v2808_v39 }
  0x47   :  { %2190 = vmatpush3.bf16.msra.mxu0 %v2802_v38 }
  0x48   :  { %2206 = vmatpush3.bf16.msra.mxu1 %v2808_v39  ;;  %2211 = vmatprep.subr.bf16.mxu0 %v2816_v40 }
  0x49   :  { %2227 = vmatprep.subr.bf16.mxu1 %v2822_v41 }
  0x4a   :  { %2192 = vmatmul.mubr.msk.bf16.vlgmr.msra.gmra.mxu0 %vm97_vm0, %v2639_v17 }
  0x4b   :  { %2208 = vmatmul.mubr.msk.bf16.vlgmr.msra.gmra.mxu1 %vm97_vm0, %v2633_v16  ;;  %2212 = vmatpush3.bf16.msra.mxu0 %v2816_v40 }
  0x4c   :  { %2228 = vmatpush3.bf16.msra.mxu1 %v2822_v41  ;;  %2213 = vmatprep.subr.bf16.mxu0 %v2830_v42 }
  0x4d   :  { %2229 = vmatprep.subr.bf16.mxu1 %v2836_v43  ;;  %2223 = vmatprep.mubr.msk.bf16.mxu0 %vm97_vm0, %v2596_v11 }
  0x4e   :  { %2239 = vmatprep.mubr.msk.bf16.mxu1 %vm97_vm0, %v2590_v10 }
  0x4f   :  { %2214 = vmatpush3.bf16.msra.mxu0 %v2830_v42 }
  0x50   :  { %2230 = vmatpush3.bf16.msra.mxu1 %v2836_v43  ;;  %2215 = vmatprep.subr.bf16.mxu0 %v2848_v44 }
  0x51   :  { %2231 = vmatprep.subr.bf16.mxu1 %v2854_v45 }
  0x53   :  { %2216 = vmatpush3.bf16.msra.mxu0 %v2848_v44 }
  0x54   :  { %2232 = vmatpush3.bf16.msra.mxu1 %v2854_v45  ;;  %2217 = vmatprep.subr.bf16.mxu0 %v2866_v46 }
  0x55   :  { %2233 = vmatprep.subr.bf16.mxu1 %v2872_v47 }
  0x57   :  { %2218 = vmatpush3.bf16.msra.mxu0 %v2866_v46 }
  0x58   :  { %2234 = vmatpush3.bf16.msra.mxu1 %v2872_v47  ;;  %2219 = vmatprep.subr.bf16.mxu0 %v2880_v48 }
  0x59   :  { %2235 = vmatprep.subr.bf16.mxu1 %v2886_v49 }
  0x5b   :  { %2220 = vmatpush3.bf16.msra.mxu0 %v2880_v48 }
  0x5c   :  { %2236 = vmatpush3.bf16.msra.mxu1 %v2886_v49  ;;  %2221 = vmatprep.subr.bf16.mxu0 %v2894_v50 }
  0x5d   :  { %2237 = vmatprep.subr.bf16.mxu1 %v2900_v51 }
  0x5f   :  { %2222 = vmatpush3.bf16.msra.mxu0 %v2894_v50 }
  0x60   :  { %2238 = vmatpush3.bf16.msra.mxu1 %v2900_v51  ;;  %2243 = vmatprep.subr.bf16.mxu0 %v2908_v52 }
  0x61   :  { %2259 = vmatprep.subr.bf16.mxu1 %v2914_v53 }
  0x62   :  { %2224 = vmatmul.mubr.msk.bf16.vlgmr.msra.gmra.mxu0 %vm97_vm0, %v2639_v17 }
  0x63   :  { %2240 = vmatmul.mubr.msk.bf16.vlgmr.msra.gmra.mxu1 %vm97_vm0, %v2633_v16  ;;  %2244 = vmatpush3.bf16.msra.mxu0 %v2908_v52 }
  0x64   :  { %2260 = vmatpush3.bf16.msra.mxu1 %v2914_v53  ;;  %2245 = vmatprep.subr.bf16.mxu0 %v2922_v54 }
  0x65   :  { %2261 = vmatprep.subr.bf16.mxu1 %v2928_v55  ;;  %2255 = vmatprep.mubr.msk.bf16.mxu0 %vm97_vm0, %v2596_v11 }
  0x66   :  { %2271 = vmatprep.mubr.msk.bf16.mxu1 %vm97_vm0, %v2596_v11 }
  0x67   :  { %2246 = vmatpush3.bf16.msra.mxu0 %v2922_v54 }
  0x68   :  { %2262 = vmatpush3.bf16.msra.mxu1 %v2928_v55  ;;  %2247 = vmatprep.subr.bf16.mxu0 %v2940_v56 }
  0x69   :  { %2263 = vmatprep.subr.bf16.mxu1 %v2946_v57 }
  0x6b   :  { %2248 = vmatpush3.bf16.msra.mxu0 %v2940_v56 }
  0x6c   :  { %2264 = vmatpush3.bf16.msra.mxu1 %v2946_v57  ;;  %2249 = vmatprep.subr.bf16.mxu0 %v2958_v58 }
  0x6d   :  { %2265 = vmatprep.subr.bf16.mxu1 %v2964_v59 }
  0x6f   :  { %2250 = vmatpush3.bf16.msra.mxu0 %v2958_v58 }
  0x70   :  { %2266 = vmatpush3.bf16.msra.mxu1 %v2964_v59  ;;  %2251 = vmatprep.subr.bf16.mxu0 %v2972_v60 }
  0x71   :  { %2267 = vmatprep.subr.bf16.mxu1 %v2978_v61 }
  0x73   :  { %2252 = vmatpush3.bf16.msra.mxu0 %v2972_v60 }
  0x74   :  { %2268 = vmatpush3.bf16.msra.mxu1 %v2978_v61  ;;  %2253 = vmatprep.subr.bf16.mxu0 %v2986_v62 }
  0x75   :  { %2269 = vmatprep.subr.bf16.mxu1 %v2992_v63 }
  0x77   :  { %2254 = vmatpush3.bf16.msra.mxu0 %v2986_v62 }
  0x78   :  { %2270 = vmatpush3.bf16.msra.mxu1 %v2992_v63  ;;  %2275 = vmatprep.subr.bf16.mxu0 %v2628_v15 }
  0x79   :  { %2291 = vmatprep.subr.bf16.mxu1 %v2527_v0 }
  0x7a   :  { %2256 = vmatmul.mubr.msk.bf16.vlgmr.msra.gmra.mxu0 %vm97_vm0, %v2639_v17 }
  0x7b   :  { %2272 = vmatmul.mubr.msk.bf16.vlgmr.msra.gmra.mxu1 %vm97_vm0, %v2639_v17  ;;  %2276 = vmatpush3.bf16.msra.mxu0 %v2628_v15 }
  0x7c   :  { %2292 = vmatpush3.bf16.msra.mxu1 %v2527_v0  ;;  %2277 = vmatprep.subr.bf16.mxu0 %v2652_v19 }
  0x7d   :  { %2293 = vmatprep.subr.bf16.mxu1 %v2538_v2  ;;  %2287 = vmatprep.mubr.msk.bf16.mxu0 %vm97_vm0, %v2590_v10 }
  0x7e   :  { %2303 = vmatprep.mubr.msk.bf16.mxu1 %vm97_vm0, %v2596_v11 }
  0x7f   :  { %2278 = vmatpush3.bf16.msra.mxu0 %v2652_v19 }
  0x80   :  { %2294 = vmatpush3.bf16.msra.mxu1 %v2538_v2  ;;  %2279 = vmatprep.subr.bf16.mxu0 %v2670_v21 }
  0x81   :  { %2295 = vmatprep.subr.bf16.mxu1 %v2552_v4 }
  0x83   :  { %2280 = vmatpush3.bf16.msra.mxu0 %v2670_v21 }
  0x84   :  { %2296 = vmatpush3.bf16.msra.mxu1 %v2552_v4  ;;  %2281 = vmatprep.subr.bf16.mxu0 %v2688_v23 }
  0x85   :  { %2297 = vmatprep.subr.bf16.mxu1 %v2566_v6 }
  0x87   :  { %2282 = vmatpush3.bf16.msra.mxu0 %v2688_v23 }
  0x88   :  { %2298 = vmatpush3.bf16.msra.mxu1 %v2566_v6  ;;  %2283 = vmatprep.subr.bf16.mxu0 %v2702_v25 }
  0x89   :  { %2299 = vmatprep.subr.bf16.mxu1 %v2577_v8 }
  0x8b   :  { %2284 = vmatpush3.bf16.msra.mxu0 %v2702_v25 }
  0x8c   :  { %2300 = vmatpush3.bf16.msra.mxu1 %v2577_v8  ;;  %2285 = vmatprep.subr.bf16.mxu0 %v2716_v27 }
  0x8d   :  { %2301 = vmatprep.subr.bf16.mxu1 %v2608_v12 }
  0x8f   :  { %2286 = vmatpush3.bf16.msra.mxu0 %v2716_v27 }
  0x90   :  { %2302 = vmatpush3.bf16.msra.mxu1 %v2608_v12  ;;  %2307 = vmatprep.subr.bf16.mxu0 %v2724_v28 }
  0x91   :  { %2323 = vmatprep.subr.bf16.mxu1 %v2622_v14 }
  0x92   :  { %2288 = vmatmul.mubr.msk.bf16.vlgmr.msra.gmra.mxu0 %vm97_vm0, %v2633_v16 }
  0x93   :  { %2304 = vmatmul.mubr.msk.bf16.vlgmr.msra.gmra.mxu1 %vm97_vm0, %v2639_v17  ;;  %2308 = vmatpush3.bf16.msra.mxu0 %v2724_v28 }
  0x94   :  { %2324 = vmatpush3.bf16.msra.mxu1 %v2622_v14  ;;  %2309 = vmatprep.subr.bf16.mxu0 %v2738_v30 }
  0x95   :  { %2325 = vmatprep.subr.bf16.mxu1 %v2646_v18  ;;  %2319 = vmatprep.mubr.msk.bf16.mxu0 %vm97_vm0, %v2590_v10 }
  0x96   :  { %2335 = vmatprep.mubr.msk.bf16.mxu1 %vm97_vm0, %v2596_v11 }
  0x97   :  { %2310 = vmatpush3.bf16.msra.mxu0 %v2738_v30 }
  0x98   :  { %2326 = vmatpush3.bf16.msra.mxu1 %v2646_v18  ;;  %2311 = vmatprep.subr.bf16.mxu0 %v2756_v32 }
  0x99   :  { %2327 = vmatprep.subr.bf16.mxu1 %v2664_v20 }
  0x9b   :  { %2312 = vmatpush3.bf16.msra.mxu0 %v2756_v32 }
  0x9c   :  { %2328 = vmatpush3.bf16.msra.mxu1 %v2664_v20  ;;  %2313 = vmatprep.subr.bf16.mxu0 %v2774_v34 }
  0x9d   :  { %2329 = vmatprep.subr.bf16.mxu1 %v2682_v22 }
  0x9f   :  { %2314 = vmatpush3.bf16.msra.mxu0 %v2774_v34 }
  0xa0   :  { %2330 = vmatpush3.bf16.msra.mxu1 %v2682_v22  ;;  %2315 = vmatprep.subr.bf16.mxu0 %v2788_v36 }
  0xa1   :  { %2331 = vmatprep.subr.bf16.mxu1 %v2696_v24 }
  0xa3   :  { %2316 = vmatpush3.bf16.msra.mxu0 %v2788_v36 }
  0xa4   :  { %2332 = vmatpush3.bf16.msra.mxu1 %v2696_v24  ;;  %2317 = vmatprep.subr.bf16.mxu0 %v2802_v38 }
  0xa5   :  { %2333 = vmatprep.subr.bf16.mxu1 %v2710_v26 }
  0xa7   :  { %2318 = vmatpush3.bf16.msra.mxu0 %v2802_v38 }
  0xa8   :  { %2334 = vmatpush3.bf16.msra.mxu1 %v2710_v26  ;;  %2339 = vmatprep.subr.bf16.mxu0 %v2532_v1 }
  0xa9   :  { %2355 = vmatprep.subr.bf16.mxu1 %v2908_v52 }
  0xaa   :  { %2320 = vmatmul.mubr.msk.bf16.vlgmr.msra.gmra.mxu0 %vm97_vm0, %v2633_v16 }
  0xab   :  { %2336 = vmatmul.mubr.msk.bf16.vlgmr.msra.gmra.mxu1 %vm97_vm0, %v2639_v17  ;;  %2340 = vmatpush3.bf16.msra.mxu0 %v2532_v1 }
  0xac   :  { %2356 = vmatpush3.bf16.msra.mxu1 %v2908_v52  ;;  %2341 = vmatprep.subr.bf16.mxu0 %v2545_v3 }
  0xad   :  { %2357 = vmatprep.subr.bf16.mxu1 %v2922_v54  ;;  %2351 = vmatprep.mubr.msk.bf16.mxu0 %vm97_vm0, %v2590_v10 }
  0xae   :  { %2367 = vmatprep.mubr.msk.bf16.mxu1 %vm97_vm0, %v2590_v10 }
  0xaf   :  { %2342 = vmatpush3.bf16.msra.mxu0 %v2545_v3 }
  0xb0   :  { %2358 = vmatpush3.bf16.msra.mxu1 %v2922_v54  ;;  %2343 = vmatprep.subr.bf16.mxu0 %v2558_v5 }
  0xb1   :  { %2359 = vmatprep.subr.bf16.mxu1 %v2940_v56 }
  0xb3   :  { %2344 = vmatpush3.bf16.msra.mxu0 %v2558_v5 }
  0xb4   :  { %2360 = vmatpush3.bf16.msra.mxu1 %v2940_v56  ;;  %2345 = vmatprep.subr.bf16.mxu0 %v2572_v7 }
  0xb5   :  { %2361 = vmatprep.subr.bf16.mxu1 %v2958_v58 }
  0xb7   :  { %2346 = vmatpush3.bf16.msra.mxu0 %v2572_v7 }
  0xb8   :  { %2362 = vmatpush3.bf16.msra.mxu1 %v2958_v58  ;;  %2347 = vmatprep.subr.bf16.mxu0 %v2583_v9 }
  0xb9   :  { %2363 = vmatprep.subr.bf16.mxu1 %v2972_v60 }
  0xbb   :  { %2348 = vmatpush3.bf16.msra.mxu0 %v2583_v9 }
  0xbc   :  { %2364 = vmatpush3.bf16.msra.mxu1 %v2972_v60  ;;  %2349 = vmatprep.subr.bf16.mxu0 %v2614_v13 }
  0xbd   :  { %2365 = vmatprep.subr.bf16.mxu1 %v2986_v62 }
  0xbf   :  { %2350 = vmatpush3.bf16.msra.mxu0 %v2614_v13 }
  0xc0   :  { %2366 = vmatpush3.bf16.msra.mxu1 %v2986_v62  ;;  %2371 = vmatprep.subr.bf16.mxu0 %v2730_v29 }
  0xc1   :  { %2387 = vmatprep.subr.bf16.mxu1 %v2914_v53 }
  0xc2   :  { %2352 = vmatmul.mubr.msk.bf16.vlgmr.msra.gmra.mxu0 %vm97_vm0, %v2633_v16 }
  0xc3   :  { %2368 = vmatmul.mubr.msk.bf16.vlgmr.msra.gmra.mxu1 %vm97_vm0, %v2633_v16  ;;  %2372 = vmatpush3.bf16.msra.mxu0 %v2730_v29 }
  0xc4   :  { %2388 = vmatpush3.bf16.msra.mxu1 %v2914_v53  ;;  %2373 = vmatprep.subr.bf16.mxu0 %v2744_v31 }
  0xc5   :  { %2389 = vmatprep.subr.bf16.mxu1 %v2928_v55  ;;  %2383 = vmatprep.mubr.msk.bf16.mxu0 %vm97_vm0, %v2596_v11 }
  0xc6   :  { %2399 = vmatprep.mubr.msk.bf16.mxu1 %vm97_vm0, %v2590_v10 }
  0xc7   :  { %2374 = vmatpush3.bf16.msra.mxu0 %v2744_v31 }
  0xc8   :  { %2390 = vmatpush3.bf16.msra.mxu1 %v2928_v55  ;;  %2375 = vmatprep.subr.bf16.mxu0 %v2762_v33 }
  0xc9   :  { %2391 = vmatprep.subr.bf16.mxu1 %v2946_v57 }
  0xcb   :  { %2376 = vmatpush3.bf16.msra.mxu0 %v2762_v33 }
  0xcc   :  { %2392 = vmatpush3.bf16.msra.mxu1 %v2946_v57  ;;  %2377 = vmatprep.subr.bf16.mxu0 %v2780_v35 }
  0xcd   :  { %2393 = vmatprep.subr.bf16.mxu1 %v2964_v59 }
  0xcf   :  { %2378 = vmatpush3.bf16.msra.mxu0 %v2780_v35 }
  0xd0   :  { %2394 = vmatpush3.bf16.msra.mxu1 %v2964_v59  ;;  %2379 = vmatprep.subr.bf16.mxu0 %v2794_v37 }
  0xd1   :  { %2395 = vmatprep.subr.bf16.mxu1 %v2978_v61 }
  0xd3   :  { %2380 = vmatpush3.bf16.msra.mxu0 %v2794_v37 }
  0xd4   :  { %2396 = vmatpush3.bf16.msra.mxu1 %v2978_v61  ;;  %2381 = vmatprep.subr.bf16.mxu0 %v2808_v39 }
  0xd5   :  { %2397 = vmatprep.subr.bf16.mxu1 %v2992_v63 }
  0xd7   :  { %2382 = vmatpush3.bf16.msra.mxu0 %v2808_v39 }
  0xd8   :  { %2398 = vmatpush3.bf16.msra.mxu1 %v2992_v63  ;;  %2403 = vmatprep.subr.bf16.mxu0 %v2822_v41 }
  0xd9   :  { %2419 = vmatprep.subr.bf16.mxu1 %v2816_v40 }
  0xda   :  { %v2129_v0 = vpop.f32.mrf.mxu0  ;;  %2384 = vmatmul.mubr.msk.bf16.vlgmr.msra.gmra.mxu0 %vm97_vm0, %v2639_v17 }
  0xdb   :  { %v2145_v1 = vpop.f32.mrf.mxu1  ;;  %2400 = vmatmul.mubr.msk.bf16.vlgmr.msra.gmra.mxu1 %vm97_vm0, %v2633_v16  ;;  %2404 = vmatpush3.bf16.msra.mxu0 %v2822_v41 }
  0xdc   :  { %v248_v2 = vadd.f32 %v2145_v1, %v2129_v0  ;;  %2420 = vmatpush3.bf16.msra.mxu1 %v2816_v40  ;;  %v138_v3 = vpop.f32.mrf.mxu0  ;;  %2405 = vmatprep.subr.bf16.mxu0 %v2836_v43 }
  0xdd   :  { %v239_v4 = vpop.f32.mrf.mxu1  ;;  %2421 = vmatprep.subr.bf16.mxu1 %v2830_v42  ;;  %2415 = vmatprep.mubr.msk.bf16.mxu0 %vm97_vm0, %v2596_v11 }
  0xde   :  { %v240_v5 = vadd.f32 %v239_v4, %v138_v3  ;;  %v2130_v6 = vpop.f32.mrf.mxu0  ;;  %2431 = vmatprep.mubr.msk.bf16.mxu1 %vm97_vm0, %v2590_v10 }
  0xdf   :  { %v2146_v7 = vpop.f32.mrf.mxu1  ;;  %2406 = vmatpush3.bf16.msra.mxu0 %v2836_v43 }
  0xe0   :  { %v3143_v8 = vadd.f32 %v2146_v7, %v2130_v6  ;;  %2422 = vmatpush3.bf16.msra.mxu1 %v2830_v42  ;;  %v141_v9 = vpop.f32.mrf.mxu0  ;;  %2407 = vmatprep.subr.bf16.mxu0 %v2854_v45 }
  0xe1   :  { %v242_v12 = vpop.f32.mrf.mxu1  ;;  %2423 = vmatprep.subr.bf16.mxu1 %v2848_v44 }
  0xe2   :  { %v243_v13 = vadd.f32 %v242_v12, %v141_v9 }
  0xe3   :  { %2408 = vmatpush3.bf16.msra.mxu0 %v2854_v45 }
  0xe4   :  { %2424 = vmatpush3.bf16.msra.mxu1 %v2848_v44  ;;  %2409 = vmatprep.subr.bf16.mxu0 %v2872_v47 }
  0xe5   :  { %2425 = vmatprep.subr.bf16.mxu1 %v2866_v46 }
  0xe7   :  { %2410 = vmatpush3.bf16.msra.mxu0 %v2872_v47 }
  0xe8   :  { %2426 = vmatpush3.bf16.msra.mxu1 %v2866_v46  ;;  %2411 = vmatprep.subr.bf16.mxu0 %v2886_v49 }
  0xe9   :  { %2427 = vmatprep.subr.bf16.mxu1 %v2880_v48 }
  0xeb   :  { %2412 = vmatpush3.bf16.msra.mxu0 %v2886_v49 }
  0xec   :  { %2428 = vmatpush3.bf16.msra.mxu1 %v2880_v48  ;;  %2413 = vmatprep.subr.bf16.mxu0 %v2900_v51 }
  0xed   :  { %2429 = vmatprep.subr.bf16.mxu1 %v2894_v50 }
  0xef   :  { %2414 = vmatpush3.bf16.msra.mxu0 %v2900_v51 }
  0xf0   :  { %2430 = vmatpush3.bf16.msra.mxu1 %v2894_v50 }
  0xf2   :  { %v2161_v10 = vpop.f32.mrf.mxu0  ;;  %2416 = vmatmul.mubr.msk.bf16.vlgmr.msra.gmra.mxu0 %vm97_vm0, %v2639_v17 }
  0xf3   :  { %v2177_v11 = vpop.f32.mrf.mxu1  ;;  %2432 = vmatmul.mubr.msk.bf16.vlgmr.msra.gmra.mxu1 %vm97_vm0, %v2633_v16 }
  0xf4   :  { %v350_v14 = vpop.f32.mrf.mxu0  ;;  %v444_v18 = vadd.f32 %v2177_v11, %v2161_v10 }
  0xf5   :  { %v435_v15 = vpop.f32.mrf.mxu1 }
  0xf6   :  { %v2162_v19 = vpop.f32.mrf.mxu0  ;;  %v436_v21 = vadd.f32 %v435_v15, %v350_v14  ;;  %v556_v25 = vrot.slane %v444_v18, 1 }
  0xf7   :  { %v2178_v20 = vpop.f32.mrf.mxu1 }
  0xf8   :  { %v3166_v22 = vadd.f32 %v2178_v20, %v2162_v19  ;;  %v353_v23 = vpop.f32.mrf.mxu0  ;;  %v553_v17 = vrot.slane %v436_v21, 1 }
  0xf9   :  { %v438_v24 = vpop.f32.mrf.mxu1 }
  0xfa   :  { %v558_v26 = vrot.slane %v3166_v22, 1  ;;  %v439_v27 = vadd.f32 %v438_v24, %v353_v23 }
  0xfc   :  { %v559_v16 = vsel %vm552_vm1, %v556_v25, %v558_v26  ;;  %v554_v28 = vrot.slane %v439_v27, 1 }
  0xfd   :  { %v3172_v29 = vadd.f32 %v559_v16, %v248_v2  ;;  %v564_v16 = vsel %vm552_vm1, %v558_v26, 0.0 }
  0xfe   :  { %v555_v30 = vsel %vm552_vm1, %v553_v17, %v554_v28  ;;  %v557_v31 = vsel %vm552_vm1, %v554_v28, %v556_v25 }
  0xff   :  { %v3176_v32 = vadd.f32 %v555_v30, %v240_v5  ;;  %v3178_v33 = vadd.f32 %v557_v31, %v243_v13 }
 0x10a   :  { %v3180_v34 = vpop.f32.mrf.mxu0 }
 0x10b   :  { %v3182_v35 = vpop.f32.mrf.mxu1  ;;  %v577_v24 = vrot.slane %v3180_v34, 2 }
 0x10c   :  { %v3184_v36 = vpop.f32.mrf.mxu0 }
 0x10d   :  { %v3186_v37 = vpop.f32.mrf.mxu1 }
 0x10e   :  { %v2194_v38 = vpop.f32.mrf.mxu0 }
 0x10f   :  { %v3188_v39 = vpop.f32.mrf.mxu1  ;;  %v579_v20 = vrot.slane %v2194_v38, 2 }
 0x110   :  { %v3190_v40 = vpop.f32.mrf.mxu0 }
 0x111   :  { %v3192_v41 = vpop.f32.mrf.mxu1  ;;  %v580_v28 = vsel %vm573_vm2, %v577_v24, %v579_v20  ;;  %v585_v38 = vsel %vm573_vm2, %v579_v20, 0.0 }
 0x112   :  { %v3264_v20 = vadd.f32 %v580_v28, %v3172_v29 }
 0x122   :  { %v2225_v42 = vpop.f32.mrf.mxu0 }
 0x123   :  { %v2241_v43 = vpop.f32.mrf.mxu1 }
 0x124   :  { %v3194_v44 = vpop.f32.mrf.mxu0 }
 0x125   :  { %v882_v45 = vpop.f32.mrf.mxu1 }
 0x126   :  { %v2226_v46 = vpop.f32.mrf.mxu0 }
 0x127   :  { %v2242_v47 = vpop.f32.mrf.mxu1 }
 0x128   :  { %v3196_v48 = vpop.f32.mrf.mxu0 }
 0x129   :  { %v885_v49 = vpop.f32.mrf.mxu1  ;;  %v775_v28 = vadd.f32 %v3196_v48, %v3192_v41 }
 0x13a   :  { %v2257_v50 = vpop.f32.mrf.mxu0 }
 0x13b   :  { %v3198_v51 = vpop.f32.mrf.mxu1  ;;  %v976_v19 = vadd.f32 %v2257_v50, %v2241_v43  ;;  %v575_v43 = vrot.slane %v3190_v40, 2  ;;  %v780_v50 = vadd.f32 %v2225_v42, %v3182_v35  ;;  %v574_v40 = vrot.slane %v3184_v36, 2 }
 0x13c   :  { %v967_v52 = vpop.f32.mrf.mxu0 }
 0x13d   :  { %v3200_v53 = vpop.f32.mrf.mxu1  ;;  %v1087_v27 = vrot.slane %v976_v19, 1 }
 0x13e   :  { %v2258_v54 = vpop.f32.mrf.mxu0 }
 0x13f   :  { %v3202_v55 = vpop.f32.mrf.mxu1  ;;  %v979_v15 = vadd.f32 %v2258_v54, %v2242_v47  ;;  %v968_v47 = vadd.f32 %v967_v52, %v882_v45 }
 0x140   :  { %v970_v56 = vpop.f32.mrf.mxu0  ;;  %v1109_v26 = vrot.slane %v3202_v55, 2  ;;  %v576_v55 = vsel %vm573_vm2, %v574_v40, %v575_v43 }
 0x141   :  { %v3204_v57 = vpop.f32.mrf.mxu1  ;;  %v1089_v23 = vrot.slane %v979_v15, 1  ;;  %v971_v17 = vadd.f32 %v970_v56, %v885_v49  ;;  %v1107_v49 = vrot.slane %v3198_v51, 2  ;;  %v568_v56 = vadd.f32 %v564_v16, %v3143_v8 }
 0x142   :  { %v783_v15 = vadd.f32 %v2226_v46, %v3188_v39  ;;  %v1084_v42 = vrot.slane %v968_v47, 1  ;;  %v772_v8 = vadd.f32 %v3194_v44, %v3186_v37  ;;  %v3284_v44 = vadd.f32 %v576_v55, %v3176_v32 }
 0x143   :  { %v1090_v34 = vsel %vm552_vm1, %v1087_v27, %v1089_v23  ;;  %v1095_v22 = vsel %vm552_vm1, %v1089_v23, 0.0  ;;  %v1085_v19 = vrot.slane %v971_v17, 1  ;;  %v3266_v35 = vadd.f32 %v585_v38, %v568_v56 }
 0x144   :  { %v1098_v45 = vadd.f32 %v1090_v34, %v780_v50  ;;  %v1099_v51 = vadd.f32 %v1095_v22, %v783_v15  ;;  %v578_v23 = vsel %vm573_vm2, %v575_v43, %v577_v24  ;;  %v1110_v39 = vsel %vm573_vm2, %v1107_v49, %v1109_v26 }
 0x145   :  { %v1086_v36 = vsel %vm552_vm1, %v1084_v42, %v1085_v19  ;;  %v1088_v29 = vsel %vm552_vm1, %v1085_v19, %v1087_v27  ;;  %v1105_v17 = vrot.slane %v3204_v57, 2  ;;  %v1115_v38 = vsel %vm573_vm2, %v1109_v26, 0.0 }
 0x146   :  { %v3281_v24 = vadd.f32 %v1110_v39, %v1098_v45  ;;  %v1104_v47 = vrot.slane %v3200_v53, 2  ;;  %v3287_v34 = vadd.f32 %v1115_v38, %v1099_v51 }
 0x148   :  { %v1106_v32 = vsel %vm573_vm2, %v1104_v47, %v1105_v17 }
 0x152   :  { %v3206_v58 = vpop.f32.mrf.mxu0 }
 0x153   :  { %v3208_v59 = vpop.f32.mrf.mxu1 }
 0x154   :  { %v3210_v60 = vpop.f32.mrf.mxu0  ;;  %v1212_v57 = vadd.f32 %v3208_v59, %v3206_v58  ;;  %v1684_v58 = vmax.f32 %v3264_v20, %v3281_v24  ;;  %v1108_v59 = vsel %vm573_vm2, %v1105_v17, %v1107_v49 }
 0x155   :  { %v3212_v61 = vpop.f32.mrf.mxu1 }
 0x156   :  { %v2290_v62 = vpop.f32.mrf.mxu0  ;;  %v1204_v41 = vadd.f32 %v3212_v61, %v3210_v60 }
 0x157   :  { %v2306_v63 = vpop.f32.mrf.mxu1 }
 0x158   :  { %v1157_v0 = vpop.f32.mrf.mxu0  ;;  %v1215_v16 = vadd.f32 %v2306_v63, %v2290_v62  ;;  %v1096_v62 = vadd.f32 %v1086_v36, %v772_v8  ;;  %v1097_v63 = vadd.f32 %v1088_v29, %v775_v28  ;;  %v1320_v26 = vrot.slane %v1204_v41, 1 }
 0x159   :  { %v1206_v1 = vpop.f32.mrf.mxu1 }
 0x15a   :  { %v1207_v43 = vadd.f32 %v1206_v1, %v1157_v0  ;;  %v3295_v0 = vadd.f32 %v578_v23, %v3178_v33  ;;  %v1325_v1 = vrot.slane %v1215_v16, 1  ;;  %v1685_v33 = vmax.f32 %v3266_v35, %v3287_v34 }
 0x15c   :  { %v1321_v50 = vrot.slane %v1207_v43, 1 }
 0x16a   :  { %v3214_v2 = vpop.f32.mrf.mxu0 }
 0x16b   :  { %v3216_v3 = vpop.f32.mrf.mxu1 }
 0x16c   :  { %v3218_v4 = vpop.f32.mrf.mxu0  ;;  %v1310_v60 = vadd.f32 %v3216_v3, %v3214_v2 }
 0x16d   :  { %v3220_v5 = vpop.f32.mrf.mxu1 }
 0x16e   :  { %v3222_v6 = vpop.f32.mrf.mxu0  ;;  %v1388_v45 = vrot.slane %v1310_v60, 2 }
 0x16f   :  { %v2338_v7 = vpop.f32.mrf.mxu1 }
 0x170   :  { %v3224_v9 = vpop.f32.mrf.mxu0  ;;  %v1313_v48 = vadd.f32 %v2338_v7, %v3222_v6  ;;  %v1323_v6 = vrot.slane %v1212_v57, 1  ;;  %v1302_v7 = vadd.f32 %v3220_v5, %v3218_v4  ;;  %v1322_v5 = vsel %vm552_vm1, %v1320_v26, %v1321_v50 }
 0x171   :  { %v3226_v12 = vpop.f32.mrf.mxu1 }
 0x172   :  { %v1305_v53 = vadd.f32 %v3226_v12, %v3224_v9  ;;  %v3310_v9 = vadd.f32 %v1106_v32, %v1096_v62  ;;  %v3312_v12 = vadd.f32 %v1108_v59, %v1097_v63  ;;  %v1390_v49 = vrot.slane %v1313_v48, 2 }
 0x173   :  { %v1326_v2 = vsel %vm552_vm1, %v1323_v6, %v1325_v1  ;;  %v1385_v51 = vrot.slane %v1302_v7, 2 }
 0x174   :  { %v1386_v15 = vrot.slane %v1305_v53, 2 }
 0x176   :  { %v1387_v29 = vsel %vm573_vm2, %v1385_v51, %v1386_v15  ;;  %v1389_v17 = vsel %vm573_vm2, %v1386_v15, %v1388_v45 }
 0x182   :  { %v3228_v13 = vpop.f32.mrf.mxu0 }
 0x183   :  { %v3230_v10 = vpop.f32.mrf.mxu1  ;;  %v1375_v4 = vadd.f32 %v3228_v13, %v1326_v2 }
 0x184   :  { %v3232_v11 = vpop.f32.mrf.mxu0 }
 0x185   :  { %v3234_v14 = vpop.f32.mrf.mxu1 }
 0x186   :  { %v3236_v18 = vpop.f32.mrf.mxu0 }
 0x187   :  { %v3238_v21 = vpop.f32.mrf.mxu1 }
 0x188   :  { %v3241_v25 = vpop.f32.mrf.mxu0 }
 0x189   :  { %v3247_v30 = vpop.f32.mrf.mxu1 }
 0x19a   :  { %v3249_v31 = vpop.f32.mrf.mxu0 }
 0x19b   :  { %v3258_v54 = vpop.f32.mrf.mxu1  ;;  %v1493_v3 = vadd.f32 %v3249_v31, %v3230_v10  ;;  %v1396_v10 = vsel %vm573_vm2, %v1390_v49, 0.0  ;;  %v1324_v31 = vsel %vm552_vm1, %v1321_v50, %v1323_v6 }
 0x19c   :  { %v1484_v52 = vpop.f32.mrf.mxu0  ;;  %v1370_v57 = vadd.f32 %v3241_v25, %v1324_v31 }
 0x19d   :  { %v3273_v46 = vpop.f32.mrf.mxu1  ;;  %v1485_v23 = vadd.f32 %v1484_v52, %v3234_v14  ;;  %v1604_v16 = vrot.slane %v1493_v3, 1  ;;  %v1367_v14 = vadd.f32 %v3232_v11, %v1322_v5  ;;  %v1683_v5 = vmax.f32 %v3295_v0, %v3312_v12 }
 0x19e   :  { %v2386_v37 = vpop.f32.mrf.mxu0  ;;  %v1398_v15 = vadd.f32 %v1389_v17, %v1370_v57 }
 0x19f   :  { %v2402_v27 = vpop.f32.mrf.mxu1  ;;  %v1496_v22 = vadd.f32 %v2386_v37, %v3238_v21  ;;  %v1331_v21 = vsel %vm552_vm1, %v1325_v1, 0.0  ;;  %v1601_v62 = vrot.slane %v1485_v23, 1 }
 0x1a0   :  { %v1487_v61 = vpop.f32.mrf.mxu0  ;;  %v1378_v55 = vadd.f32 %v3236_v18, %v1331_v21  ;;  %v1946_v21 = vld [vmem:[%s3368_s3] ss:$0 sm:$0xff] }
 0x1a1   :  { %v1536_v56 = vpop.f32.mrf.mxu1  ;;  %v1488_v19 = vadd.f32 %v1487_v61, %v3247_v30  ;;  %v1606_v8 = vrot.slane %v1496_v22, 1  ;;  %v1391_v30 = vsel %vm573_vm2, %v1388_v45, %v1390_v49  ;;  %v1397_v49 = vadd.f32 %v1387_v29, %v1367_v14 }
 0x1a2   :  { %v1399_v38 = vadd.f32 %v1391_v30, %v1375_v4  ;;  %v1400_v47 = vadd.f32 %v1396_v10, %v1378_v55  ;;  %v1682_v4 = vmax.f32 %v3284_v44, %v3310_v9 }
 0x1a3   :  { %v1602_v28 = vrot.slane %v1488_v19, 1  ;;  %v1612_v32 = vsel %vm552_vm1, %v1606_v8, 0.0 }
 0x1a5   :  { %v1603_v11 = vsel %vm552_vm1, %v1601_v62, %v1602_v28 }
 0x1b2   :  { %v2417_v40 = vpop.f32.mrf.mxu0 }
 0x1b3   :  { %v2433_v42 = vpop.f32.mrf.mxu1  ;;  %v1591_v13 = vadd.f32 %v2417_v40, %v3258_v54  ;;  %v1607_v54 = vsel %vm552_vm1, %v1604_v16, %v1606_v8 }
 0x1b4   :  { %v1582_v39 = vpop.f32.mrf.mxu0  ;;  %v1656_v59 = vadd.f32 %v2433_v42, %v1607_v54 }
 0x1b5   :  { %v1647_v36 = vpop.f32.mrf.mxu1  ;;  %v1583_v52 = vadd.f32 %v1582_v39, %v3273_v46  ;;  %v1669_v41 = vrot.slane %v1591_v13, 2  ;;  %v1605_v46 = vsel %vm552_vm1, %v1602_v28, %v1604_v16 }
 0x1b6   :  { %v2418_v18 = vpop.f32.mrf.mxu0  ;;  %v1648_v6 = vadd.f32 %v1647_v36, %v1603_v11 }
 0x1b7   :  { %v1594_v43 = vadd.f32 %v2418_v18, %v2402_v27  ;;  %v2434_v37 = vpop.f32.mrf.mxu1  ;;  %v1666_v27 = vrot.slane %v1583_v52, 2 }
 0x1b8   :  { %v1585_v63 = vpop.f32.mrf.mxu0  ;;  %v1659_v50 = vadd.f32 %v2434_v37, %v1612_v32 }
 0x1b9   :  { %v1671_v48 = vrot.slane %v1594_v43, 2  ;;  %v1586_v1 = vadd.f32 %v1585_v63, %v1536_v56  ;;  %v1650_v53 = vpop.f32.mrf.mxu1 }
 0x1ba   :  { %v1651_v26 = vadd.f32 %v1650_v53, %v1605_v46 }
 0x1bb   :  { %v1672_v60 = vsel %vm573_vm2, %v1669_v41, %v1671_v48  ;;  %v1677_v25 = vsel %vm573_vm2, %v1671_v48, 0.0  ;;  %v1667_v61 = vrot.slane %v1586_v1, 2 }
 0x1bc   :  { %v1680_v7 = vadd.f32 %v1672_v60, %v1656_v59  ;;  %v1681_v22 = vadd.f32 %v1677_v25, %v1659_v50 }
 0x1bd   :  { %v1668_v56 = vsel %vm573_vm2, %v1666_v27, %v1667_v61  ;;  %v1670_v2 = vsel %vm573_vm2, %v1667_v61, %v1669_v41 }
 0x1be   :  { %v1688_v3 = vmax.f32 %v1399_v38, %v1680_v7  ;;  %v1689_v19 = vmax.f32 %v1400_v47, %v1681_v22  ;;  %v1678_v40 = vadd.f32 %v1668_v56, %v1648_v6  ;;  %v1679_v45 = vadd.f32 %v1670_v2, %v1651_v26 }
 0x1c0   :  { %v1692_v42 = vmax.f32 %v1684_v58, %v1688_v3  ;;  %v1693_v51 = vmax.f32 %v1685_v33, %v1689_v19  ;;  %v1686_v55 = vmax.f32 %v1397_v49, %v1678_v40  ;;  %v1687_v23 = vmax.f32 %v1398_v15, %v1679_v45 }
 0x1c2   :  { %v1703_v8 = vadd.f32 %v1946_v21, %v1692_v42  ;;  %v1704_v39 = vadd.f32 %v1946_v21, %v1693_v51  ;;  %v1690_v44 = vmax.f32 %v1682_v4, %v1686_v55  ;;  %v1691_v9 = vmax.f32 %v1683_v5, %v1687_v23 }
 0x1c4   :  { %v1707_v10 = vmax.f32 %v1703_v8, 0.0  ;;  %v1708_v0 = vmax.f32 %v1704_v39, 0.0  ;;  %v1701_v12 = vadd.f32 %v1946_v21, %v1690_v44  ;;  %v1702_v30 = vadd.f32 %v1946_v21, %v1691_v9 }
 0x1c6   :  { %v1953_v31 = vpack.c.bf16 %v1707_v10, %v1707_v10  ;;  %v1954_v13 = vpack.c.bf16 %v1708_v0, %v1708_v0  ;;  %v1705_v36 = vmax.f32 %v1701_v12, 0.0  ;;  %v1706_v20 = vmax.f32 %v1702_v30, 0.0 }
 0x1c8   :  { %1728 = vst.msk [vmem:[%s3369_s4 + $0x8] sm:$0xf] %vm1725_vm3, %v1953_v31  ;;  %1729 = vst.msk [vmem:[%s3369_s4 + $0xc] sm:$0xf] %vm1725_vm3, %v1954_v13  ;;  %v1951_v35 = vpack.c.bf16 %v1705_v36, %v1705_v36  ;;  %v1952_v24 = vpack.c.bf16 %v1706_v20, %v1706_v20 }
 0x1ca   :  { %1726 = vst.msk [vmem:[%s3369_s4] sm:$0xf] %vm1725_vm3, %v1951_v35  ;;  %1727 = vst.msk [vmem:[%s3369_s4 + $0x4] sm:$0xf] %vm1725_vm3, %v1952_v24 }

// kernel: tile.18
= control target key start
LH: loop header
LB: loop body
LE: loop exit
PB: predicated region body
PF: predicated region fallthrough
CT: control target
= control target key end

     0   :  { %s22_s0 = inlined_call_operand.vmem [shape: f32[16], index: 0, kind: input, shape index: {}]   ;;  %s23_s1 = inlined_call_operand.vmem [shape: f32[5,16], index: 1, kind: output, shape index: {}]  }
   0x1   :  { %v4_v0 = vld [vmem:[%s22_s0] ss:$0 sm:$0xff] }
   0x2   :  { %5 = vst [vmem:[%s23_s1] sm:$0xff] %v4_v0 }

// kernel: tile.19
= control target key start
LH: loop header
LB: loop body
LE: loop exit
PB: predicated region body
PF: predicated region fallthrough
CT: control target
= control target key end

     0   :  { %s45_s10 = smov 64   ;;  %s46_s11 = smov 32   ;;  %vm3_vm0 = vcmask 130048   ;;  %vm9_vm1 = vcmask 654848   ;;  %vm15_vm2 = vcmask 523648   ;;  %vm21_vm3 = vcmask 392448   ;;  %s77_s0 = inlined_call_operand.vmem [shape: f32[5,16], index: 0, kind: input, shape index: {}]   ;;  %s78_s1 = inlined_call_operand.vmem [shape: f32[1,80], index: 1, kind: output, shape index: {}]  }
   0x1   :  { %v37_v0 = vld [vmem:[%s77_s0 + $0x4] sm:$0x1]   ;;  %v39_v1 = vld [vmem:[%s77_s0 + $0x2] sm:$0x1]   ;;  %v38_v2 = vld [vmem:[%s77_s0 + $0x3] sm:$0x1]  }
   0x2   :  { %7 = vrot.lane.b32.xlu0 %v37_v0, %s45_s10  ;;  %19 = vrot.lane.b32.xlu1 %v39_v1, %s46_s11  ;;  %v40_v3 = vld [vmem:[%s77_s0 + $0x1] sm:$0x1]   ;;  %v2_v4 = vld [vmem:[%s77_s0] sm:$0x1]   ;;  %s47_s0 = smov 48   ;;  %s48_s18 = smov 16  }
   0x3   :  { %4 = vst.msk [vmem:[#allocation0] sm:$0x1] %vm3_vm0, %v2_v4   ;;  %vm27_vm4 = vcmask 261248  }
   0x6   :  { %13 = vrot.lane.b32.xlu0 %v38_v2, %s47_s0  ;;  %25 = vrot.lane.b32.xlu1 %v40_v3, %s48_s18 }
  0x74   :  { %v8_v5 = vpop.permute.xlu0 %7   ;;  %v20_v6 = vpop.permute.xlu1 %19  }
  0x75   :  { %10 = vst.msk [vmem:[#allocation0] sm:$0x1] %vm9_vm1, %v8_v5  }
  0x78   :  { %v14_v7 = vpop.permute.xlu0 %13   ;;  %v26_v8 = vpop.permute.xlu1 %25  }
  0x79   :  { %16 = vst.msk [vmem:[#allocation0] sm:$0x1] %vm15_vm2, %v14_v7  }
  0x7a   :  { %22 = vst.msk [vmem:[#allocation0] sm:$0x1] %vm21_vm3, %v20_v6  }
  0x7b   :  { %28 = vst.msk [vmem:[#allocation0] sm:$0x1] %vm27_vm4, %v26_v8  }
  0x82   :  { %v33_v9 = vld [vmem:[#allocation0] sm:$0x1] }
  0x83   :  { %36 = vst [vmem:[%s78_s1] sm:$0x1] %v33_v9 }

// kernel: lenet_cifar10_forward.4
= control target key start
LH: loop header
LB: loop body
LE: loop exit
PB: predicated region body
PF: predicated region fallthrough
CT: control target
= control target key end

     0   :  { %vm87_vm0 = vcmask 1041408   ;;  %v2159_v0 = vmov 0.0   ;;  %vm2160_vm1 = vmmov 0   ;;  %vm83_vm2 = vcmask 687104   ;;  %s2869_s2 = inlined_call_operand.vmem [shape: bf16[10,84,80], index: 2, kind: input, shape index: {}]   ;;  %s2870_s1 = inlined_call_operand.vmem [shape: bf16[16,84], index: 1, kind: input, shape index: {}]   ;;  %s2871_s0 = inlined_call_operand.vmem [shape: bf16[16,84], index: 0, kind: input, shape index: {}]   ;;  %s2872_s3 = inlined_call_operand.vmem [shape: f32[1,80], index: 3, kind: input, shape index: {}]   ;;  %s2873_s4 = inlined_call_operand.vmem [shape: bf16[16,80], index: 4, kind: output, shape index: {}]  }
   0x1   :  { %1775 = vmatprep.subr.bf16.mxu0 %v2159_v0  ;;  %1791 = vmatprep.subr.bf16.mxu1 %v2159_v0  ;;  %v2097_v1 = vld [vmem:[%s2869_s2 + $0x80] ss:$0 sps:$4 sm:$0x33]   ;;  %v2098_v2 = vld [vmem:[%s2869_s2 + $0x28] ss:$0 sps:$4 sm:$0x33]  }
   0x2   :  { %1787 = vmatprep.mubr.msk.bf16.mxu0 %vm2160_vm1, %v2159_v0  ;;  %1803 = vmatprep.mubr.msk.bf16.mxu1 %vm2160_vm1, %v2159_v0  ;;  %v2199_v3 = vsel %vm87_vm0, %v2097_v1, 0  ;;  %v2204_v4 = vld [vmem:[%s2869_s2 + $0x78] sm:$0xff]   ;;  %v2208_v5 = vsel %vm87_vm0, %v2098_v2, 0  ;;  %v2213_v6 = vld [vmem:[%s2869_s2 + $0x20] sm:$0xff]   ;;  %v2222_v7 = vld [vmem:[%s2869_s2 + $0x70] sm:$0xff]   ;;  %vm486_vm3 = vcmask 1046528  }
   0x3   :  { %1776 = vmatpush3.bf16.msra.mxu0 %v2199_v3  ;;  %1792 = vmatpush3.bf16.msra.mxu1 %v2208_v5  ;;  %v2229_v8 = vld [vmem:[%s2869_s2 + $0x18] sm:$0xff]   ;;  %v2236_v9 = vld [vmem:[%s2869_s2 + $0x68] sm:$0xff]   ;;  %v2243_v10 = vld [vmem:[%s2869_s2 + $0x10] sm:$0xff]   ;;  %vm497_vm4 = vcmask 1045504   ;;  %vm1442_vm5 = vcmask 650240  }
   0x4   :  { %1777 = vmatprep.subr.bf16.mxu0 %v2159_v0  ;;  %1793 = vmatprep.subr.bf16.mxu1 %v2159_v0  ;;  %v2250_v11 = vld [vmem:[%s2869_s2 + $0x60] sm:$0xff]   ;;  %v2257_v12 = vld [vmem:[%s2869_s2 + $0x8] sm:$0xff]   ;;  %v2111_v13 = vld [vmem:[%s2869_s2 + $0x130] ss:$0 sps:$4 sm:$0x33]  }
   0x5   :  { %v2267_v14 = vld [vmem:[%s2869_s2 + $0x58] sm:$0xff]   ;;  %v2277_v16 = vld [vmem:[%s2869_s2] sm:$0xff]   ;;  %v2294_v19 = vsel %vm87_vm0, %v2111_v13, 0  ;;  %v2308_v21 = vld [vmem:[%s2869_s2 + $0x128] sm:$0xff]  }
   0x6   :  { %v2112_v15 = vld [vmem:[%s2869_s2 + $0xd8] ss:$0 sps:$4 sm:$0x33]   ;;  %v2283_v17 = vld [vmem:[%s2870_s1] sm:$0xff]   ;;  %v2315_v22 = vld [vmem:[%s2869_s2 + $0xd0] sm:$0xff]  }
   0x7   :  { %1778 = vmatpush3.bf16.msra.mxu0 %v2204_v4  ;;  %1794 = vmatpush3.bf16.msra.mxu1 %v2213_v6  ;;  %v2289_v18 = vld [vmem:[%s2871_s0] sm:$0xff]   ;;  %v2298_v20 = vsel %vm87_vm0, %v2112_v15, 0  ;;  %v2333_v24 = vld [vmem:[%s2869_s2 + $0xc8] sm:$0xff]   ;;  %v2340_v25 = vld [vmem:[%s2869_s2 + $0x118] sm:$0xff]  }
   0x8   :  { %1779 = vmatprep.subr.bf16.mxu0 %v2159_v0  ;;  %1795 = vmatprep.subr.bf16.mxu1 %v2159_v0  ;;  %v2326_v23 = vld [vmem:[%s2869_s2 + $0x120] sm:$0xff]   ;;  %v2135_v27 = vld [vmem:[%s2869_s2 + $0x54] ss:$0 sps:$4 sm:$0x33]   ;;  %v2368_v31 = vld [vmem:[%s2869_s2 + $0xb8] sm:$0xff]  }
   0x9   :  { %v2347_v26 = vld [vmem:[%s2869_s2 + $0xc0] sm:$0xff]   ;;  %v2136_v28 = vld [vmem:[%s2869_s2 + $0x15c] ss:$0 sps:$4 sm:$0x33]   ;;  %v2359_v29 = vld [vmem:[%s2869_s2 + $0x110] sm:$0xff]   ;;  %v2362_v30 = vsel %vm87_vm0, %v2135_v27, 0 }
   0xa   :  { %v2371_v32 = vsel %vm87_vm0, %v2136_v28, 0  ;;  %v2123_v33 = vld [vmem:[%s2869_s2 + $0x188] ss:$0 sps:$4 sm:$0x33]   ;;  %v2393_v36 = vld [vmem:[%s2869_s2 + $0xb0] sm:$0xff]   ;;  %v2420_v42 = vld [vmem:[%s2869_s2 + $0x180] sm:$0xff]  }
   0xb   :  { %1780 = vmatpush3.bf16.msra.mxu0 %v2222_v7  ;;  %1796 = vmatpush3.bf16.msra.mxu1 %v2229_v8  ;;  %v2383_v34 = vld [vmem:[%s2869_s2 + $0x108] sm:$0xff]   ;;  %v2147_v37 = vld [vmem:[%s2869_s2 + $0x104] ss:$0 sps:$4 sm:$0x33]   ;;  %v2403_v38 = vsel %vm87_vm0, %v2123_v33, 0  ;;  %v2444_v45 = vld [vmem:[%s2869_s2 + $0x178] sm:$0xff]  }
   0xc   :  { %1781 = vmatprep.subr.bf16.mxu0 %v2159_v0  ;;  %1797 = vmatprep.subr.bf16.mxu1 %v2159_v0  ;;  %v2124_v35 = vld [vmem:[%s2869_s2 + $0xac] ss:$0 sps:$4 sm:$0x33]   ;;  %v2148_v39 = vld [vmem:[%s2869_s2 + $0x1b4] ss:$0 sps:$4 sm:$0x33]  }
   0xd   :  { %v2410_v40 = vsel %vm87_vm0, %v2124_v35, 0  ;;  %v2413_v41 = vsel %vm87_vm0, %v2147_v37, 0  ;;  %v2423_v43 = vsel %vm87_vm0, %v2148_v39, 0  ;;  %v2433_v44 = vld [vmem:[%s2869_s2 + $0xa4] sm:$0xff]   ;;  %v2451_v46 = vld [vmem:[%s2869_s2 + $0x9c] sm:$0xff]   ;;  %v2458_v47 = vld [vmem:[%s2869_s2 + $0x170] sm:$0xff]  }
   0xe   :  { %v2465_v48 = vld [vmem:[%s2869_s2 + $0x94] sm:$0xff]   ;;  %v2472_v49 = vld [vmem:[%s2869_s2 + $0x168] sm:$0xff]   ;;  %v2486_v51 = vld [vmem:[%s2869_s2 + $0x160] sm:$0xff]  }
   0xf   :  { %1782 = vmatpush3.bf16.msra.mxu0 %v2236_v9  ;;  %1798 = vmatpush3.bf16.msra.mxu1 %v2243_v10  ;;  %v2479_v50 = vld [vmem:[%s2869_s2 + $0x8c] sm:$0xff]   ;;  %v2493_v52 = vld [vmem:[%s2869_s2 + $0x84] sm:$0xff]   ;;  %v2515_v54 = vld [vmem:[%s2869_s2 + $0x154] sm:$0xff]  }
  0x10   :  { %1783 = vmatprep.subr.bf16.mxu0 %v2159_v0  ;;  %1799 = vmatprep.subr.bf16.mxu1 %v2159_v0  ;;  %v2508_v53 = vld [vmem:[%s2869_s2 + $0x4c] sm:$0xff]   ;;  %v2526_v55 = vld [vmem:[%s2869_s2 + $0x44] sm:$0xff]   ;;  %v2540_v57 = vld [vmem:[%s2869_s2 + $0x3c] sm:$0xff]  }
  0x11   :  { %v2533_v56 = vld [vmem:[%s2869_s2 + $0x14c] sm:$0xff]   ;;  %v2547_v58 = vld [vmem:[%s2869_s2 + $0x144] sm:$0xff]   ;;  %v2554_v59 = vld [vmem:[%s2869_s2 + $0x34] sm:$0xff]  }
  0x12   :  { %v2561_v60 = vld [vmem:[%s2869_s2 + $0x13c] sm:$0xff]   ;;  %v2568_v61 = vld [vmem:[%s2869_s2 + $0x2c] sm:$0xff]   ;;  %v2575_v62 = vld [vmem:[%s2869_s2 + $0x134] sm:$0xff]  }
  0x13   :  { %1784 = vmatpush3.bf16.msra.mxu0 %v2250_v11  ;;  %1800 = vmatpush3.bf16.msra.mxu1 %v2257_v12  ;;  %v2590_v63 = vld [vmem:[%s2869_s2 + $0xfc] sm:$0xff]   ;;  %v2597_v1 = vld [vmem:[%s2869_s2 + $0x1ac] sm:$0xff]   ;;  %v2608_v2 = vld [vmem:[%s2869_s2 + $0xf4] sm:$0xff]  }
  0x14   :  { %1785 = vmatprep.subr.bf16.mxu0 %v2159_v0  ;;  %1801 = vmatprep.subr.bf16.mxu1 %v2159_v0  ;;  %v2615_v13 = vld [vmem:[%s2869_s2 + $0x1a4] sm:$0xff]   ;;  %v2622_v15 = vld [vmem:[%s2869_s2 + $0xec] sm:$0xff]   ;;  %v2629_v27 = vld [vmem:[%s2869_s2 + $0x19c] sm:$0xff]  }
  0x15   :  { %v2636_v28 = vld [vmem:[%s2869_s2 + $0xe4] sm:$0xff]   ;;  %v2643_v33 = vld [vmem:[%s2869_s2 + $0x194] sm:$0xff]   ;;  %v2650_v35 = vld [vmem:[%s2869_s2 + $0xdc] sm:$0xff]  }
  0x16   :  { %v2657_v37 = vld [vmem:[%s2869_s2 + $0x18c] sm:$0xff]  }
  0x17   :  { %1786 = vmatpush3.bf16.msra.mxu0 %v2267_v14  ;;  %1802 = vmatpush3.bf16.msra.mxu1 %v2277_v16 }
  0x18   :  { %1807 = vmatprep.subr.bf16.mxu0 %v2159_v0  ;;  %1823 = vmatprep.subr.bf16.mxu1 %v2159_v0 }
  0x1a   :  { %1788 = vmatmul.mubr.msk.bf16.vlgmr.msra.gmra.mxu0 %vm83_vm2, %v2283_v17  ;;  %1804 = vmatmul.mubr.msk.bf16.vlgmr.msra.gmra.mxu1 %vm83_vm2, %v2289_v18 }
  0x1b   :  { %1808 = vmatpush3.bf16.msra.mxu0 %v2294_v19  ;;  %1824 = vmatpush3.bf16.msra.mxu1 %v2298_v20 }
  0x1c   :  { %1809 = vmatprep.subr.bf16.mxu0 %v2159_v0  ;;  %1825 = vmatprep.subr.bf16.mxu1 %v2159_v0 }
  0x1d   :  { %1819 = vmatprep.mubr.msk.bf16.mxu0 %vm2160_vm1, %v2159_v0  ;;  %1835 = vmatprep.mubr.msk.bf16.mxu1 %vm2160_vm1, %v2159_v0 }
  0x1f   :  { %1810 = vmatpush3.bf16.msra.mxu0 %v2308_v21  ;;  %1826 = vmatpush3.bf16.msra.mxu1 %v2315_v22 }
  0x20   :  { %1811 = vmatprep.subr.bf16.mxu0 %v2159_v0  ;;  %1827 = vmatprep.subr.bf16.mxu1 %v2159_v0 }
  0x23   :  { %1812 = vmatpush3.bf16.msra.mxu0 %v2326_v23  ;;  %1828 = vmatpush3.bf16.msra.mxu1 %v2333_v24 }
  0x24   :  { %1813 = vmatprep.subr.bf16.mxu0 %v2159_v0  ;;  %1829 = vmatprep.subr.bf16.mxu1 %v2159_v0 }
  0x27   :  { %1814 = vmatpush3.bf16.msra.mxu0 %v2340_v25  ;;  %1830 = vmatpush3.bf16.msra.mxu1 %v2347_v26 }
  0x28   :  { %1815 = vmatprep.subr.bf16.mxu0 %v2159_v0  ;;  %1831 = vmatprep.subr.bf16.mxu1 %v2159_v0 }
  0x2b   :  { %1816 = vmatpush3.bf16.msra.mxu0 %v2359_v29  ;;  %1832 = vmatpush3.bf16.msra.mxu1 %v2368_v31 }
  0x2c   :  { %1817 = vmatprep.subr.bf16.mxu0 %v2159_v0  ;;  %1833 = vmatprep.subr.bf16.mxu1 %v2159_v0 }
  0x2f   :  { %1818 = vmatpush3.bf16.msra.mxu0 %v2383_v34  ;;  %1834 = vmatpush3.bf16.msra.mxu1 %v2393_v36 }
  0x30   :  { %1839 = vmatprep.subr.bf16.mxu0 %v2159_v0  ;;  %1855 = vmatprep.subr.bf16.mxu1 %v2159_v0 }
  0x32   :  { %1820 = vmatmul.mubr.msk.bf16.vlgmr.msra.gmra.mxu0 %vm83_vm2, %v2283_v17  ;;  %1836 = vmatmul.mubr.msk.bf16.vlgmr.msra.gmra.mxu1 %vm83_vm2, %v2289_v18 }
  0x33   :  { %1840 = vmatpush3.bf16.msra.mxu0 %v2403_v38  ;;  %1856 = vmatpush3.bf16.msra.mxu1 %v2410_v40 }
  0x34   :  { %1841 = vmatprep.subr.bf16.mxu0 %v2159_v0  ;;  %1857 = vmatprep.subr.bf16.mxu1 %v2159_v0 }
  0x35   :  { %1851 = vmatprep.mubr.msk.bf16.mxu0 %vm2160_vm1, %v2159_v0  ;;  %1867 = vmatprep.mubr.msk.bf16.mxu1 %vm2160_vm1, %v2159_v0 }
  0x37   :  { %1842 = vmatpush3.bf16.msra.mxu0 %v2420_v42  ;;  %1858 = vmatpush3.bf16.msra.mxu1 %v2433_v44 }
  0x38   :  { %1843 = vmatprep.subr.bf16.mxu0 %v2159_v0  ;;  %1859 = vmatprep.subr.bf16.mxu1 %v2159_v0 }
  0x3b   :  { %1844 = vmatpush3.bf16.msra.mxu0 %v2444_v45  ;;  %1860 = vmatpush3.bf16.msra.mxu1 %v2451_v46 }
  0x3c   :  { %1845 = vmatprep.subr.bf16.mxu0 %v2159_v0  ;;  %1861 = vmatprep.subr.bf16.mxu1 %v2159_v0 }
  0x3f   :  { %1846 = vmatpush3.bf16.msra.mxu0 %v2458_v47  ;;  %1862 = vmatpush3.bf16.msra.mxu1 %v2465_v48 }
  0x40   :  { %1847 = vmatprep.subr.bf16.mxu0 %v2159_v0  ;;  %1863 = vmatprep.subr.bf16.mxu1 %v2159_v0 }
  0x43   :  { %1848 = vmatpush3.bf16.msra.mxu0 %v2472_v49  ;;  %1864 = vmatpush3.bf16.msra.mxu1 %v2479_v50 }
  0x44   :  { %1849 = vmatprep.subr.bf16.mxu0 %v2159_v0  ;;  %1865 = vmatprep.subr.bf16.mxu1 %v2159_v0 }
  0x47   :  { %1850 = vmatpush3.bf16.msra.mxu0 %v2486_v51  ;;  %1866 = vmatpush3.bf16.msra.mxu1 %v2493_v52 }
  0x48   :  { %1871 = vmatprep.subr.bf16.mxu0 %v2159_v0  ;;  %1887 = vmatprep.subr.bf16.mxu1 %v2159_v0 }
  0x4a   :  { %1852 = vmatmul.mubr.msk.bf16.vlgmr.msra.gmra.mxu0 %vm83_vm2, %v2289_v18  ;;  %1868 = vmatmul.mubr.msk.bf16.vlgmr.msra.gmra.mxu1 %vm83_vm2, %v2283_v17 }
  0x4b   :  { %1872 = vmatpush3.bf16.msra.mxu0 %v2362_v30  ;;  %1888 = vmatpush3.bf16.msra.mxu1 %v2371_v32 }
  0x4c   :  { %1873 = vmatprep.subr.bf16.mxu0 %v2159_v0  ;;  %1889 = vmatprep.subr.bf16.mxu1 %v2159_v0 }
  0x4d   :  { %1883 = vmatprep.mubr.msk.bf16.mxu0 %vm2160_vm1, %v2159_v0  ;;  %1899 = vmatprep.mubr.msk.bf16.mxu1 %vm2160_vm1, %v2159_v0 }
  0x4f   :  { %1874 = vmatpush3.bf16.msra.mxu0 %v2508_v53  ;;  %1890 = vmatpush3.bf16.msra.mxu1 %v2515_v54 }
  0x50   :  { %1875 = vmatprep.subr.bf16.mxu0 %v2159_v0  ;;  %1891 = vmatprep.subr.bf16.mxu1 %v2159_v0 }
  0x53   :  { %1876 = vmatpush3.bf16.msra.mxu0 %v2526_v55  ;;  %1892 = vmatpush3.bf16.msra.mxu1 %v2533_v56 }
  0x54   :  { %1877 = vmatprep.subr.bf16.mxu0 %v2159_v0  ;;  %1893 = vmatprep.subr.bf16.mxu1 %v2159_v0 }
  0x57   :  { %1878 = vmatpush3.bf16.msra.mxu0 %v2540_v57  ;;  %1894 = vmatpush3.bf16.msra.mxu1 %v2547_v58 }
  0x58   :  { %1879 = vmatprep.subr.bf16.mxu0 %v2159_v0  ;;  %1895 = vmatprep.subr.bf16.mxu1 %v2159_v0 }
  0x5b   :  { %1880 = vmatpush3.bf16.msra.mxu0 %v2554_v59  ;;  %1896 = vmatpush3.bf16.msra.mxu1 %v2561_v60 }
  0x5c   :  { %1881 = vmatprep.subr.bf16.mxu0 %v2159_v0  ;;  %1897 = vmatprep.subr.bf16.mxu1 %v2159_v0 }
  0x5f   :  { %1882 = vmatpush3.bf16.msra.mxu0 %v2568_v61  ;;  %1898 = vmatpush3.bf16.msra.mxu1 %v2575_v62 }
  0x60   :  { %1903 = vmatprep.subr.bf16.mxu0 %v2159_v0  ;;  %1919 = vmatprep.subr.bf16.mxu1 %v2159_v0 }
  0x62   :  { %1884 = vmatmul.mubr.msk.bf16.vlgmr.msra.gmra.mxu0 %vm83_vm2, %v2289_v18  ;;  %1900 = vmatmul.mubr.msk.bf16.vlgmr.msra.gmra.mxu1 %vm83_vm2, %v2283_v17 }
  0x63   :  { %1904 = vmatpush3.bf16.msra.mxu0 %v2413_v41  ;;  %1920 = vmatpush3.bf16.msra.mxu1 %v2423_v43 }
  0x64   :  { %1905 = vmatprep.subr.bf16.mxu0 %v2159_v0  ;;  %1921 = vmatprep.subr.bf16.mxu1 %v2159_v0 }
  0x65   :  { %1915 = vmatprep.mubr.msk.bf16.mxu0 %vm2160_vm1, %v2159_v0  ;;  %1931 = vmatprep.mubr.msk.bf16.mxu1 %vm2160_vm1, %v2159_v0 }
  0x67   :  { %1906 = vmatpush3.bf16.msra.mxu0 %v2590_v63  ;;  %1922 = vmatpush3.bf16.msra.mxu1 %v2597_v1 }
  0x68   :  { %1907 = vmatprep.subr.bf16.mxu0 %v2159_v0  ;;  %1923 = vmatprep.subr.bf16.mxu1 %v2159_v0 }
  0x6b   :  { %1908 = vmatpush3.bf16.msra.mxu0 %v2608_v2  ;;  %1924 = vmatpush3.bf16.msra.mxu1 %v2615_v13 }
  0x6c   :  { %1909 = vmatprep.subr.bf16.mxu0 %v2159_v0  ;;  %1925 = vmatprep.subr.bf16.mxu1 %v2159_v0 }
  0x6f   :  { %1910 = vmatpush3.bf16.msra.mxu0 %v2622_v15  ;;  %1926 = vmatpush3.bf16.msra.mxu1 %v2629_v27 }
  0x70   :  { %1911 = vmatprep.subr.bf16.mxu0 %v2159_v0  ;;  %1927 = vmatprep.subr.bf16.mxu1 %v2159_v0 }
  0x73   :  { %1912 = vmatpush3.bf16.msra.mxu0 %v2636_v28  ;;  %1928 = vmatpush3.bf16.msra.mxu1 %v2643_v33 }
  0x74   :  { %1913 = vmatprep.subr.bf16.mxu0 %v2159_v0  ;;  %1929 = vmatprep.subr.bf16.mxu1 %v2159_v0 }
  0x77   :  { %1914 = vmatpush3.bf16.msra.mxu0 %v2650_v35  ;;  %1930 = vmatpush3.bf16.msra.mxu1 %v2657_v37 }
  0x78   :  { %1935 = vmatprep.subr.bf16.mxu0 %v2159_v0  ;;  %1951 = vmatprep.subr.bf16.mxu1 %v2159_v0 }
  0x7a   :  { %1916 = vmatmul.mubr.msk.bf16.vlgmr.msra.gmra.mxu0 %vm83_vm2, %v2289_v18  ;;  %1932 = vmatmul.mubr.msk.bf16.vlgmr.msra.gmra.mxu1 %vm83_vm2, %v2289_v18 }
  0x7b   :  { %1936 = vmatpush3.bf16.msra.mxu0 %v2298_v20  ;;  %1952 = vmatpush3.bf16.msra.mxu1 %v2199_v3 }
  0x7c   :  { %1937 = vmatprep.subr.bf16.mxu0 %v2159_v0  ;;  %1953 = vmatprep.subr.bf16.mxu1 %v2159_v0 }
  0x7d   :  { %1947 = vmatprep.mubr.msk.bf16.mxu0 %vm2160_vm1, %v2159_v0  ;;  %1963 = vmatprep.mubr.msk.bf16.mxu1 %vm2160_vm1, %v2159_v0 }
  0x7f   :  { %1938 = vmatpush3.bf16.msra.mxu0 %v2315_v22  ;;  %1954 = vmatpush3.bf16.msra.mxu1 %v2204_v4 }
  0x80   :  { %1939 = vmatprep.subr.bf16.mxu0 %v2159_v0  ;;  %1955 = vmatprep.subr.bf16.mxu1 %v2159_v0 }
  0x83   :  { %1940 = vmatpush3.bf16.msra.mxu0 %v2333_v24  ;;  %1956 = vmatpush3.bf16.msra.mxu1 %v2222_v7 }
  0x84   :  { %1941 = vmatprep.subr.bf16.mxu0 %v2159_v0  ;;  %1957 = vmatprep.subr.bf16.mxu1 %v2159_v0 }
  0x87   :  { %1942 = vmatpush3.bf16.msra.mxu0 %v2347_v26  ;;  %1958 = vmatpush3.bf16.msra.mxu1 %v2236_v9 }
  0x88   :  { %1943 = vmatprep.subr.bf16.mxu0 %v2159_v0  ;;  %1959 = vmatprep.subr.bf16.mxu1 %v2159_v0 }
  0x8b   :  { %1944 = vmatpush3.bf16.msra.mxu0 %v2368_v31  ;;  %1960 = vmatpush3.bf16.msra.mxu1 %v2250_v11 }
  0x8c   :  { %1945 = vmatprep.subr.bf16.mxu0 %v2159_v0  ;;  %1961 = vmatprep.subr.bf16.mxu1 %v2159_v0 }
  0x8f   :  { %1946 = vmatpush3.bf16.msra.mxu0 %v2393_v36  ;;  %1962 = vmatpush3.bf16.msra.mxu1 %v2267_v14 }
  0x90   :  { %1967 = vmatprep.subr.bf16.mxu0 %v2159_v0  ;;  %1983 = vmatprep.subr.bf16.mxu1 %v2159_v0 }
  0x92   :  { %1948 = vmatmul.mubr.msk.bf16.vlgmr.msra.gmra.mxu0 %vm83_vm2, %v2283_v17  ;;  %1964 = vmatmul.mubr.msk.bf16.vlgmr.msra.gmra.mxu1 %vm83_vm2, %v2289_v18 }
  0x93   :  { %1968 = vmatpush3.bf16.msra.mxu0 %v2403_v38  ;;  %1984 = vmatpush3.bf16.msra.mxu1 %v2294_v19 }
  0x94   :  { %1969 = vmatprep.subr.bf16.mxu0 %v2159_v0  ;;  %1985 = vmatprep.subr.bf16.mxu1 %v2159_v0 }
  0x95   :  { %1979 = vmatprep.mubr.msk.bf16.mxu0 %vm2160_vm1, %v2159_v0  ;;  %1995 = vmatprep.mubr.msk.bf16.mxu1 %vm2160_vm1, %v2159_v0 }
  0x97   :  { %1970 = vmatpush3.bf16.msra.mxu0 %v2420_v42  ;;  %1986 = vmatpush3.bf16.msra.mxu1 %v2308_v21 }
  0x98   :  { %1971 = vmatprep.subr.bf16.mxu0 %v2159_v0  ;;  %1987 = vmatprep.subr.bf16.mxu1 %v2159_v0 }
  0x9b   :  { %1972 = vmatpush3.bf16.msra.mxu0 %v2444_v45  ;;  %1988 = vmatpush3.bf16.msra.mxu1 %v2326_v23 }
  0x9c   :  { %1973 = vmatprep.subr.bf16.mxu0 %v2159_v0  ;;  %1989 = vmatprep.subr.bf16.mxu1 %v2159_v0 }
  0x9f   :  { %1974 = vmatpush3.bf16.msra.mxu0 %v2458_v47  ;;  %1990 = vmatpush3.bf16.msra.mxu1 %v2340_v25 }
  0xa0   :  { %1975 = vmatprep.subr.bf16.mxu0 %v2159_v0  ;;  %1991 = vmatprep.subr.bf16.mxu1 %v2159_v0 }
  0xa3   :  { %1976 = vmatpush3.bf16.msra.mxu0 %v2472_v49  ;;  %1992 = vmatpush3.bf16.msra.mxu1 %v2359_v29 }
  0xa4   :  { %1977 = vmatprep.subr.bf16.mxu0 %v2159_v0  ;;  %1993 = vmatprep.subr.bf16.mxu1 %v2159_v0 }
  0xa7   :  { %1978 = vmatpush3.bf16.msra.mxu0 %v2486_v51  ;;  %1994 = vmatpush3.bf16.msra.mxu1 %v2383_v34 }
  0xa8   :  { %1999 = vmatprep.subr.bf16.mxu0 %v2159_v0  ;;  %2015 = vmatprep.subr.bf16.mxu1 %v2159_v0 }
  0xaa   :  { %1980 = vmatmul.mubr.msk.bf16.vlgmr.msra.gmra.mxu0 %vm83_vm2, %v2283_v17  ;;  %1996 = vmatmul.mubr.msk.bf16.vlgmr.msra.gmra.mxu1 %vm83_vm2, %v2289_v18 }
  0xab   :  { %2000 = vmatpush3.bf16.msra.mxu0 %v2208_v5  ;;  %2016 = vmatpush3.bf16.msra.mxu1 %v2413_v41 }
  0xac   :  { %2001 = vmatprep.subr.bf16.mxu0 %v2159_v0  ;;  %2017 = vmatprep.subr.bf16.mxu1 %v2159_v0 }
  0xad   :  { %2011 = vmatprep.mubr.msk.bf16.mxu0 %vm2160_vm1, %v2159_v0  ;;  %2027 = vmatprep.mubr.msk.bf16.mxu1 %vm2160_vm1, %v2159_v0 }
  0xaf   :  { %2002 = vmatpush3.bf16.msra.mxu0 %v2213_v6  ;;  %2018 = vmatpush3.bf16.msra.mxu1 %v2590_v63 }
  0xb0   :  { %2003 = vmatprep.subr.bf16.mxu0 %v2159_v0  ;;  %2019 = vmatprep.subr.bf16.mxu1 %v2159_v0 }
  0xb3   :  { %2004 = vmatpush3.bf16.msra.mxu0 %v2229_v8  ;;  %2020 = vmatpush3.bf16.msra.mxu1 %v2608_v2 }
  0xb4   :  { %2005 = vmatprep.subr.bf16.mxu0 %v2159_v0  ;;  %2021 = vmatprep.subr.bf16.mxu1 %v2159_v0 }
  0xb7   :  { %2006 = vmatpush3.bf16.msra.mxu0 %v2243_v10  ;;  %2022 = vmatpush3.bf16.msra.mxu1 %v2622_v15 }
  0xb8   :  { %2007 = vmatprep.subr.bf16.mxu0 %v2159_v0  ;;  %2023 = vmatprep.subr.bf16.mxu1 %v2159_v0 }
  0xbb   :  { %2008 = vmatpush3.bf16.msra.mxu0 %v2257_v12  ;;  %2024 = vmatpush3.bf16.msra.mxu1 %v2636_v28 }
  0xbc   :  { %2009 = vmatprep.subr.bf16.mxu0 %v2159_v0  ;;  %2025 = vmatprep.subr.bf16.mxu1 %v2159_v0 }
  0xbf   :  { %2010 = vmatpush3.bf16.msra.mxu0 %v2277_v16  ;;  %2026 = vmatpush3.bf16.msra.mxu1 %v2650_v35 }
  0xc0   :  { %2031 = vmatprep.subr.bf16.mxu0 %v2159_v0  ;;  %2047 = vmatprep.subr.bf16.mxu1 %v2159_v0 }
  0xc2   :  { %2012 = vmatmul.mubr.msk.bf16.vlgmr.msra.gmra.mxu0 %vm83_vm2, %v2283_v17  ;;  %2028 = vmatmul.mubr.msk.bf16.vlgmr.msra.gmra.mxu1 %vm83_vm2, %v2283_v17 }
  0xc3   :  { %2032 = vmatpush3.bf16.msra.mxu0 %v2410_v40  ;;  %2048 = vmatpush3.bf16.msra.mxu1 %v2423_v43 }
  0xc4   :  { %2033 = vmatprep.subr.bf16.mxu0 %v2159_v0  ;;  %2049 = vmatprep.subr.bf16.mxu1 %v2159_v0 }
  0xc5   :  { %2043 = vmatprep.mubr.msk.bf16.mxu0 %vm2160_vm1, %v2159_v0  ;;  %2059 = vmatprep.mubr.msk.bf16.mxu1 %vm2160_vm1, %v2159_v0 }
  0xc7   :  { %2034 = vmatpush3.bf16.msra.mxu0 %v2433_v44  ;;  %2050 = vmatpush3.bf16.msra.mxu1 %v2597_v1 }
  0xc8   :  { %2035 = vmatprep.subr.bf16.mxu0 %v2159_v0  ;;  %2051 = vmatprep.subr.bf16.mxu1 %v2159_v0 }
  0xcb   :  { %2036 = vmatpush3.bf16.msra.mxu0 %v2451_v46  ;;  %2052 = vmatpush3.bf16.msra.mxu1 %v2615_v13 }
  0xcc   :  { %2037 = vmatprep.subr.bf16.mxu0 %v2159_v0  ;;  %2053 = vmatprep.subr.bf16.mxu1 %v2159_v0 }
  0xcf   :  { %2038 = vmatpush3.bf16.msra.mxu0 %v2465_v48  ;;  %2054 = vmatpush3.bf16.msra.mxu1 %v2629_v27 }
  0xd0   :  { %2039 = vmatprep.subr.bf16.mxu0 %v2159_v0  ;;  %2055 = vmatprep.subr.bf16.mxu1 %v2159_v0 }
  0xd3   :  { %2040 = vmatpush3.bf16.msra.mxu0 %v2479_v50  ;;  %2056 = vmatpush3.bf16.msra.mxu1 %v2643_v33 }
  0xd4   :  { %2041 = vmatprep.subr.bf16.mxu0 %v2159_v0  ;;  %2057 = vmatprep.subr.bf16.mxu1 %v2159_v0 }
  0xd7   :  { %2042 = vmatpush3.bf16.msra.mxu0 %v2493_v52  ;;  %2058 = vmatpush3.bf16.msra.mxu1 %v2657_v37 }
  0xd8   :  { %2063 = vmatprep.subr.bf16.mxu0 %v2159_v0  ;;  %2079 = vmatprep.subr.bf16.mxu1 %v2159_v0 }
  0xda   :  { %v125_v3 = vpop.f32.mrf.mxu0  ;;  %2044 = vmatmul.mubr.msk.bf16.vlgmr.msra.gmra.mxu0 %vm83_vm2, %v2289_v18  ;;  %v210_v4 = vpop.f32.mrf.mxu1  ;;  %2060 = vmatmul.mubr.msk.bf16.vlgmr.msra.gmra.mxu1 %vm83_vm2, %v2283_v17 }
  0xdb   :  { %2064 = vmatpush3.bf16.msra.mxu0 %v2371_v32  ;;  %v211_v5 = vadd.f32 %v210_v4, %v125_v3  ;;  %2080 = vmatpush3.bf16.msra.mxu1 %v2362_v30 }
  0xdc   :  { %v1789_v6 = vpop.f32.mrf.mxu0  ;;  %2065 = vmatprep.subr.bf16.mxu0 %v2159_v0  ;;  %v1805_v7 = vpop.f32.mrf.mxu1  ;;  %2081 = vmatprep.subr.bf16.mxu1 %v2159_v0 }
  0xdd   :  { %2075 = vmatprep.mubr.msk.bf16.mxu0 %vm2160_vm1, %v2159_v0  ;;  %2091 = vmatprep.mubr.msk.bf16.mxu1 %vm2160_vm1, %v2159_v0 }
  0xde   :  { %v128_v8 = vpop.f32.mrf.mxu0  ;;  %v213_v9 = vpop.f32.mrf.mxu1 }
  0xdf   :  { %2066 = vmatpush3.bf16.msra.mxu0 %v2515_v54  ;;  %v214_v10 = vadd.f32 %v213_v9, %v128_v8  ;;  %2082 = vmatpush3.bf16.msra.mxu1 %v2508_v53 }
  0xe0   :  { %v1790_v11 = vpop.f32.mrf.mxu0  ;;  %2067 = vmatprep.subr.bf16.mxu0 %v2159_v0  ;;  %v1806_v12 = vpop.f32.mrf.mxu1  ;;  %2083 = vmatprep.subr.bf16.mxu1 %v2159_v0 }
  0xe3   :  { %2068 = vmatpush3.bf16.msra.mxu0 %v2533_v56  ;;  %2084 = vmatpush3.bf16.msra.mxu1 %v2526_v55 }
  0xe4   :  { %2069 = vmatprep.subr.bf16.mxu0 %v2159_v0  ;;  %2085 = vmatprep.subr.bf16.mxu1 %v2159_v0 }
  0xe7   :  { %2070 = vmatpush3.bf16.msra.mxu0 %v2547_v58  ;;  %2086 = vmatpush3.bf16.msra.mxu1 %v2540_v57 }
  0xe8   :  { %2071 = vmatprep.subr.bf16.mxu0 %v2159_v0  ;;  %2087 = vmatprep.subr.bf16.mxu1 %v2159_v0 }
  0xeb   :  { %2072 = vmatpush3.bf16.msra.mxu0 %v2561_v60  ;;  %2088 = vmatpush3.bf16.msra.mxu1 %v2554_v59 }
  0xec   :  { %2073 = vmatprep.subr.bf16.mxu0 %v2159_v0  ;;  %2089 = vmatprep.subr.bf16.mxu1 %v2159_v0 }
  0xef   :  { %2074 = vmatpush3.bf16.msra.mxu0 %v2575_v62  ;;  %2090 = vmatpush3.bf16.msra.mxu1 %v2568_v61 }
  0xf2   :  { %v311_v14 = vpop.f32.mrf.mxu0  ;;  %2076 = vmatmul.mubr.msk.bf16.vlgmr.msra.gmra.mxu0 %vm83_vm2, %v2289_v18  ;;  %v388_v16 = vpop.f32.mrf.mxu1  ;;  %2092 = vmatmul.mubr.msk.bf16.vlgmr.msra.gmra.mxu1 %vm83_vm2, %v2283_v17 }
  0xf3   :  { %v389_v19 = vadd.f32 %v388_v16, %v311_v14 }
  0xf4   :  { %v1821_v20 = vpop.f32.mrf.mxu0  ;;  %v1837_v21 = vpop.f32.mrf.mxu1 }
  0xf5   :  { %v487_v26 = vrot.slane %v389_v19, 1 }
  0xf6   :  { %v314_v22 = vpop.f32.mrf.mxu0  ;;  %v391_v23 = vpop.f32.mrf.mxu1 }
  0xf7   :  { %v392_v24 = vadd.f32 %v391_v23, %v314_v22 }
  0xf8   :  { %v1822_v25 = vpop.f32.mrf.mxu0  ;;  %v1838_v0 = vpop.f32.mrf.mxu1 }
  0xf9   :  { %v488_v29 = vrot.slane %v392_v24, 1 }
  0xfb   :  { %v489_v30 = vsel %vm486_vm3, %v487_v26, %v488_v29  ;;  %v492_v31 = vsel %vm486_vm3, %v488_v29, 0.0 }
  0xfc   :  { %v493_v18 = vadd.f32 %v489_v30, %v211_v5  ;;  %v494_v32 = vadd.f32 %v492_v31, %v214_v10 }
 0x10a   :  { %v477_v34 = vpop.f32.mrf.mxu0  ;;  %v600_v36 = vpop.f32.mrf.mxu1 }
 0x10b   :  { %v498_v40 = vrot.slane %v477_v34, 2 }
 0x10c   :  { %v1853_v17 = vpop.f32.mrf.mxu0  ;;  %v1869_v38 = vpop.f32.mrf.mxu1 }
 0x10e   :  { %v480_v39 = vpop.f32.mrf.mxu0  ;;  %v603_v42 = vpop.f32.mrf.mxu1 }
 0x10f   :  { %v499_v41 = vrot.slane %v480_v39, 2 }
 0x110   :  { %v1854_v43 = vpop.f32.mrf.mxu0  ;;  %v1870_v46 = vpop.f32.mrf.mxu1 }
 0x111   :  { %v500_v44 = vsel %vm497_vm4, %v498_v40, %v499_v41  ;;  %v503_v45 = vsel %vm497_vm4, %v499_v41, 0.0 }
 0x112   :  { %v2830_v47 = vadd.f32 %v500_v44, %v493_v18  ;;  %v2832_v48 = vadd.f32 %v503_v45, %v494_v32 }
 0x122   :  { %v677_v49 = vpop.f32.mrf.mxu0  ;;  %v778_v51 = vpop.f32.mrf.mxu1 }
 0x123   :  { %v678_v50 = vadd.f32 %v677_v49, %v600_v36 }
 0x124   :  { %v1885_v52 = vpop.f32.mrf.mxu0  ;;  %v1901_v53 = vpop.f32.mrf.mxu1 }
 0x126   :  { %v680_v54 = vpop.f32.mrf.mxu0  ;;  %v781_v56 = vpop.f32.mrf.mxu1 }
 0x127   :  { %v681_v55 = vadd.f32 %v680_v54, %v603_v42 }
 0x128   :  { %v1886_v57 = vpop.f32.mrf.mxu0  ;;  %v1902_v58 = vpop.f32.mrf.mxu1 }
 0x13a   :  { %v855_v59 = vpop.f32.mrf.mxu0  ;;  %v944_v61 = vpop.f32.mrf.mxu1 }
 0x13b   :  { %v856_v60 = vadd.f32 %v855_v59, %v778_v51  ;;  %v963_v1 = vrot.slane %v944_v61, 2 }
 0x13c   :  { %v1917_v62 = vpop.f32.mrf.mxu0  ;;  %v1933_v63 = vpop.f32.mrf.mxu1 }
 0x13d   :  { %v953_v33 = vrot.slane %v856_v60, 1 }
 0x13e   :  { %v858_v2 = vpop.f32.mrf.mxu0  ;;  %v947_v15 = vpop.f32.mrf.mxu1 }
 0x13f   :  { %v859_v13 = vadd.f32 %v858_v2, %v781_v56  ;;  %v964_v27 = vrot.slane %v947_v15, 2 }
 0x140   :  { %v1918_v28 = vpop.f32.mrf.mxu0  ;;  %v1934_v37 = vpop.f32.mrf.mxu1 }
 0x141   :  { %v954_v35 = vrot.slane %v859_v13, 1  ;;  %v965_v3 = vsel %vm497_vm4, %v963_v1, %v964_v27  ;;  %v968_v8 = vsel %vm497_vm4, %v964_v27, 0.0 }
 0x143   :  { %v955_v4 = vsel %vm486_vm3, %v953_v33, %v954_v35  ;;  %v958_v5 = vsel %vm486_vm3, %v954_v35, 0.0 }
 0x144   :  { %v959_v6 = vadd.f32 %v955_v4, %v678_v50  ;;  %v960_v7 = vadd.f32 %v958_v5, %v681_v55 }
 0x146   :  { %v2838_v9 = vadd.f32 %v965_v3, %v959_v6  ;;  %v2840_v10 = vadd.f32 %v968_v8, %v960_v7 }
 0x148   :  { %v1417_v11 = vmax.f32 %v2830_v47, %v2838_v9  ;;  %v1418_v12 = vmax.f32 %v2832_v48, %v2840_v10 }
 0x152   :  { %v1005_v14 = vpop.f32.mrf.mxu0  ;;  %v1046_v16 = vpop.f32.mrf.mxu1 }
 0x153   :  { %v1047_v19 = vadd.f32 %v1046_v16, %v1005_v14 }
 0x154   :  { %v1949_v20 = vpop.f32.mrf.mxu0  ;;  %v1965_v21 = vpop.f32.mrf.mxu1 }
 0x155   :  { %v1137_v26 = vrot.slane %v1047_v19, 1 }
 0x156   :  { %v1008_v22 = vpop.f32.mrf.mxu0  ;;  %v1049_v23 = vpop.f32.mrf.mxu1 }
 0x157   :  { %v1050_v24 = vadd.f32 %v1049_v23, %v1008_v22 }
 0x158   :  { %v1950_v25 = vpop.f32.mrf.mxu0  ;;  %v1966_v0 = vpop.f32.mrf.mxu1 }
 0x159   :  { %v1138_v29 = vrot.slane %v1050_v24, 1 }
 0x15b   :  { %v1139_v30 = vsel %vm486_vm3, %v1137_v26, %v1138_v29  ;;  %v1142_v53 = vsel %vm486_vm3, %v1138_v29, 0.0 }
 0x16a   :  { %v1087_v31 = vpop.f32.mrf.mxu0  ;;  %v1128_v18 = vpop.f32.mrf.mxu1 }
 0x16b   :  { %v1129_v32 = vadd.f32 %v1128_v18, %v1087_v31 }
 0x16c   :  { %v1981_v34 = vpop.f32.mrf.mxu0  ;;  %v1997_v36 = vpop.f32.mrf.mxu1 }
 0x16d   :  { %v1186_v42 = vrot.slane %v1129_v32, 2  ;;  %v1630_v34 = vld [vmem:[%s2872_s3] ss:$0 sm:$0xff] }
 0x16e   :  { %v1090_v17 = vpop.f32.mrf.mxu0  ;;  %v1131_v38 = vpop.f32.mrf.mxu1 }
 0x16f   :  { %v1132_v39 = vadd.f32 %v1131_v38, %v1090_v17 }
 0x170   :  { %v1982_v40 = vpop.f32.mrf.mxu0  ;;  %v1998_v41 = vpop.f32.mrf.mxu1 }
 0x171   :  { %v1187_v43 = vrot.slane %v1132_v39, 2 }
 0x173   :  { %v1188_v44 = vsel %vm497_vm4, %v1186_v42, %v1187_v43  ;;  %v1191_v57 = vsel %vm497_vm4, %v1187_v43, 0.0 }
 0x182   :  { %v1177_v45 = vpop.f32.mrf.mxu0  ;;  %v1228_v49 = vpop.f32.mrf.mxu1 }
 0x183   :  { %v1178_v46 = vadd.f32 %v1177_v45, %v1139_v30 }
 0x184   :  { %v2013_v50 = vpop.f32.mrf.mxu0  ;;  %v2029_v52 = vpop.f32.mrf.mxu1 }
 0x185   :  { %v1192_v51 = vadd.f32 %v1188_v44, %v1178_v46 }
 0x186   :  { %v1180_v54 = vpop.f32.mrf.mxu0  ;;  %v1231_v56 = vpop.f32.mrf.mxu1 }
 0x187   :  { %v1181_v55 = vadd.f32 %v1180_v54, %v1142_v53 }
 0x188   :  { %v2014_v58 = vpop.f32.mrf.mxu0  ;;  %v2030_v60 = vpop.f32.mrf.mxu1 }
 0x189   :  { %v1193_v59 = vadd.f32 %v1191_v57, %v1181_v55 }
 0x19a   :  { %v1269_v61 = vpop.f32.mrf.mxu0  ;;  %v1310_v62 = vpop.f32.mrf.mxu1 }
 0x19b   :  { %v1270_v35 = vadd.f32 %v1269_v61, %v1228_v49 }
 0x19c   :  { %v2045_v63 = vpop.f32.mrf.mxu0  ;;  %v2061_v1 = vpop.f32.mrf.mxu1 }
 0x19d   :  { %v1360_v8 = vrot.slane %v1270_v35, 1 }
 0x19e   :  { %v1272_v2 = vpop.f32.mrf.mxu0  ;;  %v1313_v13 = vpop.f32.mrf.mxu1 }
 0x19f   :  { %v1273_v28 = vadd.f32 %v1272_v2, %v1231_v56 }
 0x1a0   :  { %v2046_v15 = vpop.f32.mrf.mxu0  ;;  %v2062_v27 = vpop.f32.mrf.mxu1 }
 0x1a1   :  { %v1361_v4 = vrot.slane %v1273_v28, 1 }
 0x1a3   :  { %v1362_v21 = vsel %vm486_vm3, %v1360_v8, %v1361_v4  ;;  %v1365_v23 = vsel %vm486_vm3, %v1361_v4, 0.0 }
 0x1b2   :  { %v1351_v33 = vpop.f32.mrf.mxu0  ;;  %v1400_v37 = vpop.f32.mrf.mxu1 }
 0x1b3   :  { %v1352_v5 = vadd.f32 %v1351_v33, %v1310_v62  ;;  %v1401_v25 = vadd.f32 %v1400_v37, %v1362_v21 }
 0x1b4   :  { %v2077_v3 = vpop.f32.mrf.mxu0  ;;  %v2093_v6 = vpop.f32.mrf.mxu1 }
 0x1b5   :  { %v1409_v20 = vrot.slane %v1352_v5, 2 }
 0x1b6   :  { %v1354_v7 = vpop.f32.mrf.mxu0  ;;  %v1403_v16 = vpop.f32.mrf.mxu1 }
 0x1b7   :  { %v1355_v14 = vadd.f32 %v1354_v7, %v1313_v13  ;;  %v1404_v0 = vadd.f32 %v1403_v16, %v1365_v23 }
 0x1b8   :  { %v2078_v19 = vpop.f32.mrf.mxu0  ;;  %v2094_v24 = vpop.f32.mrf.mxu1 }
 0x1b9   :  { %v1410_v22 = vrot.slane %v1355_v14, 2 }
 0x1bb   :  { %v1411_v26 = vsel %vm497_vm4, %v1409_v20, %v1410_v22  ;;  %v1414_v29 = vsel %vm497_vm4, %v1410_v22, 0.0 }
 0x1bc   :  { %v1415_v30 = vadd.f32 %v1411_v26, %v1401_v25  ;;  %v1416_v31 = vadd.f32 %v1414_v29, %v1404_v0 }
 0x1be   :  { %v1419_v18 = vmax.f32 %v1192_v51, %v1415_v30  ;;  %v1420_v32 = vmax.f32 %v1193_v59, %v1416_v31 }
 0x1c0   :  { %v1421_v36 = vmax.f32 %v1417_v11, %v1419_v18  ;;  %v1422_v17 = vmax.f32 %v1418_v12, %v1420_v32 }
 0x1c2   :  { %v1430_v38 = vadd.f32 %v1630_v34, %v1421_v36  ;;  %v1431_v39 = vadd.f32 %v1630_v34, %v1422_v17 }
 0x1c4   :  { %v1432_v40 = vmax.f32 %v1430_v38, 0.0  ;;  %v1433_v41 = vmax.f32 %v1431_v39, 0.0 }
 0x1c6   :  { %v1633_v42 = vpack.c.bf16 %v1432_v40, %v1432_v40  ;;  %v1634_v43 = vpack.c.bf16 %v1433_v41, %v1433_v41 }
 0x1c8   :  { %1443 = vst.msk [vmem:[%s2873_s4] sm:$0xf] %vm1442_vm5, %v1633_v42  ;;  %1444 = vst.msk [vmem:[%s2873_s4 + $0x4] sm:$0xf] %vm1442_vm5, %v1634_v43 }

// kernel: lenet_cifar10_forward.5
= control target key start
LH: loop header
LB: loop body
LE: loop exit
PB: predicated region body
PF: predicated region fallthrough
CT: control target
= control target key end

     0   :  { %v804_v1 = vmov 0   ;;  %v98_v20 = vlaneseq  ;;  %v805_v25 = vmov 1966171168   ;;  %vm264_vm0 = vcmask 130048   ;;  %s1016_s0 = inlined_call_operand.vmem [shape: bf16[2,400], index: 0, kind: input, shape index: {}]   ;;  %s1017_s1 = inlined_call_operand.vmem [shape: bf16[400,128], index: 1, kind: input, shape index: {}]   ;;  %s1018_s2 = inlined_call_operand.vmem [shape: f32[1,128], index: 2, kind: input, shape index: {}]   ;;  %s1019_s3 = inlined_call_operand.vmem [shape: bf16[128,128], index: 3, kind: input, shape index: {}]   ;;  %s1020_s4 = inlined_call_operand.vmem [shape: f32[1,128], index: 4, kind: input, shape index: {}]   ;;  %s1021_s5 = inlined_call_operand.vmem [shape: bf16[128,128], index: 5, kind: input, shape index: {}]   ;;  %s1022_s6 = inlined_call_operand.vmem [shape: f32[1,128], index: 6, kind: input, shape index: {}]   ;;  %s1023_s7 = inlined_call_operand.hbm [shape: f32[2,128], index: 7, kind: output, shape index: {}]  }
   0x1   :  { %v737_v0 = vld [vmem:[%s1017_s1 + $0x78] sm:$0xff]   ;;  %308 = vmatprep.subr.bf16.mxu1 %v804_v1  ;;  %v740_v4 = vld [vmem:[%s1017_s1 + $0x70] sm:$0xff]   ;;  %v743_v7 = vld [vmem:[%s1017_s1 + $0x68] sm:$0xff]   ;;  %v96_v26 = vunpack.c.l.s4 %v805_v25  ;;  %v806_v38 = vmov 0.0  }
   0x2   :  { %v738_v2 = vld [vmem:[%s1017_s1 + $0xb8] sm:$0xff]   ;;  %652 = vmatprep.subr.bf16.mxu0 %v737_v0  ;;  %v741_v5 = vld [vmem:[%s1017_s1 + $0xb0] sm:$0xff]   ;;  %v744_v8 = vld [vmem:[%s1017_s1 + $0xa8] sm:$0xff]   ;;  %v99_v27 = vshrl.u32 %v98_v20, 7 }
   0x3   :  { %v739_v3 = vld [vmem:[%s1017_s1 + $0x38] sm:$0xff]   ;;  %309 = vmatpush1.bf16.msra.mxu1 %v738_v2  ;;  %v742_v6 = vld [vmem:[%s1017_s1 + $0x30] sm:$0xff]   ;;  %v745_v9 = vld [vmem:[%s1017_s1 + $0x28] sm:$0xff]   ;;  %v97_v30 = vunpack.c.0.s8 %v96_v26 }
   0x4   :  { %653 = vmatpush3.bf16.msra.mxu0 %v739_v3  ;;  %310 = vmatprep.subr.bf16.mxu1 %v804_v1  ;;  %v746_v10 = vld [vmem:[%s1017_s1 + $0x60] sm:$0xff]   ;;  %v749_v13 = vld [vmem:[%s1017_s1 + $0x58] sm:$0xff]   ;;  %v752_v16 = vld [vmem:[%s1017_s1 + $0x50] sm:$0xff]  }
   0x5   :  { %654 = vmatprep.subr.bf16.mxu0 %v740_v4  ;;  %v747_v11 = vld [vmem:[%s1017_s1 + $0xa0] sm:$0xff]   ;;  %v750_v14 = vld [vmem:[%s1017_s1 + $0x98] sm:$0xff]   ;;  %v753_v17 = vld [vmem:[%s1017_s1 + $0x90] sm:$0xff]   ;;  %v100_v32 = vsub.s32 %v97_v30, %v99_v27 }
   0x6   :  { %v748_v12 = vld [vmem:[%s1017_s1 + $0x20] sm:$0xff]   ;;  %v751_v15 = vld [vmem:[%s1017_s1 + $0x18] sm:$0xff]   ;;  %v754_v18 = vld [vmem:[%s1017_s1 + $0x10] sm:$0xff]  }
   0x7   :  { %311 = vmatpush1.bf16.msra.mxu1 %v741_v5  ;;  %v755_v19 = vld [vmem:[%s1017_s1 + $0x48] sm:$0xff]   ;;  %v607_v23 = vld.sshfl [vmem:[%s1016_s0] sm:$0x33 pattern:$0x75316420]  ;;  %v762_v34 = vld [vmem:[%s1019_s3 + $0x38] sm:$0xff]  }
   0x8   :  { %655 = vmatpush3.bf16.msra.mxu0 %v742_v6  ;;  %312 = vmatprep.subr.bf16.mxu1 %v804_v1  ;;  %v756_v21 = vld [vmem:[%s1017_s1 + $0x88] sm:$0xff]   ;;  %v758_v24 = vld [vmem:[%s1017_s1 + $0x40] sm:$0xff]   ;;  %v94_v29 = vcombine.high %v607_v23, %v607_v23  ;;  %v101_v36 = vrot.slane %v607_v23, %v100_v32  ;;  %v763_v40 = vld [vmem:[%s1019_s3 + $0x30] sm:$0xff]  }
   0x9   :  { %656 = vmatprep.subr.bf16.mxu0 %v743_v7  ;;  %v757_v22 = vld [vmem:[%s1017_s1 + $0x8] sm:$0xff]   ;;  %v759_v28 = vld [vmem:[%s1017_s1 + $0x80] sm:$0xff]  }
   0xa   :  { %v760_v31 = vld [vmem:[%s1017_s1] sm:$0xff]   ;;  %v108_v35 = vrot.slane %v94_v29, %v100_v32  ;;  %v109_v39 = vcombine.high %v101_v36, %v101_v36 }
   0xb   :  { %313 = vmatpush1.bf16.msra.mxu1 %v744_v8  ;;  %v761_v33 = vld [vmem:[%s1017_s1 + $0xc0] sm:$0xff]  }
   0xc   :  { %657 = vmatpush3.bf16.msra.mxu0 %v745_v9  ;;  %314 = vmatprep.subr.bf16.mxu1 %v804_v1  ;;  %v110_v37 = vcombine.high %v108_v35, %v108_v35 }
   0xd   :  { %658 = vmatprep.subr.bf16.mxu0 %v746_v10  ;;  %300 = vmatprep.mubr.bf16.mxu0 %v108_v35 }
   0xe   :  { %633 = vmatprep.mubr.msk.bf16.mxu1 %vm264_vm0, %v110_v37 }
   0xf   :  { %315 = vmatpush1.bf16.msra.mxu1 %v747_v11 }
  0x10   :  { %659 = vmatpush3.bf16.msra.mxu0 %v748_v12  ;;  %316 = vmatprep.subr.bf16.mxu1 %v804_v1 }
  0x11   :  { %660 = vmatprep.subr.bf16.mxu0 %v749_v13 }
  0x13   :  { %317 = vmatpush1.bf16.msra.mxu1 %v750_v14 }
  0x14   :  { %661 = vmatpush3.bf16.msra.mxu0 %v751_v15  ;;  %318 = vmatprep.subr.bf16.mxu1 %v804_v1 }
  0x15   :  { %662 = vmatprep.subr.bf16.mxu0 %v752_v16 }
  0x17   :  { %319 = vmatpush1.bf16.msra.mxu1 %v753_v17 }
  0x18   :  { %663 = vmatpush3.bf16.msra.mxu0 %v754_v18  ;;  %320 = vmatprep.subr.bf16.mxu1 %v804_v1 }
  0x19   :  { %664 = vmatprep.subr.bf16.mxu0 %v755_v19 }
  0x1b   :  { %321 = vmatpush1.bf16.msra.mxu1 %v756_v21 }
  0x1c   :  { %665 = vmatpush3.bf16.msra.mxu0 %v757_v22  ;;  %322 = vmatprep.subr.bf16.mxu1 %v804_v1 }
  0x1d   :  { %666 = vmatprep.subr.bf16.mxu0 %v758_v24 }
  0x1f   :  { %323 = vmatpush1.bf16.msra.mxu1 %v759_v28 }
  0x20   :  { %667 = vmatpush3.bf16.msra.mxu0 %v760_v31  ;;  %338 = vmatprep.subr.bf16.mxu1 %v804_v1 }
  0x21   :  { %692 = vmatprep.subr.bf16.mxu0 %v806_v38 }
  0x23   :  { %301 = vmatmul.mubr.bf16.vlgmr.msra.gmra.mxu0 %v101_v36  ;;  %339 = vmatpush2.bf16.msra.mxu1 %v761_v33 }
  0x24   :  { %693 = vmatpush3.bf16.msra.mxu0 %v762_v34  ;;  %712 = vmatprep.subr.bf16.mxu1 %v806_v38 }
  0x25   :  { %694 = vmatprep.subr.bf16.mxu0 %v806_v38 }
  0x26   :  { %341 = vmatmul.mubr.bf16.vlgmr.msra.gmra.mxu1 %v109_v39 }
  0x27   :  { %12 = vsyncpa [#allocation3], 0  ;;  %v764_v41 = vld [vmem:[%s1019_s3 + $0x28] sm:$0xff]   ;;  %v765_v42 = vld [vmem:[%s1019_s3 + $0x20] sm:$0xff]   ;;  %vm807_vm1 = vmmov 0   ;;  %v575_v13 = vand.u32 127, %v98_v20 }
  0x28   :  { %695 = vmatpush3.bf16.msra.mxu0 %v763_v40  ;;  %v766_v43 = vld [vmem:[%s1019_s3 + $0x18] sm:$0xff]   ;;  %v767_v44 = vld [vmem:[%s1019_s3 + $0x10] sm:$0xff]   ;;  %v768_v45 = vld [vmem:[%s1019_s3 + $0x8] sm:$0xff]   ;;  %708 = vmatprep.mubr.msk.bf16.mxu0 %vm807_vm1, %v806_v38  ;;  %vm578_vm3 = vcmask 1041408  }
  0x29   :  { %696 = vmatprep.subr.bf16.mxu0 %v806_v38  ;;  %v769_v46 = vld [vmem:[%s1019_s3] sm:$0xff]   ;;  %728 = vmatprep.mubr.msk.bf16.mxu1 %vm807_vm1, %v806_v38  ;;  %v770_v47 = vld [vmem:[%s1021_s5 + $0x38] sm:$0xff]   ;;  %v771_v48 = vld [vmem:[%s1021_s5 + $0x30] sm:$0xff]   ;;  %vm576_vm2 = vcmp.lt.s32.totalorder %v575_v13, 10 }
  0x2a   :  { %713 = vmatpush3.bf16.msra.mxu1 %v770_v47  ;;  %v772_v49 = vld [vmem:[%s1021_s5 + $0x28] sm:$0xff]   ;;  %v773_v50 = vld [vmem:[%s1021_s5 + $0x20] sm:$0xff]   ;;  %v774_v51 = vld [vmem:[%s1021_s5 + $0x18] sm:$0xff]  }
  0x2b   :  { %714 = vmatprep.subr.bf16.mxu1 %v806_v38  ;;  %v775_v52 = vld [vmem:[%s1021_s5 + $0x10] sm:$0xff]   ;;  %v606_v55 = vld [vmem:[%s1018_s2] ss:$0 sm:$0xff]  ;;  %v776_v3 = vld [vmem:[%s1021_s5 + $0x8] sm:$0xff]  }
  0x2c   :  { %697 = vmatpush3.bf16.msra.mxu0 %v764_v41  ;;  %v777_v4 = vld [vmem:[%s1021_s5] sm:$0xff]  }
  0x2d   :  { %698 = vmatprep.subr.bf16.mxu0 %v806_v38  ;;  %v634_v5 = vld [vmem:[%s1020_s4] ss:$0 sm:$0xff]  ;;  %s808_s4 = smov [#allocation2]  }
  0x2e   :  { %715 = vmatpush3.bf16.msra.mxu1 %v771_v48  ;;  %v643_v14 = vld [vmem:[%s1022_s6] ss:$0 sm:$0xff]  ;;  %s598_s5 = sshll.u32 %s808_s4, 4  ;;  %s599_s5 = int_to_ptr.vmem [resolvable:$true] %s598_s5 }
  0x2f   :  { %716 = vmatprep.subr.bf16.mxu1 %v806_v38  ;;  %s782_s6 = scalar_lea.vmem %s599_s5, 32  ;;  %p787_p1 = scmp.lt.s32.totalorder %s599_s5, %s599_s5 }
  0x30   :  { %699 = vmatpush3.bf16.msra.mxu0 %v765_v42  ;;  %p783_p0 = scmp.ne.s32.totalorder %s599_s5, %s782_s6  ;;  %p788_p2 = scmp.lt.s32.totalorder %s782_s6, %s782_s6 }
  0x31   :  { %700 = vmatprep.subr.bf16.mxu0 %v806_v38 }
  0x32   :  { %717 = vmatpush3.bf16.msra.mxu1 %v772_v49  ;;  %p789_p3 = por %p788_p2, %p787_p1 }
  0x33   :  { %718 = vmatprep.subr.bf16.mxu1 %v806_v38 }
  0x34   :  { %701 = vmatpush3.bf16.msra.mxu0 %v766_v43  ;;  %p790_p4 = pnand %p789_p3, %p783_p0 }
  0x35   :  { %702 = vmatprep.subr.bf16.mxu0 %v806_v38 }
  0x36   :  { %719 = vmatpush3.bf16.msra.mxu1 %v773_v50 }
  0x37   :  { %720 = vmatprep.subr.bf16.mxu1 %v806_v38 }
  0x38   :  { %703 = vmatpush3.bf16.msra.mxu0 %v767_v44 }
  0x39   :  { %704 = vmatprep.subr.bf16.mxu0 %v806_v38 }
  0x3a   :  { %721 = vmatpush3.bf16.msra.mxu1 %v774_v51 }
  0x3b   :  { %722 = vmatprep.subr.bf16.mxu1 %v806_v38 }
  0x3c   :  { %705 = vmatpush3.bf16.msra.mxu0 %v768_v45 }
  0x3d   :  { %706 = vmatprep.subr.bf16.mxu0 %v806_v38 }
  0x3e   :  { %723 = vmatpush3.bf16.msra.mxu1 %v775_v52 }
  0x3f   :  { %724 = vmatprep.subr.bf16.mxu1 %v806_v38 }
  0x40   :  { %707 = vmatpush3.bf16.msra.mxu0 %v769_v46 }
  0x42   :  { %725 = vmatpush3.bf16.msra.mxu1 %v776_v3 }
  0x43   :  { %726 = vmatprep.subr.bf16.mxu1 %v806_v38 }
  0x46   :  { %727 = vmatpush3.bf16.msra.mxu1 %v777_v4 }
  0xe3   :  { %v668_v53 = vpop.f32.mrf.mxu0 }
  0xe5   :  { %v669_v54 = vpop.f32.mrf.mxu0 }
  0xe6   :  { %v670_v56 = vadd.f32 %v669_v54, %v668_v53  ;;  %v342_v57 = vpop.f32.mrf.mxu1 }
  0xe7   :  { %v671_v58 = vpop.f32.mrf.mxu0 }
  0xe8   :  { %v303_v59 = vadd.f32 %v670_v56, %v606_v55  ;;  %v344_v60 = vpop.f32.mrf.mxu1 }
  0xe9   :  { %v672_v61 = vpop.f32.mrf.mxu0 }
  0xea   :  { %v343_v62 = vadd.f32 %v342_v57, %v303_v59  ;;  %v345_v63 = vpop.f32.mrf.mxu1 }
  0xec   :  { %v348_v0 = vmax.f32 %v343_v62, 0.0  ;;  %v346_v1 = vpop.f32.mrf.mxu1 }
  0xee   :  { %v349_v2 = vpack.c.bf16 %v348_v0, %v348_v0 }
  0xf0   :  { %709 = vmatmul.mubr.bf16.vlgmr.msra.gmra.mxu0 %v349_v2 }
 0x1b0   :  { %v455_v6 = vpop.f32.mrf.mxu0 }
 0x1b1   :  { %v456_v7 = vadd.f32 %v634_v5, %v455_v6 }
 0x1b2   :  { %v710_v8 = vpop.f32.mrf.mxu0 }
 0x1b3   :  { %v461_v9 = vmax.f32 %v456_v7, 0.0 }
 0x1b4   :  { %v458_v10 = vpop.f32.mrf.mxu0 }
 0x1b5   :  { %v462_v11 = vpack.c.bf16 %v461_v9, %v461_v9 }
 0x1b6   :  { %v711_v12 = vpop.f32.mrf.mxu0 }
 0x1b7   :  { %729 = vmatmul.mubr.bf16.vlgmr.msra.gmra.mxu1 %v462_v11 }
 0x277   :  { %v568_v15 = vpop.f32.mrf.mxu1 }
 0x278   :  { %v569_v16 = vadd.f32 %v643_v14, %v568_v15 }
 0x279   :  { %v730_v17 = vpop.f32.mrf.mxu1 }
 0x27a   :  { %v577_v18 = vsel %vm576_vm2, %v569_v16, -1e+30 }
 0x27b   :  { %v571_v19 = vpop.f32.mrf.mxu1  ;;  %v579_v21 = vsel %vm578_vm3, %v577_v18, -inf }
 0x27c   :  { %580 = vmax.xlane.f32.xlu0 %v579_v21 }
 0x27d   :  { %v731_v22 = vpop.f32.mrf.mxu1 }
 0x305   :  { %v581_v23 = vpop.xlane.xlu0 %580 }
 0x306   :  { %v582_v24 = vsub.f32 %v577_v18, %v581_v23 }
 0x308   :  { %v583_v25 = vmul.f32 1.442695, %v582_v24 }
 0x30a   :  { %778 = vpow2.f32 %v583_v25 }
 0x317   :  { %v779_v26 = vpop.eup %778 }
 0x318   :  { %v585_v20 = vsel %vm578_vm3, %v779_v26, 0.0 }
 0x319   :  { %586 = vadd.xlane.f32.xlu0 %v585_v20 }
 0x3a2   :  { %v587_v27 = vpop.xlane.xlu0 %586 }
 0x3a3   :  { %780 = vlog2.f32 %v587_v27 }
 0x3b0   :  { %v781_v28 = vpop.eup %780 }
 0x3b1   :  { %v589_v29 = vmul.f32 0.6931472, %v781_v28 }
 0x3b3   :  { %v590_v30 = vsub.f32 %v582_v24, %v589_v29 }
 0x3b5   :  { %591 = vst [vmem:[#allocation2] sm:$0x3] %v590_v30 }
 0x3b6   :  { %793 = shalt.err (!%p790_p4)
}
 0x3b7   :  { %601 = dma.vmem_to_hbm [thread:$0]  %s599_s5, 32, %s1023_s7, [#allocation3]  }
 0x3b8   :  { %802 = dma.done.wait [#allocation3], 32  }
 0x3b9   :  { %803 = vsyncadd [#allocation3], 4294967264 }
 0x3ba   :  { %605 = vsyncpa [#allocation3], 1 }

</bundles_post_ra>
